<compile_context>
chip_gen: v5e
topology: v5e:2x2
jax: 0.10.0
libtpu: 0.0.40
codegen_flags: <defaults>
</compile_context>

<pallas_src>
import functools

import jax
import jax.numpy as jnp
from jax.experimental import pallas as pl
from jax.experimental.pallas import tpu as pltpu

LANE = 128
SUBLANE = 8
NEG_INF = -1e30


def _round_up(x, m):
    return ((x + m - 1) // m) * m


def _node_tiles(num_nodes):
    """Node (sublane) tiling: returns (n_total, tn, n_blocks)."""
    n8 = _round_up(max(num_nodes, 1), SUBLANE)
    if n8 <= 256:
        return n8, n8, 1
    tn = 256
    n_total = _round_up(n8, tn)
    return n_total, tn, n_total // tn


# ---------------------------------------------------------------------------
# Fused kernel: whole window x layer recurrence + decoder + log_softmax
# One grid step == one block of node rows (rows are independent through the
# recurrence), so the grid axis is "parallel".
# ---------------------------------------------------------------------------

def _fused_rnn_kernel(*refs, has_extra_ih, has_init):
    it = iter(refs)
    x_ref = next(it)                               # [1, window*tn, Pin]  bf16 (time-major rows)
    w_ih0_ref = next(it)                           # [Pin, 4P]            bf16
    w_ihr_ref = next(it) if has_extra_ih else None  # [L-1, P, 4P]        bf16
    w_hh_ref = next(it)                            # [L, P, 4P]           bf16
    b_ref = next(it)                               # [L, 1, 4P]           f32
    wdec_ref = next(it)                            # [P, Cp]              bf16
    bdec_ref = next(it)                            # [1, Cp]              f32 (pad cols=-1e30)
    h_init_ref = next(it) if has_init else None    # [L, tn, P]           f32
    c_init_ref = next(it) if has_init else None    # [L, tn, P]           f32
    out_ref = next(it)                             # [tn, Cp]             f32
    h0_h_ref = next(it)                            # [tn, P]              f32
    h0_c_ref = next(it)                            # [tn, P]              f32

    num_layers = w_hh_ref.shape[0]
    p4 = w_hh_ref.shape[-1]
    hp = p4 // 4
    tn = out_ref.shape[0]
    window = x_ref.shape[1] // tn

    # ---- prologue: hoist the layer-0 input projection for the whole window ----
    # Single [window*tn, Pin] @ [Pin, 4P] contraction, off the serial recurrence path.
    xg_all = (
        jnp.dot(x_ref[0], w_ih0_ref[...], preferred_element_type=jnp.float32)
        + b_ref[0]
    )                                              # [window*tn, 4P] f32 (bias folded in)

    # ---- recurrent state lives as values across the (statically unrolled) window ----
    if has_init:
        h = [h_init_ref[l] for l in range(num_layers)]
        c = [c_init_ref[l] for l in range(num_layers)]
    else:
        h = [jnp.zeros((tn, hp), jnp.float32) for _ in range(num_layers)]
        c = [jnp.zeros((tn, hp), jnp.float32) for _ in range(num_layers)]

    for t in range(window):                        # window is small & static -> unroll
        layer_in = None
        for l in range(num_layers):                # few layers -> unroll
            if l == 0:
                gates = xg_all[t * tn:(t + 1) * tn, :] + jnp.dot(
                    h[0].astype(jnp.bfloat16), w_hh_ref[0],
                    preferred_element_type=jnp.float32)
            else:
                gates = (
                    jnp.dot(layer_in.astype(jnp.bfloat16), w_ihr_ref[l - 1],
                            preferred_element_type=jnp.float32)
                    + jnp.dot(h[l].astype(jnp.bfloat16), w_hh_ref[l],
                              preferred_element_type=jnp.float32)
                    + b_ref[l]
                )
            # PyTorch LSTM gate order: i, f, g, o  (f32 gate math; padded cols stay 0)
            i_g = jax.nn.sigmoid(gates[:, 0 * hp:1 * hp])
            f_g = jax.nn.sigmoid(gates[:, 1 * hp:2 * hp])
            g_g = jnp.tanh(gates[:, 2 * hp:3 * hp])
            o_g = jax.nn.sigmoid(gates[:, 3 * hp:4 * hp])
            c[l] = f_g * c[l] + i_g * g_g
            h[l] = o_g * jnp.tanh(c[l])
            layer_in = h[l]
        if t == 0:
            # h0 = [(h, c) of layer 0 after the first step]
            h0_h_ref[...] = h[0]
            h0_c_ref[...] = c[0]

    # ---- fused decoder + log_softmax on the last layer's last-step h ----
    logits = (
        jnp.dot(h[num_layers - 1].astype(jnp.bfloat16), wdec_ref[...],
                preferred_element_type=jnp.float32)
        + bdec_ref[...]
    )
    m = jnp.max(logits, axis=-1, keepdims=True)
    z = logits - m
    lse = jnp.log(jnp.sum(jnp.exp(z), axis=-1, keepdims=True))
    out_ref[...] = z - lse


# ---------------------------------------------------------------------------
# Parameter construction & padding (host side, done once)
# ---------------------------------------------------------------------------

def init_params(key, num_features, hidden_dim, num_classes, num_rnn_layers):
    """PyTorch-layout params, pre-transposed so kernels do (nodes x in) @ (in x 4H)."""
    params = {"lstm": [], "decoder": {}}
    scale = 0.1
    for layer in range(num_rnn_layers):
        in_dim = num_features if layer == 0 else hidden_dim
        key, k1, k2, k3, k4 = jax.random.split(key, 5)
        w_ih_t = scale * jax.random.normal(k1, (in_dim, 4 * hidden_dim), jnp.float32)
        w_hh_t = scale * jax.random.normal(k2, (hidden_dim, 4 * hidden_dim), jnp.float32)
        b_ih = scale * jax.random.normal(k3, (4 * hidden_dim,), jnp.float32)
        b_hh = scale * jax.random.normal(k4, (4 * hidden_dim,), jnp.float32)
        params["lstm"].append(
            {"w_ih_t": w_ih_t, "w_hh_t": w_hh_t,
             "b": (b_ih + b_hh).reshape(1, 4 * hidden_dim)})
    key, k5, k6 = jax.random.split(key, 3)
    params["decoder"]["w_t"] = scale * jax.random.normal(
        k5, (hidden_dim, num_classes), jnp.float32)
    params["decoder"]["b"] = scale * jax.random.normal(
        k6, (1, num_classes), jnp.float32)
    return params


def _pad_gate_cols(w, real_h, pad_h):
    """[rows, 4*real_h] -> [rows, 4*pad_h]; gate k occupies cols [k*pad_h, k*pad_h+real_h)."""
    out = jnp.zeros((w.shape[0], 4 * pad_h), w.dtype)
    for k in range(4):
        out = out.at[:, k * pad_h:k * pad_h + real_h].set(
            w[:, k * real_h:(k + 1) * real_h])
    return out


def _pad_rows(w, pad_rows):
    return jnp.zeros((pad_rows, w.shape[1]), w.dtype).at[:w.shape[0], :].set(w)


def prepare_padded_params(params, num_features, hidden_dim, num_classes):
    """Pad to 128-lane-dense layout, split W_ih / W_hh, cast weights to bf16."""
    num_layers = len(params["lstm"])
    p_in = _round_up(num_features, LANE)     # layer-0 input dim padded independently
    p = _round_up(hidden_dim, LANE)
    c_pad = _round_up(num_classes, LANE)

    lp0 = params["lstm"][0]
    w_ih0 = _pad_rows(_pad_gate_cols(lp0["w_ih_t"], hidden_dim, p),
                      p_in).astype(jnp.bfloat16)                      # [Pin, 4P]

    w_ihr = None
    if num_layers > 1:
        w_ihr = jnp.stack([
            _pad_rows(_pad_gate_cols(params["lstm"][l]["w_ih_t"], hidden_dim, p), p)
            for l in range(1, num_layers)]).astype(jnp.bfloat16)      # [L-1, P, 4P]

    w_hh = jnp.stack([
        _pad_rows(_pad_gate_cols(params["lstm"][l]["w_hh_t"], hidden_dim, p), p)
        for l in range(num_layers)]).astype(jnp.bfloat16)             # [L, P, 4P]

    b = jnp.stack([
        _pad_gate_cols(params["lstm"][l]["b"], hidden_dim, p)
        for l in range(num_layers)]).astype(jnp.float32)              # [L, 1, 4P]

    w_dec = jnp.zeros((p, c_pad), jnp.float32).at[
        :hidden_dim, :num_classes].set(params["decoder"]["w_t"]).astype(jnp.bfloat16)
    b_dec = jnp.full((1, c_pad), NEG_INF, jnp.float32).at[
        :, :num_classes].set(params["decoder"]["b"])

    return {"w_ih0": w_ih0, "w_ihr": w_ihr, "w_hh": w_hh, "b": b,
            "w_dec": w_dec, "b_dec": b_dec,
            "p_in": p_in, "p": p, "c_pad": c_pad, "num_layers": num_layers}


# ---------------------------------------------------------------------------
# Forward pass (one jit, one pallas_call)
# ---------------------------------------------------------------------------

@functools.partial(jax.jit, static_argnames=("hidden_dim", "num_classes"))
def _fused_forward(x_seq, w_ih0, w_ihr, w_hh, b, w_dec, b_dec, h_init, c_init,
                   *, hidden_dim, num_classes):
    window, num_nodes, num_features = x_seq.shape
    num_layers, p, p4 = w_hh.shape
    p_in = w_ih0.shape[0]
    c_pad = w_dec.shape[1]
    n_total, tn, n_blocks = _node_tiles(num_nodes)
    has_extra_ih = w_ihr is not None
    has_init = h_init is not None

    # Host-side prep: cast x to bf16, pad lanes to Pin only, sublane-pad nodes,
    # and lay rows out time-major within each node block: [n_blocks, window*tn, Pin].
    x_pad = jnp.zeros((window, n_total, p_in), jnp.bfloat16)
    x_pad = x_pad.at[:, :num_nodes, :num_features].set(x_seq.astype(jnp.bfloat16))
    x_r = (x_pad.reshape(window, n_blocks, tn, p_in)
           .transpose(1, 0, 2, 3)
           .reshape(n_blocks, window * tn, p_in))

    ops = [x_r, w_ih0]
    in_specs = [
        pl.BlockSpec((1, window * tn, p_in), lambda nb: (nb, 0, 0)),     # x (per node block)
        pl.BlockSpec((p_in, p4), lambda nb: (0, 0)),                     # W_ih layer 0 (resident)
    ]
    if has_extra_ih:
        ops.append(w_ihr)
        in_specs.append(pl.BlockSpec((num_layers - 1, p, p4), lambda nb: (0, 0, 0)))
    ops += [w_hh, b, w_dec, b_dec]
    in_specs += [
        pl.BlockSpec((num_layers, p, p4), lambda nb: (0, 0, 0)),         # W_hh (resident)
        pl.BlockSpec((num_layers, 1, p4), lambda nb: (0, 0, 0)),         # biases
        pl.BlockSpec((p, c_pad), lambda nb: (0, 0)),                     # decoder W
        pl.BlockSpec((1, c_pad), lambda nb: (0, 0)),                     # decoder b
    ]
    if has_init:
        ops += [h_init, c_init]
        in_specs += [pl.BlockSpec((num_layers, tn, p), lambda nb: (0, nb, 0)),
                     pl.BlockSpec((num_layers, tn, p), lambda nb: (0, nb, 0))]

    out_shape = (
        jax.ShapeDtypeStruct((n_total, c_pad), jnp.float32),   # log-probs
        jax.ShapeDtypeStruct((n_total, p), jnp.float32),       # h0: h of layer 0
        jax.ShapeDtypeStruct((n_total, p), jnp.float32),       # h0: c of layer 0
    )
    out_specs = (
        pl.BlockSpec((tn, c_pad), lambda nb: (nb, 0)),
        pl.BlockSpec((tn, p), lambda nb: (nb, 0)),
        pl.BlockSpec((tn, p), lambda nb: (nb, 0)),
    )

    # Advisory cost estimate (helps XLA schedule around the fused call).
    flops = 2 * n_blocks * (
        window * tn * p_in * p4                       # hoisted layer-0 input projection
        + window * num_layers * tn * p * p4           # h @ W_hh
        + window * (num_layers - 1) * tn * p * p4     # layer>=1 input projection
        + tn * p * c_pad)                             # decoder
    transcendentals = n_blocks * (window * num_layers * 5 * tn * p + tn * c_pad)
    in_bytes = (window * n_total * p_in * 2
                + p_in * p4 * 2
                + (num_layers - 1) * p * p4 * 2
                + num_layers * p * p4 * 2
                + num_layers * p4 * 4
                + p * c_pad * 2 + c_pad * 4
                + (2 * num_layers * n_total * p * 4 if has_init else 0))
    out_bytes = 4 * (n_total * c_pad + 2 * n_total * p)
    cost = pl.CostEstimate(flops=flops, transcendentals=transcendentals,
                           bytes_accessed=in_bytes + out_bytes)

    # VMEM budget from the actual per-block resident set (x2 for default double
    # buffering) plus headroom.
    resident = (window * tn * p_in * 2
                + p_in * p4 * 2
                + (num_layers - 1) * p * p4 * 2
                + num_layers * p * p4 * 2
                + num_layers * p4 * 4
                + p * c_pad * 2 + c_pad * 4
                + (2 * num_layers * tn * p * 4 if has_init else 0)
                + tn * c_pad * 4 + 2 * tn * p * 4)
    vmem_limit = int(min(100 * 2 ** 20, 2 * resident + 8 * 2 ** 20))
    # TODO(synk): for large L*hidden (>~32 MiB bf16 weights) stream per-layer weights
    # instead of keeping all layers resident (v7x has only 64 MiB VMEM).

    kernel = functools.partial(_fused_rnn_kernel,
                               has_extra_ih=has_extra_ih, has_init=has_init)

    log_probs, h0_h, h0_c = pl.pallas_call(
        kernel,
        out_shape=out_shape,
        grid=(n_blocks,),
        in_specs=in_specs,
        out_specs=out_specs,
        compiler_params=pltpu.CompilerParams(
            dimension_semantics=("parallel",),       # node blocks are independent
            vmem_limit_bytes=vmem_limit),
        cost_estimate=cost,
    )(*ops)

    output = log_probs[:num_nodes, :num_classes]
    h0 = (h0_h[:num_nodes, :hidden_dim], h0_c[:num_nodes, :hidden_dim])
    return output, h0


def rnn_forward(prepped, x_seq, num_nodes, hidden_dim, num_classes, h0=None):
    """Mirrors RNN.forward for the (default) stacked-LSTM rnn_model.

    x_seq: [window, num_nodes, num_features]
    Returns (log_probs [num_nodes, num_classes], h0_list).
    """
    num_layers = prepped["num_layers"]
    p = prepped["p"]

    if h0 is None:
        h_init = c_init = None       # zero-init is materialised inside the kernel
    else:
        n_total, _, _ = _node_tiles(num_nodes)
        h_init = jnp.zeros((num_layers, n_total, p), jnp.float32)
        c_init = jnp.zeros((num_layers, n_total, p), jnp.float32)
        for layer, (h_l, c_l) in enumerate(h0):
            h_init = h_init.at[layer, :num_nodes, :hidden_dim].set(h_l)
            c_init = c_init.at[layer, :num_nodes, :hidden_dim].set(c_l)

    output, (h0_h, h0_c) = _fused_forward(
        x_seq, prepped["w_ih0"], prepped["w_ihr"], prepped["w_hh"], prepped["b"],
        prepped["w_dec"], prepped["b_dec"], h_init, c_init,
        hidden_dim=hidden_dim, num_classes=num_classes)
    return output, [(h0_h, h0_c)]


# ---------------------------------------------------------------------------
# Pure-JAX reference (f32, PyTorch semantics) for validation
# ---------------------------------------------------------------------------

def _reference_forward(params, x_seq, hidden_dim, num_classes):
    window, n, _ = x_seq.shape
    num_layers = len(params["lstm"])
    hs = [(jnp.zeros((n, hidden_dim), jnp.float32),
           jnp.zeros((n, hidden_dim), jnp.float32)) for _ in range(num_layers)]
    h0_out = None
    for t in range(window):
        layer_in = x_seq[t]
        for l in range(num_layers):
            lp = params["lstm"][l]
            h_prev, c_prev = hs[l]
            gates = layer_in @ lp["w_ih_t"] + h_prev @ lp["w_hh_t"] + lp["b"]
            H = hidden_dim
            i = jax.nn.sigmoid(gates[:, 0:H])
            f = jax.nn.sigmoid(gates[:, H:2 * H])
            g = jnp.tanh(gates[:, 2 * H:3 * H])
            o = jax.nn.sigmoid(gates[:, 3 * H:4 * H])
            c_new = f * c_prev + i * g
            h_new = o * jnp.tanh(c_new)
            hs[l] = (h_new, c_new)
            layer_in = h_new
        if t == 0:
            h0_out = (hs[0][0], hs[0][1])
    logits = hs[-1][0] @ params["decoder"]["w_t"] + params["decoder"]["b"]
    return jax.nn.log_softmax(logits, axis=1), h0_out


# ---------------------------------------------------------------------------
# Main
# ---------------------------------------------------------------------------

if __name__ == "__main__":
    # small, forward-consistent shapes
    window_size = 4
    num_nodes = 8
    num_features = 16
    hidden_dim = 32
    num_classes = 8
    num_rnn_layers = 2

    key = jax.random.PRNGKey(0)
    key, kx, kp = jax.random.split(key, 3)

    # data.x : list of per-step node feature matrices -> stacked array
    x_seq = jax.random.normal(
        kx, (window_size, num_nodes, num_features), jnp.float32)

    params = init_params(kp, num_features, hidden_dim, num_classes, num_rnn_layers)
    prepped = prepare_padded_params(params, num_features, hidden_dim, num_classes)

    output, h0 = rnn_forward(prepped, x_seq, num_nodes, hidden_dim, num_classes)
    jax.block_until_ready(output)
    jax.block_until_ready(h0[0][0])

    # validation against a pure-JAX f32 reference (bf16 weights -> loose tolerance)
    ref_out, ref_h0 = _reference_forward(params, x_seq, hidden_dim, num_classes)

    assert output.shape == (num_nodes, num_classes)
    assert h0[0][0].shape == (num_nodes, hidden_dim)
    assert h0[0][1].shape == (num_nodes, hidden_dim)
    row_sums = jnp.exp(output).sum(axis=1)
    assert bool(jnp.allclose(row_sums, 1.0, atol=1e-4))
    assert bool(jnp.allclose(output, ref_out, atol=5e-2, rtol=5e-2))
    assert bool(jnp.allclose(h0[0][0], ref_h0[0], atol=5e-2, rtol=5e-2))
    assert bool(jnp.allclose(h0[0][1], ref_h0[1], atol=5e-2, rtol=5e-2))

    print("KERNEL_OK")
</pallas_src>

<mosaic_0001>
module attributes {stable_mosaic.version = 11 : i64} {
  func.func @_fused_rnn_kernel(%arg0: i32, %arg1: memref<1x32x128xbf16, #tpu.memory_space<vmem>>, %arg2: memref<128x512xbf16, #tpu.memory_space<vmem>>, %arg3: memref<1x128x512xbf16, #tpu.memory_space<vmem>>, %arg4: memref<2x128x512xbf16, #tpu.memory_space<vmem>>, %arg5: memref<2x1x512xf32, #tpu.memory_space<vmem>>, %arg6: memref<128x128xbf16, #tpu.memory_space<vmem>>, %arg7: memref<1x128xf32, #tpu.memory_space<vmem>>, %arg8: memref<8x128xf32, #tpu.memory_space<vmem>>, %arg9: memref<8x128xf32, #tpu.memory_space<vmem>>, %arg10: memref<8x128xf32, #tpu.memory_space<vmem>>) attributes {dimension_semantics = [#tpu.dimension_semantics<parallel>], iteration_bounds = array<i64: 1>, scalar_prefetch = 0 : i64, scratch_operands = 0 : i64, tpu.core_type = #tpu.core_type<tc>, window_params = [{transform_indices = @transform_0, window_bounds = array<i64: 1, 32, 128>}, {pipeline_mode = #tpu.pipeline_mode<synchronous>, transform_indices = @transform_1, window_bounds = array<i64: 128, 512>}, {pipeline_mode = #tpu.pipeline_mode<synchronous>, transform_indices = @transform_2, window_bounds = array<i64: 1, 128, 512>}, {pipeline_mode = #tpu.pipeline_mode<synchronous>, transform_indices = @transform_3, window_bounds = array<i64: 2, 128, 512>}, {pipeline_mode = #tpu.pipeline_mode<synchronous>, transform_indices = @transform_4, window_bounds = array<i64: 2, 1, 512>}, {pipeline_mode = #tpu.pipeline_mode<synchronous>, transform_indices = @transform_5, window_bounds = array<i64: 128, 128>}, {pipeline_mode = #tpu.pipeline_mode<synchronous>, transform_indices = @transform_6, window_bounds = array<i64: 1, 128>}, {transform_indices = @transform_7, window_bounds = array<i64: 8, 128>}, {transform_indices = @transform_8, window_bounds = array<i64: 8, 128>}, {transform_indices = @transform_9, window_bounds = array<i64: 8, 128>}]} {
    %c0 = arith.constant 0 : index
    %c0_0 = arith.constant 0 : index
    %c0_1 = arith.constant 0 : index
    %0 = vector.load %arg1[%c0, %c0_0, %c0_1] : memref<1x32x128xbf16, #tpu.memory_space<vmem>>, vector<1x32x128xbf16>
    %1 = vector.shape_cast %0 : vector<1x32x128xbf16> to vector<32x128xbf16>
    %c0_2 = arith.constant 0 : index
    %c0_3 = arith.constant 0 : index
    %2 = vector.load %arg2[%c0_2, %c0_3] : memref<128x512xbf16, #tpu.memory_space<vmem>>, vector<128x512xbf16>
    %cst = arith.constant dense<0.000000e+00> : vector<32x512xf32>
    %3 = tpu.matmul %1, %2, %cst {dimension_numbers = #tpu.dot_dimension_numbers<[1], [0], [0], [1], [0, 0, 1, 1], [], []>} : vector<32x128xbf16>, vector<128x512xbf16>, vector<32x512xf32> -> vector<32x512xf32>
    %c0_4 = arith.constant 0 : index
    %c0_5 = arith.constant 0 : index
    %c0_6 = arith.constant 0 : index
    %4 = vector.load %arg5[%c0_4, %c0_5, %c0_6] : memref<2x1x512xf32, #tpu.memory_space<vmem>>, vector<1x1x512xf32>
    %5 = vector.shape_cast %4 : vector<1x1x512xf32> to vector<1x512xf32>
    %6 = vector.broadcast %5 : vector<1x512xf32> to vector<32x512xf32>
    %7 = arith.addf %3, %6 : vector<32x512xf32>
    %cst_7 = arith.constant 0.000000e+00 : f32
    %8 = vector.broadcast %cst_7 : f32 to vector<8x128xf32>
    %cst_8 = arith.constant 0.000000e+00 : f32
    %9 = vector.broadcast %cst_8 : f32 to vector<8x128xf32>
    %cst_9 = arith.constant 0.000000e+00 : f32
    %10 = vector.broadcast %cst_9 : f32 to vector<8x128xf32>
    %cst_10 = arith.constant 0.000000e+00 : f32
    %11 = vector.broadcast %cst_10 : f32 to vector<8x128xf32>
    %12 = vector.extract_strided_slice %7 {offsets = [0, 0], sizes = [8, 512], strides = [1, 1]} : vector<32x512xf32> to vector<8x512xf32>
    %13 = arith.truncf %8 : vector<8x128xf32> to vector<8x128xbf16>
    %c0_11 = arith.constant 0 : index
    %c0_12 = arith.constant 0 : index
    %c0_13 = arith.constant 0 : index
    %14 = vector.load %arg4[%c0_11, %c0_12, %c0_13] : memref<2x128x512xbf16, #tpu.memory_space<vmem>>, vector<1x128x512xbf16>
    %15 = vector.shape_cast %14 : vector<1x128x512xbf16> to vector<128x512xbf16>
    %cst_14 = arith.constant dense<0.000000e+00> : vector<8x512xf32>
    %16 = tpu.matmul %13, %15, %cst_14 {dimension_numbers = #tpu.dot_dimension_numbers<[1], [0], [0], [1], [0, 0, 1, 1], [], []>} : vector<8x128xbf16>, vector<128x512xbf16>, vector<8x512xf32> -> vector<8x512xf32>
    %17 = arith.addf %12, %16 : vector<8x512xf32>
    %18 = vector.extract_strided_slice %17 {offsets = [0, 0], sizes = [8, 128], strides = [1, 1]} : vector<8x512xf32> to vector<8x128xf32>
    %19 = arith.negf %18 : vector<8x128xf32>
    %20 = math.exp %19 : vector<8x128xf32>
    %cst_15 = arith.constant 1.000000e+00 : f32
    %21 = vector.broadcast %cst_15 : f32 to vector<8x128xf32>
    %22 = arith.addf %21, %20 : vector<8x128xf32>
    %23 = arith.divf %21, %22 : vector<8x128xf32>
    %24 = vector.extract_strided_slice %17 {offsets = [0, 128], sizes = [8, 128], strides = [1, 1]} : vector<8x512xf32> to vector<8x128xf32>
    %25 = arith.negf %24 : vector<8x128xf32>
    %26 = math.exp %25 : vector<8x128xf32>
    %cst_16 = arith.constant 1.000000e+00 : f32
    %27 = vector.broadcast %cst_16 : f32 to vector<8x128xf32>
    %28 = arith.addf %27, %26 : vector<8x128xf32>
    %29 = arith.divf %27, %28 : vector<8x128xf32>
    %30 = vector.extract_strided_slice %17 {offsets = [0, 256], sizes = [8, 128], strides = [1, 1]} : vector<8x512xf32> to vector<8x128xf32>
    %31 = math.tanh %30 : vector<8x128xf32>
    %32 = vector.extract_strided_slice %17 {offsets = [0, 384], sizes = [8, 128], strides = [1, 1]} : vector<8x512xf32> to vector<8x128xf32>
    %33 = arith.negf %32 : vector<8x128xf32>
    %34 = math.exp %33 : vector<8x128xf32>
    %cst_17 = arith.constant 1.000000e+00 : f32
    %35 = vector.broadcast %cst_17 : f32 to vector<8x128xf32>
    %36 = arith.addf %35, %34 : vector<8x128xf32>
    %37 = arith.divf %35, %36 : vector<8x128xf32>
    %38 = arith.mulf %29, %10 : vector<8x128xf32>
    %39 = arith.mulf %23, %31 : vector<8x128xf32>
    %40 = arith.addf %38, %39 : vector<8x128xf32>
    %41 = math.tanh %40 : vector<8x128xf32>
    %42 = arith.mulf %37, %41 : vector<8x128xf32>
    %43 = arith.truncf %42 : vector<8x128xf32> to vector<8x128xbf16>
    %c0_18 = arith.constant 0 : index
    %c0_19 = arith.constant 0 : index
    %c0_20 = arith.constant 0 : index
    %44 = vector.load %arg3[%c0_18, %c0_19, %c0_20] : memref<1x128x512xbf16, #tpu.memory_space<vmem>>, vector<1x128x512xbf16>
    %45 = vector.shape_cast %44 : vector<1x128x512xbf16> to vector<128x512xbf16>
    %cst_21 = arith.constant dense<0.000000e+00> : vector<8x512xf32>
    %46 = tpu.matmul %43, %45, %cst_21 {dimension_numbers = #tpu.dot_dimension_numbers<[1], [0], [0], [1], [0, 0, 1, 1], [], []>} : vector<8x128xbf16>, vector<128x512xbf16>, vector<8x512xf32> -> vector<8x512xf32>
    %47 = arith.truncf %9 : vector<8x128xf32> to vector<8x128xbf16>
    %c1 = arith.constant 1 : index
    %c0_22 = arith.constant 0 : index
    %c0_23 = arith.constant 0 : index
    %48 = vector.load %arg4[%c1, %c0_22, %c0_23] : memref<2x128x512xbf16, #tpu.memory_space<vmem>>, vector<1x128x512xbf16>
    %49 = vector.shape_cast %48 : vector<1x128x512xbf16> to vector<128x512xbf16>
    %cst_24 = arith.constant dense<0.000000e+00> : vector<8x512xf32>
    %50 = tpu.matmul %47, %49, %cst_24 {dimension_numbers = #tpu.dot_dimension_numbers<[1], [0], [0], [1], [0, 0, 1, 1], [], []>} : vector<8x128xbf16>, vector<128x512xbf16>, vector<8x512xf32> -> vector<8x512xf32>
    %51 = arith.addf %46, %50 : vector<8x512xf32>
    %c1_25 = arith.constant 1 : index
    %c0_26 = arith.constant 0 : index
    %c0_27 = arith.constant 0 : index
    %52 = vector.load %arg5[%c1_25, %c0_26, %c0_27] : memref<2x1x512xf32, #tpu.memory_space<vmem>>, vector<1x1x512xf32>
    %53 = vector.shape_cast %52 : vector<1x1x512xf32> to vector<1x512xf32>
    %54 = vector.broadcast %53 : vector<1x512xf32> to vector<8x512xf32>
    %55 = arith.addf %51, %54 : vector<8x512xf32>
    %56 = vector.extract_strided_slice %55 {offsets = [0, 0], sizes = [8, 128], strides = [1, 1]} : vector<8x512xf32> to vector<8x128xf32>
    %57 = arith.negf %56 : vector<8x128xf32>
    %58 = math.exp %57 : vector<8x128xf32>
    %cst_28 = arith.constant 1.000000e+00 : f32
    %59 = vector.broadcast %cst_28 : f32 to vector<8x128xf32>
    %60 = arith.addf %59, %58 : vector<8x128xf32>
    %61 = arith.divf %59, %60 : vector<8x128xf32>
    %62 = vector.extract_strided_slice %55 {offsets = [0, 128], sizes = [8, 128], strides = [1, 1]} : vector<8x512xf32> to vector<8x128xf32>
    %63 = arith.negf %62 : vector<8x128xf32>
    %64 = math.exp %63 : vector<8x128xf32>
    %cst_29 = arith.constant 1.000000e+00 : f32
    %65 = vector.broadcast %cst_29 : f32 to vector<8x128xf32>
    %66 = arith.addf %65, %64 : vector<8x128xf32>
    %67 = arith.divf %65, %66 : vector<8x128xf32>
    %68 = vector.extract_strided_slice %55 {offsets = [0, 256], sizes = [8, 128], strides = [1, 1]} : vector<8x512xf32> to vector<8x128xf32>
    %69 = math.tanh %68 : vector<8x128xf32>
    %70 = vector.extract_strided_slice %55 {offsets = [0, 384], sizes = [8, 128], strides = [1, 1]} : vector<8x512xf32> to vector<8x128xf32>
    %71 = arith.negf %70 : vector<8x128xf32>
    %72 = math.exp %71 : vector<8x128xf32>
    %cst_30 = arith.constant 1.000000e+00 : f32
    %73 = vector.broadcast %cst_30 : f32 to vector<8x128xf32>
    %74 = arith.addf %73, %72 : vector<8x128xf32>
    %75 = arith.divf %73, %74 : vector<8x128xf32>
    %76 = arith.mulf %67, %11 : vector<8x128xf32>
    %77 = arith.mulf %61, %69 : vector<8x128xf32>
    %78 = arith.addf %76, %77 : vector<8x128xf32>
    %79 = math.tanh %78 : vector<8x128xf32>
    %80 = arith.mulf %75, %79 : vector<8x128xf32>
    %c0_31 = arith.constant 0 : index
    %c0_32 = arith.constant 0 : index
    %81 = vector.load %arg9[%c0_31, %c0_32] : memref<8x128xf32, #tpu.memory_space<vmem>>, vector<8x128xf32>
    tpu.vector_store %arg9[%c0_31, %c0_32], %42 {strides = array<i32>} : memref<8x128xf32, #tpu.memory_space<vmem>>, vector<8x128xf32>,
    %c0_33 = arith.constant 0 : index
    %c0_34 = arith.constant 0 : index
    %82 = vector.load %arg10[%c0_33, %c0_34] : memref<8x128xf32, #tpu.memory_space<vmem>>, vector<8x128xf32>
    tpu.vector_store %arg10[%c0_33, %c0_34], %40 {strides = array<i32>} : memref<8x128xf32, #tpu.memory_space<vmem>>, vector<8x128xf32>,
    %83 = vector.extract_strided_slice %7 {offsets = [8, 0], sizes = [8, 512], strides = [1, 1]} : vector<32x512xf32> to vector<8x512xf32>
    %84 = arith.truncf %42 : vector<8x128xf32> to vector<8x128xbf16>
    %c0_35 = arith.constant 0 : index
    %c0_36 = arith.constant 0 : index
    %c0_37 = arith.constant 0 : index
    %85 = vector.load %arg4[%c0_35, %c0_36, %c0_37] : memref<2x128x512xbf16, #tpu.memory_space<vmem>>, vector<1x128x512xbf16>
    %86 = vector.shape_cast %85 : vector<1x128x512xbf16> to vector<128x512xbf16>
    %cst_38 = arith.constant dense<0.000000e+00> : vector<8x512xf32>
    %87 = tpu.matmul %84, %86, %cst_38 {dimension_numbers = #tpu.dot_dimension_numbers<[1], [0], [0], [1], [0, 0, 1, 1], [], []>} : vector<8x128xbf16>, vector<128x512xbf16>, vector<8x512xf32> -> vector<8x512xf32>
    %88 = arith.addf %83, %87 : vector<8x512xf32>
    %89 = vector.extract_strided_slice %88 {offsets = [0, 0], sizes = [8, 128], strides = [1, 1]} : vector<8x512xf32> to vector<8x128xf32>
    %90 = arith.negf %89 : vector<8x128xf32>
    %91 = math.exp %90 : vector<8x128xf32>
    %cst_39 = arith.constant 1.000000e+00 : f32
    %92 = vector.broadcast %cst_39 : f32 to vector<8x128xf32>
    %93 = arith.addf %92, %91 : vector<8x128xf32>
    %94 = arith.divf %92, %93 : vector<8x128xf32>
    %95 = vector.extract_strided_slice %88 {offsets = [0, 128], sizes = [8, 128], strides = [1, 1]} : vector<8x512xf32> to vector<8x128xf32>
    %96 = arith.negf %95 : vector<8x128xf32>
    %97 = math.exp %96 : vector<8x128xf32>
    %cst_40 = arith.constant 1.000000e+00 : f32
    %98 = vector.broadcast %cst_40 : f32 to vector<8x128xf32>
    %99 = arith.addf %98, %97 : vector<8x128xf32>
    %100 = arith.divf %98, %99 : vector<8x128xf32>
    %101 = vector.extract_strided_slice %88 {offsets = [0, 256], sizes = [8, 128], strides = [1, 1]} : vector<8x512xf32> to vector<8x128xf32>
    %102 = math.tanh %101 : vector<8x128xf32>
    %103 = vector.extract_strided_slice %88 {offsets = [0, 384], sizes = [8, 128], strides = [1, 1]} : vector<8x512xf32> to vector<8x128xf32>
    %104 = arith.negf %103 : vector<8x128xf32>
    %105 = math.exp %104 : vector<8x128xf32>
    %cst_41 = arith.constant 1.000000e+00 : f32
    %106 = vector.broadcast %cst_41 : f32 to vector<8x128xf32>
    %107 = arith.addf %106, %105 : vector<8x128xf32>
    %108 = arith.divf %106, %107 : vector<8x128xf32>
    %109 = arith.mulf %100, %40 : vector<8x128xf32>
    %110 = arith.mulf %94, %102 : vector<8x128xf32>
    %111 = arith.addf %109, %110 : vector<8x128xf32>
    %112 = math.tanh %111 : vector<8x128xf32>
    %113 = arith.mulf %108, %112 : vector<8x128xf32>
    %114 = arith.truncf %113 : vector<8x128xf32> to vector<8x128xbf16>
    %c0_42 = arith.constant 0 : index
    %c0_43 = arith.constant 0 : index
    %c0_44 = arith.constant 0 : index
    %115 = vector.load %arg3[%c0_42, %c0_43, %c0_44] : memref<1x128x512xbf16, #tpu.memory_space<vmem>>, vector<1x128x512xbf16>
    %116 = vector.shape_cast %115 : vector<1x128x512xbf16> to vector<128x512xbf16>
    %cst_45 = arith.constant dense<0.000000e+00> : vector<8x512xf32>
    %117 = tpu.matmul %114, %116, %cst_45 {dimension_numbers = #tpu.dot_dimension_numbers<[1], [0], [0], [1], [0, 0, 1, 1], [], []>} : vector<8x128xbf16>, vector<128x512xbf16>, vector<8x512xf32> -> vector<8x512xf32>
    %118 = arith.truncf %80 : vector<8x128xf32> to vector<8x128xbf16>
    %c1_46 = arith.constant 1 : index
    %c0_47 = arith.constant 0 : index
    %c0_48 = arith.constant 0 : index
    %119 = vector.load %arg4[%c1_46, %c0_47, %c0_48] : memref<2x128x512xbf16, #tpu.memory_space<vmem>>, vector<1x128x512xbf16>
    %120 = vector.shape_cast %119 : vector<1x128x512xbf16> to vector<128x512xbf16>
    %cst_49 = arith.constant dense<0.000000e+00> : vector<8x512xf32>
    %121 = tpu.matmul %118, %120, %cst_49 {dimension_numbers = #tpu.dot_dimension_numbers<[1], [0], [0], [1], [0, 0, 1, 1], [], []>} : vector<8x128xbf16>, vector<128x512xbf16>, vector<8x512xf32> -> vector<8x512xf32>
    %122 = arith.addf %117, %121 : vector<8x512xf32>
    %c1_50 = arith.constant 1 : index
    %c0_51 = arith.constant 0 : index
    %c0_52 = arith.constant 0 : index
    %123 = vector.load %arg5[%c1_50, %c0_51, %c0_52] : memref<2x1x512xf32, #tpu.memory_space<vmem>>, vector<1x1x512xf32>
    %124 = vector.shape_cast %123 : vector<1x1x512xf32> to vector<1x512xf32>
    %125 = vector.broadcast %124 : vector<1x512xf32> to vector<8x512xf32>
    %126 = arith.addf %122, %125 : vector<8x512xf32>
    %127 = vector.extract_strided_slice %126 {offsets = [0, 0], sizes = [8, 128], strides = [1, 1]} : vector<8x512xf32> to vector<8x128xf32>
    %128 = arith.negf %127 : vector<8x128xf32>
    %129 = math.exp %128 : vector<8x128xf32>
    %cst_53 = arith.constant 1.000000e+00 : f32
    %130 = vector.broadcast %cst_53 : f32 to vector<8x128xf32>
    %131 = arith.addf %130, %129 : vector<8x128xf32>
    %132 = arith.divf %130, %131 : vector<8x128xf32>
    %133 = vector.extract_strided_slice %126 {offsets = [0, 128], sizes = [8, 128], strides = [1, 1]} : vector<8x512xf32> to vector<8x128xf32>
    %134 = arith.negf %133 : vector<8x128xf32>
    %135 = math.exp %134 : vector<8x128xf32>
    %cst_54 = arith.constant 1.000000e+00 : f32
    %136 = vector.broadcast %cst_54 : f32 to vector<8x128xf32>
    %137 = arith.addf %136, %135 : vector<8x128xf32>
    %138 = arith.divf %136, %137 : vector<8x128xf32>
    %139 = vector.extract_strided_slice %126 {offsets = [0, 256], sizes = [8, 128], strides = [1, 1]} : vector<8x512xf32> to vector<8x128xf32>
    %140 = math.tanh %139 : vector<8x128xf32>
    %141 = vector.extract_strided_slice %126 {offsets = [0, 384], sizes = [8, 128], strides = [1, 1]} : vector<8x512xf32> to vector<8x128xf32>
    %142 = arith.negf %141 : vector<8x128xf32>
    %143 = math.exp %142 : vector<8x128xf32>
    %cst_55 = arith.constant 1.000000e+00 : f32
    %144 = vector.broadcast %cst_55 : f32 to vector<8x128xf32>
    %145 = arith.addf %144, %143 : vector<8x128xf32>
    %146 = arith.divf %144, %145 : vector<8x128xf32>
    %147 = arith.mulf %138, %78 : vector<8x128xf32>
    %148 = arith.mulf %132, %140 : vector<8x128xf32>
    %149 = arith.addf %147, %148 : vector<8x128xf32>
    %150 = math.tanh %149 : vector<8x128xf32>
    %151 = arith.mulf %146, %150 : vector<8x128xf32>
    %152 = vector.extract_strided_slice %7 {offsets = [16, 0], sizes = [8, 512], strides = [1, 1]} : vector<32x512xf32> to vector<8x512xf32>
    %153 = arith.truncf %113 : vector<8x128xf32> to vector<8x128xbf16>
    %c0_56 = arith.constant 0 : index
    %c0_57 = arith.constant 0 : index
    %c0_58 = arith.constant 0 : index
    %154 = vector.load %arg4[%c0_56, %c0_57, %c0_58] : memref<2x128x512xbf16, #tpu.memory_space<vmem>>, vector<1x128x512xbf16>
    %155 = vector.shape_cast %154 : vector<1x128x512xbf16> to vector<128x512xbf16>
    %cst_59 = arith.constant dense<0.000000e+00> : vector<8x512xf32>
    %156 = tpu.matmul %153, %155, %cst_59 {dimension_numbers = #tpu.dot_dimension_numbers<[1], [0], [0], [1], [0, 0, 1, 1], [], []>} : vector<8x128xbf16>, vector<128x512xbf16>, vector<8x512xf32> -> vector<8x512xf32>
    %157 = arith.addf %152, %156 : vector<8x512xf32>
    %158 = vector.extract_strided_slice %157 {offsets = [0, 0], sizes = [8, 128], strides = [1, 1]} : vector<8x512xf32> to vector<8x128xf32>
    %159 = arith.negf %158 : vector<8x128xf32>
    %160 = math.exp %159 : vector<8x128xf32>
    %cst_60 = arith.constant 1.000000e+00 : f32
    %161 = vector.broadcast %cst_60 : f32 to vector<8x128xf32>
    %162 = arith.addf %161, %160 : vector<8x128xf32>
    %163 = arith.divf %161, %162 : vector<8x128xf32>
    %164 = vector.extract_strided_slice %157 {offsets = [0, 128], sizes = [8, 128], strides = [1, 1]} : vector<8x512xf32> to vector<8x128xf32>
    %165 = arith.negf %164 : vector<8x128xf32>
    %166 = math.exp %165 : vector<8x128xf32>
    %cst_61 = arith.constant 1.000000e+00 : f32
    %167 = vector.broadcast %cst_61 : f32 to vector<8x128xf32>
    %168 = arith.addf %167, %166 : vector<8x128xf32>
    %169 = arith.divf %167, %168 : vector<8x128xf32>
    %170 = vector.extract_strided_slice %157 {offsets = [0, 256], sizes = [8, 128], strides = [1, 1]} : vector<8x512xf32> to vector<8x128xf32>
    %171 = math.tanh %170 : vector<8x128xf32>
    %172 = vector.extract_strided_slice %157 {offsets = [0, 384], sizes = [8, 128], strides = [1, 1]} : vector<8x512xf32> to vector<8x128xf32>
    %173 = arith.negf %172 : vector<8x128xf32>
    %174 = math.exp %173 : vector<8x128xf32>
    %cst_62 = arith.constant 1.000000e+00 : f32
    %175 = vector.broadcast %cst_62 : f32 to vector<8x128xf32>
    %176 = arith.addf %175, %174 : vector<8x128xf32>
    %177 = arith.divf %175, %176 : vector<8x128xf32>
    %178 = arith.mulf %169, %111 : vector<8x128xf32>
    %179 = arith.mulf %163, %171 : vector<8x128xf32>
    %180 = arith.addf %178, %179 : vector<8x128xf32>
    %181 = math.tanh %180 : vector<8x128xf32>
    %182 = arith.mulf %177, %181 : vector<8x128xf32>
    %183 = arith.truncf %182 : vector<8x128xf32> to vector<8x128xbf16>
    %c0_63 = arith.constant 0 : index
    %c0_64 = arith.constant 0 : index
    %c0_65 = arith.constant 0 : index
    %184 = vector.load %arg3[%c0_63, %c0_64, %c0_65] : memref<1x128x512xbf16, #tpu.memory_space<vmem>>, vector<1x128x512xbf16>
    %185 = vector.shape_cast %184 : vector<1x128x512xbf16> to vector<128x512xbf16>
    %cst_66 = arith.constant dense<0.000000e+00> : vector<8x512xf32>
    %186 = tpu.matmul %183, %185, %cst_66 {dimension_numbers = #tpu.dot_dimension_numbers<[1], [0], [0], [1], [0, 0, 1, 1], [], []>} : vector<8x128xbf16>, vector<128x512xbf16>, vector<8x512xf32> -> vector<8x512xf32>
    %187 = arith.truncf %151 : vector<8x128xf32> to vector<8x128xbf16>
    %c1_67 = arith.constant 1 : index
    %c0_68 = arith.constant 0 : index
    %c0_69 = arith.constant 0 : index
    %188 = vector.load %arg4[%c1_67, %c0_68, %c0_69] : memref<2x128x512xbf16, #tpu.memory_space<vmem>>, vector<1x128x512xbf16>
    %189 = vector.shape_cast %188 : vector<1x128x512xbf16> to vector<128x512xbf16>
    %cst_70 = arith.constant dense<0.000000e+00> : vector<8x512xf32>
    %190 = tpu.matmul %187, %189, %cst_70 {dimension_numbers = #tpu.dot_dimension_numbers<[1], [0], [0], [1], [0, 0, 1, 1], [], []>} : vector<8x128xbf16>, vector<128x512xbf16>, vector<8x512xf32> -> vector<8x512xf32>
    %191 = arith.addf %186, %190 : vector<8x512xf32>
    %c1_71 = arith.constant 1 : index
    %c0_72 = arith.constant 0 : index
    %c0_73 = arith.constant 0 : index
    %192 = vector.load %arg5[%c1_71, %c0_72, %c0_73] : memref<2x1x512xf32, #tpu.memory_space<vmem>>, vector<1x1x512xf32>
    %193 = vector.shape_cast %192 : vector<1x1x512xf32> to vector<1x512xf32>
    %194 = vector.broadcast %193 : vector<1x512xf32> to vector<8x512xf32>
    %195 = arith.addf %191, %194 : vector<8x512xf32>
    %196 = vector.extract_strided_slice %195 {offsets = [0, 0], sizes = [8, 128], strides = [1, 1]} : vector<8x512xf32> to vector<8x128xf32>
    %197 = arith.negf %196 : vector<8x128xf32>
    %198 = math.exp %197 : vector<8x128xf32>
    %cst_74 = arith.constant 1.000000e+00 : f32
    %199 = vector.broadcast %cst_74 : f32 to vector<8x128xf32>
    %200 = arith.addf %199, %198 : vector<8x128xf32>
    %201 = arith.divf %199, %200 : vector<8x128xf32>
    %202 = vector.extract_strided_slice %195 {offsets = [0, 128], sizes = [8, 128], strides = [1, 1]} : vector<8x512xf32> to vector<8x128xf32>
    %203 = arith.negf %202 : vector<8x128xf32>
    %204 = math.exp %203 : vector<8x128xf32>
    %cst_75 = arith.constant 1.000000e+00 : f32
    %205 = vector.broadcast %cst_75 : f32 to vector<8x128xf32>
    %206 = arith.addf %205, %204 : vector<8x128xf32>
    %207 = arith.divf %205, %206 : vector<8x128xf32>
    %208 = vector.extract_strided_slice %195 {offsets = [0, 256], sizes = [8, 128], strides = [1, 1]} : vector<8x512xf32> to vector<8x128xf32>
    %209 = math.tanh %208 : vector<8x128xf32>
    %210 = vector.extract_strided_slice %195 {offsets = [0, 384], sizes = [8, 128], strides = [1, 1]} : vector<8x512xf32> to vector<8x128xf32>
    %211 = arith.negf %210 : vector<8x128xf32>
    %212 = math.exp %211 : vector<8x128xf32>
    %cst_76 = arith.constant 1.000000e+00 : f32
    %213 = vector.broadcast %cst_76 : f32 to vector<8x128xf32>
    %214 = arith.addf %213, %212 : vector<8x128xf32>
    %215 = arith.divf %213, %214 : vector<8x128xf32>
    %216 = arith.mulf %207, %149 : vector<8x128xf32>
    %217 = arith.mulf %201, %209 : vector<8x128xf32>
    %218 = arith.addf %216, %217 : vector<8x128xf32>
    %219 = math.tanh %218 : vector<8x128xf32>
    %220 = arith.mulf %215, %219 : vector<8x128xf32>
    %221 = vector.extract_strided_slice %7 {offsets = [24, 0], sizes = [8, 512], strides = [1, 1]} : vector<32x512xf32> to vector<8x512xf32>
    %222 = arith.truncf %182 : vector<8x128xf32> to vector<8x128xbf16>
    %c0_77 = arith.constant 0 : index
    %c0_78 = arith.constant 0 : index
    %c0_79 = arith.constant 0 : index
    %223 = vector.load %arg4[%c0_77, %c0_78, %c0_79] : memref<2x128x512xbf16, #tpu.memory_space<vmem>>, vector<1x128x512xbf16>
    %224 = vector.shape_cast %223 : vector<1x128x512xbf16> to vector<128x512xbf16>
    %cst_80 = arith.constant dense<0.000000e+00> : vector<8x512xf32>
    %225 = tpu.matmul %222, %224, %cst_80 {dimension_numbers = #tpu.dot_dimension_numbers<[1], [0], [0], [1], [0, 0, 1, 1], [], []>} : vector<8x128xbf16>, vector<128x512xbf16>, vector<8x512xf32> -> vector<8x512xf32>
    %226 = arith.addf %221, %225 : vector<8x512xf32>
    %227 = vector.extract_strided_slice %226 {offsets = [0, 0], sizes = [8, 128], strides = [1, 1]} : vector<8x512xf32> to vector<8x128xf32>
    %228 = arith.negf %227 : vector<8x128xf32>
    %229 = math.exp %228 : vector<8x128xf32>
    %cst_81 = arith.constant 1.000000e+00 : f32
    %230 = vector.broadcast %cst_81 : f32 to vector<8x128xf32>
    %231 = arith.addf %230, %229 : vector<8x128xf32>
    %232 = arith.divf %230, %231 : vector<8x128xf32>
    %233 = vector.extract_strided_slice %226 {offsets = [0, 128], sizes = [8, 128], strides = [1, 1]} : vector<8x512xf32> to vector<8x128xf32>
    %234 = arith.negf %233 : vector<8x128xf32>
    %235 = math.exp %234 : vector<8x128xf32>
    %cst_82 = arith.constant 1.000000e+00 : f32
    %236 = vector.broadcast %cst_82 : f32 to vector<8x128xf32>
    %237 = arith.addf %236, %235 : vector<8x128xf32>
    %238 = arith.divf %236, %237 : vector<8x128xf32>
    %239 = vector.extract_strided_slice %226 {offsets = [0, 256], sizes = [8, 128], strides = [1, 1]} : vector<8x512xf32> to vector<8x128xf32>
    %240 = math.tanh %239 : vector<8x128xf32>
    %241 = vector.extract_strided_slice %226 {offsets = [0, 384], sizes = [8, 128], strides = [1, 1]} : vector<8x512xf32> to vector<8x128xf32>
    %242 = arith.negf %241 : vector<8x128xf32>
    %243 = math.exp %242 : vector<8x128xf32>
    %cst_83 = arith.constant 1.000000e+00 : f32
    %244 = vector.broadcast %cst_83 : f32 to vector<8x128xf32>
    %245 = arith.addf %244, %243 : vector<8x128xf32>
    %246 = arith.divf %244, %245 : vector<8x128xf32>
    %247 = arith.mulf %238, %180 : vector<8x128xf32>
    %248 = arith.mulf %232, %240 : vector<8x128xf32>
    %249 = arith.addf %247, %248 : vector<8x128xf32>
    %250 = math.tanh %249 : vector<8x128xf32>
    %251 = arith.mulf %246, %250 : vector<8x128xf32>
    %252 = arith.truncf %251 : vector<8x128xf32> to vector<8x128xbf16>
    %c0_84 = arith.constant 0 : index
    %c0_85 = arith.constant 0 : index
    %c0_86 = arith.constant 0 : index
    %253 = vector.load %arg3[%c0_84, %c0_85, %c0_86] : memref<1x128x512xbf16, #tpu.memory_space<vmem>>, vector<1x128x512xbf16>
    %254 = vector.shape_cast %253 : vector<1x128x512xbf16> to vector<128x512xbf16>
    %cst_87 = arith.constant dense<0.000000e+00> : vector<8x512xf32>
    %255 = tpu.matmul %252, %254, %cst_87 {dimension_numbers = #tpu.dot_dimension_numbers<[1], [0], [0], [1], [0, 0, 1, 1], [], []>} : vector<8x128xbf16>, vector<128x512xbf16>, vector<8x512xf32> -> vector<8x512xf32>
    %256 = arith.truncf %220 : vector<8x128xf32> to vector<8x128xbf16>
    %c1_88 = arith.constant 1 : index
    %c0_89 = arith.constant 0 : index
    %c0_90 = arith.constant 0 : index
    %257 = vector.load %arg4[%c1_88, %c0_89, %c0_90] : memref<2x128x512xbf16, #tpu.memory_space<vmem>>, vector<1x128x512xbf16>
    %258 = vector.shape_cast %257 : vector<1x128x512xbf16> to vector<128x512xbf16>
    %cst_91 = arith.constant dense<0.000000e+00> : vector<8x512xf32>
    %259 = tpu.matmul %256, %258, %cst_91 {dimension_numbers = #tpu.dot_dimension_numbers<[1], [0], [0], [1], [0, 0, 1, 1], [], []>} : vector<8x128xbf16>, vector<128x512xbf16>, vector<8x512xf32> -> vector<8x512xf32>
    %260 = arith.addf %255, %259 : vector<8x512xf32>
    %c1_92 = arith.constant 1 : index
    %c0_93 = arith.constant 0 : index
    %c0_94 = arith.constant 0 : index
    %261 = vector.load %arg5[%c1_92, %c0_93, %c0_94] : memref<2x1x512xf32, #tpu.memory_space<vmem>>, vector<1x1x512xf32>
    %262 = vector.shape_cast %261 : vector<1x1x512xf32> to vector<1x512xf32>
    %263 = vector.broadcast %262 : vector<1x512xf32> to vector<8x512xf32>
    %264 = arith.addf %260, %263 : vector<8x512xf32>
    %265 = vector.extract_strided_slice %264 {offsets = [0, 0], sizes = [8, 128], strides = [1, 1]} : vector<8x512xf32> to vector<8x128xf32>
    %266 = arith.negf %265 : vector<8x128xf32>
    %267 = math.exp %266 : vector<8x128xf32>
    %cst_95 = arith.constant 1.000000e+00 : f32
    %268 = vector.broadcast %cst_95 : f32 to vector<8x128xf32>
    %269 = arith.addf %268, %267 : vector<8x128xf32>
    %270 = arith.divf %268, %269 : vector<8x128xf32>
    %271 = vector.extract_strided_slice %264 {offsets = [0, 128], sizes = [8, 128], strides = [1, 1]} : vector<8x512xf32> to vector<8x128xf32>
    %272 = arith.negf %271 : vector<8x128xf32>
    %273 = math.exp %272 : vector<8x128xf32>
    %cst_96 = arith.constant 1.000000e+00 : f32
    %274 = vector.broadcast %cst_96 : f32 to vector<8x128xf32>
    %275 = arith.addf %274, %273 : vector<8x128xf32>
    %276 = arith.divf %274, %275 : vector<8x128xf32>
    %277 = vector.extract_strided_slice %264 {offsets = [0, 256], sizes = [8, 128], strides = [1, 1]} : vector<8x512xf32> to vector<8x128xf32>
    %278 = math.tanh %277 : vector<8x128xf32>
    %279 = vector.extract_strided_slice %264 {offsets = [0, 384], sizes = [8, 128], strides = [1, 1]} : vector<8x512xf32> to vector<8x128xf32>
    %280 = arith.negf %279 : vector<8x128xf32>
    %281 = math.exp %280 : vector<8x128xf32>
    %cst_97 = arith.constant 1.000000e+00 : f32
    %282 = vector.broadcast %cst_97 : f32 to vector<8x128xf32>
    %283 = arith.addf %282, %281 : vector<8x128xf32>
    %284 = arith.divf %282, %283 : vector<8x128xf32>
    %285 = arith.mulf %276, %218 : vector<8x128xf32>
    %286 = arith.mulf %270, %278 : vector<8x128xf32>
    %287 = arith.addf %285, %286 : vector<8x128xf32>
    %288 = math.tanh %287 : vector<8x128xf32>
    %289 = arith.mulf %284, %288 : vector<8x128xf32>
    %290 = arith.truncf %289 : vector<8x128xf32> to vector<8x128xbf16>
    %c0_98 = arith.constant 0 : index
    %c0_99 = arith.constant 0 : index
    %291 = vector.load %arg6[%c0_98, %c0_99] : memref<128x128xbf16, #tpu.memory_space<vmem>>, vector<128x128xbf16>
    %cst_100 = arith.constant dense<0.000000e+00> : vector<8x128xf32>
    %292 = tpu.matmul %290, %291, %cst_100 {dimension_numbers = #tpu.dot_dimension_numbers<[1], [0], [0], [1], [0, 0, 1, 1], [], []>} : vector<8x128xbf16>, vector<128x128xbf16>, vector<8x128xf32> -> vector<8x128xf32>
    %c0_101 = arith.constant 0 : index
    %c0_102 = arith.constant 0 : index
    %293 = vector.load %arg7[%c0_101, %c0_102] : memref<1x128xf32, #tpu.memory_space<vmem>>, vector<1x128xf32>
    %294 = vector.broadcast %293 : vector<1x128xf32> to vector<8x128xf32>
    %295 = arith.addf %292, %294 : vector<8x128xf32>
    %cst_103 = arith.constant dense<0xFF800000> : vector<8xf32>
    %296 = vector.multi_reduction <maximumf>, %295, %cst_103 [1] : vector<8x128xf32> to vector<8xf32>
    %297 = vector.shape_cast %296 : vector<8xf32> to vector<8x1xf32>
    %298 = vector.broadcast %297 : vector<8x1xf32> to vector<8x128xf32>
    %299 = arith.subf %295, %298 : vector<8x128xf32>
    %300 = math.exp %299 : vector<8x128xf32>
    %cst_104 = arith.constant dense<0.000000e+00> : vector<8xf32>
    %301 = vector.multi_reduction <add>, %300, %cst_104 [1] : vector<8x128xf32> to vector<8xf32>
    %302 = vector.shape_cast %301 : vector<8xf32> to vector<8x1xf32>
    %303 = math.log %302 : vector<8x1xf32>
    %304 = vector.broadcast %303 : vector<8x1xf32> to vector<8x128xf32>
    %305 = arith.subf %299, %304 : vector<8x128xf32>
    %c0_105 = arith.constant 0 : index
    %c0_106 = arith.constant 0 : index
    %306 = vector.load %arg8[%c0_105, %c0_106] : memref<8x128xf32, #tpu.memory_space<vmem>>, vector<8x128xf32>
    tpu.vector_store %arg8[%c0_105, %c0_106], %305 {strides = array<i32>} : memref<8x128xf32, #tpu.memory_space<vmem>>, vector<8x128xf32>,
    return
  }
  func.func @transform_0(%arg0: i32) -> (i32, i32, i32) {
    %c0_i32 = arith.constant 0 : i32
    %c0_i32_0 = arith.constant 0 : i32
    %c0_i32_1 = arith.constant 0 : i32
    return %arg0, %c0_i32, %c0_i32_0 : i32, i32, i32
  }
  func.func @transform_1(%arg0: i32) -> (i32, i32) {
    %c0_i32 = arith.constant 0 : i32
    %c0_i32_0 = arith.constant 0 : i32
    %c0_i32_1 = arith.constant 0 : i32
    return %c0_i32, %c0_i32_0 : i32, i32
  }
  func.func @transform_2(%arg0: i32) -> (i32, i32, i32) {
    %c0_i32 = arith.constant 0 : i32
    %c0_i32_0 = arith.constant 0 : i32
    %c0_i32_1 = arith.constant 0 : i32
    %c0_i32_2 = arith.constant 0 : i32
    return %c0_i32, %c0_i32_0, %c0_i32_1 : i32, i32, i32
  }
  func.func @transform_3(%arg0: i32) -> (i32, i32, i32) {
    %c0_i32 = arith.constant 0 : i32
    %c0_i32_0 = arith.constant 0 : i32
    %c0_i32_1 = arith.constant 0 : i32
    %c0_i32_2 = arith.constant 0 : i32
    return %c0_i32, %c0_i32_0, %c0_i32_1 : i32, i32, i32
  }
  func.func @transform_4(%arg0: i32) -> (i32, i32, i32) {
    %c0_i32 = arith.constant 0 : i32
    %c0_i32_0 = arith.constant 0 : i32
    %c0_i32_1 = arith.constant 0 : i32
    %c0_i32_2 = arith.constant 0 : i32
    return %c0_i32, %c0_i32_0, %c0_i32_1 : i32, i32, i32
  }
  func.func @transform_5(%arg0: i32) -> (i32, i32) {
    %c0_i32 = arith.constant 0 : i32
    %c0_i32_0 = arith.constant 0 : i32
    %c0_i32_1 = arith.constant 0 : i32
    return %c0_i32, %c0_i32_0 : i32, i32
  }
  func.func @transform_6(%arg0: i32) -> (i32, i32) {
    %c0_i32 = arith.constant 0 : i32
    %c0_i32_0 = arith.constant 0 : i32
    %c0_i32_1 = arith.constant 0 : i32
    return %c0_i32, %c0_i32_0 : i32, i32
  }
  func.func @transform_7(%arg0: i32) -> (i32, i32) {
    %c0_i32 = arith.constant 0 : i32
    %c0_i32_0 = arith.constant 0 : i32
    return %arg0, %c0_i32 : i32, i32
  }
  func.func @transform_8(%arg0: i32) -> (i32, i32) {
    %c0_i32 = arith.constant 0 : i32
    %c0_i32_0 = arith.constant 0 : i32
    return %arg0, %c0_i32 : i32, i32
  }
  func.func @transform_9(%arg0: i32) -> (i32, i32) {
    %c0_i32 = arith.constant 0 : i32
    %c0_i32_0 = arith.constant 0 : i32
    return %arg0, %c0_i32 : i32, i32
  }
}

</mosaic_0001>

<bundles_post_ra>
// kernel: _fused_forward.1
= control target key start
LH: loop header
LB: loop body
LE: loop exit
PB: predicated region body
PF: predicated region fallthrough
CT: control target
= control target key end

     0   :  { %15 = vsyncpa [#allocation3], 0  ;;  %s5287_s0 = inlined_call_operand.vmem [shape: bf16[1,32,128], index: 0, kind: input, shape index: {}]   ;;  %s5288_s1 = inlined_call_operand.hbm [shape: bf16[128,512], index: 1, kind: input, shape index: {}]   ;;  %s5289_s2 = inlined_call_operand.hbm [shape: bf16[1,128,512], index: 2, kind: input, shape index: {}]   ;;  %s5290_s3 = inlined_call_operand.hbm [shape: bf16[2,128,512], index: 3, kind: input, shape index: {}]   ;;  %s5291_s4 = inlined_call_operand.vmem [shape: f32[2,1,512], index: 4, kind: input, shape index: {}]   ;;  %s5292_s5 = inlined_call_operand.vmem [shape: bf16[128,128], index: 5, kind: input, shape index: {}]   ;;  %s5293_s6 = inlined_call_operand.vmem [shape: f32[1,128], index: 6, kind: input, shape index: {}]   ;;  %s5294_s7 = inlined_call_operand.hbm [shape: f32[8,128], index: 7, kind: output, shape index: {0}]   ;;  %s5295_s8 = inlined_call_operand.hbm [shape: f32[8,128], index: 8, kind: output, shape index: {1}]   ;;  %s5296_s9 = inlined_call_operand.hbm [shape: f32[8,128], index: 9, kind: output, shape index: {2}]  }
   0x1   :  { %16 = vsyncpa [#allocation6], 0 }
   0x2   :  { %17 = vsyncpa [#allocation4], 0 }
   0x3   :  { %18 = vsyncpa [#allocation10], 0  ;;  %s38_s11 = sshll.u32 %s5289_s2, 4  ;;  %s4348_s12 = smov [#allocation5]   ;;  %s39_s11 = int_to_ptr.hbm [resolvable:$true] %s38_s11 }
   0x4   :  { %s40_s13 = sshll.u32 %s4348_s12, 4  ;;  %s25_s16 = sshll.u32 %s5288_s1, 4  ;;  %s41_s13 = int_to_ptr.vmem [resolvable:$true] %s40_s13  ;;  %s26_s16 = int_to_ptr.hbm [resolvable:$true] %s25_s16 }
   0x5   :  { %s4349_s17 = smov 256   ;;  %s4350_s18 = smov 16  }
   0x6   :  { %46 = dma.hbm_to_vmem [thread:$0]  %s39_s11, 4096, %s41_s13, [#allocation6], %s4349_s17, %s4349_s17, %s4350_s18  }
   0x7   :  { %s4351_s19 = smov [#allocation2]   ;;  %s51_s23 = sshll.u32 %s5290_s3, 4  ;;  %s52_s23 = int_to_ptr.hbm [resolvable:$true] %s51_s23 }
   0x8   :  { %s27_s20 = sshll.u32 %s4351_s19, 4  ;;  %s4352_s2 = smov [#allocation7]   ;;  %s28_s20 = int_to_ptr.vmem [resolvable:$true] %s27_s20 }
   0x9   :  { %33 = dma.hbm_to_vmem [thread:$0]  %s26_s16, 4096, %s28_s20, [#allocation3], %s4349_s17, %s4349_s17, %s4350_s18  }
   0xa   :  { %s53_s24 = sshll.u32 %s4352_s2, 4  ;;  %s54_s24 = int_to_ptr.vmem [resolvable:$true] %s53_s24 }
   0xb   :  { %59 = dma.hbm_to_vmem [thread:$0]  %s52_s23, 8192, %s54_s24, [#allocation6], %s4349_s17, %s4349_s17, %s4350_s18  }
   0xc   :  { %4340 = dma.done.wait [#allocation3], 4096  }
   0xd   :  { %4341 = vsyncadd [#allocation3], 4294963200 }
   0xe   :  { %4342 = dma.done.wait [#allocation6], 12288  }
   0xf   :  { %4343 = vsyncadd [#allocation6], 4294955008  ;;  %v2980_v0 = vld [vmem:[#allocation2 + $0xe0] sm:$0xf]  ;;  %v3852_v1 = vld [vmem:[#allocation2 + $0xec] sm:$0xf0] }
  0x10   :  { %v3850_v2 = vld [vmem:[#allocation2 + $0xe4] sm:$0xf]  ;;  %v2981_v3 = vor.u32 %v3852_v1, %v2980_v0  ;;  %v2982_v4 = vld [vmem:[#allocation2 + $0xf0] sm:$0xf0]  ;;  %v2988_v5 = vld [vmem:[#allocation2 + $0xe8] sm:$0xf] }
  0x11   :  { %v3853_v6 = vld [vmem:[#allocation2 + $0xf4] sm:$0xf0]  ;;  %v2985_v7 = vor.u32 %v3850_v2, %v2982_v4  ;;  %v3851_v9 = vld [vmem:[#allocation2 + $0xec] sm:$0xf]  ;;  %v2990_v10 = vld [vmem:[#allocation2 + $0xf8] sm:$0xf0] }
  0x12   :  { %v2989_v8 = vor.u32 %v3853_v6, %v2988_v5  ;;  %v2964_v11 = vld [vmem:[#allocation2 + $0xc0] sm:$0xf]  ;;  %297 = vmatpush.bf16.msra.mxu0 %v2981_v3  ;;  %v2993_v12 = vor.u32 %v3851_v9, %v2990_v10  ;;  %v3848_v13 = vld [vmem:[#allocation2 + $0xcc] sm:$0xf0]  ;;  %v3846_v14 = vld [vmem:[#allocation2 + $0xc4] sm:$0xf] }
  0x13   :  { %v2966_v15 = vld [vmem:[#allocation2 + $0xd0] sm:$0xf0]  ;;  %316 = vmatpush.bf16.msra.mxu1 %v2985_v7  ;;  %v2965_v16 = vor.u32 %v3848_v13, %v2964_v11  ;;  %v2972_v18 = vld [vmem:[#allocation2 + $0xc8] sm:$0xf]  ;;  %v3849_v19 = vld [vmem:[#allocation2 + $0xd4] sm:$0xf0] }
  0x14   :  { %335 = vmatpush.bf16.msra.mxu2 %v2989_v8  ;;  %v2969_v17 = vor.u32 %v3846_v14, %v2966_v15  ;;  %v3847_v20 = vld [vmem:[#allocation2 + $0xcc] sm:$0xf]  ;;  %354 = vmatpush.bf16.msra.mxu3 %v2993_v12  ;;  %v2973_v21 = vor.u32 %v3849_v19, %v2972_v18  ;;  %v2974_v22 = vld [vmem:[#allocation2 + $0xd8] sm:$0xf0]  ;;  %v2948_v23 = vld [vmem:[#allocation2 + $0xa0] sm:$0xf] }
  0x15   :  { %v3844_v24 = vld [vmem:[#allocation2 + $0xac] sm:$0xf0]  ;;  %v2977_v25 = vor.u32 %v3847_v20, %v2974_v22  ;;  %v3842_v26 = vld [vmem:[#allocation2 + $0xa4] sm:$0xf]  ;;  %v2950_v27 = vld [vmem:[#allocation2 + $0xb0] sm:$0xf0] }
  0x16   :  { %v2956_v28 = vld [vmem:[#allocation2 + $0xa8] sm:$0xf]  ;;  %298 = vmatpush.bf16.msra.mxu0 %v2965_v16  ;;  %v2949_v29 = vor.u32 %v3844_v24, %v2948_v23  ;;  %v3845_v30 = vld [vmem:[#allocation2 + $0xb4] sm:$0xf0]  ;;  %v3843_v31 = vld [vmem:[#allocation2 + $0xac] sm:$0xf]  ;;  %v2953_v33 = vor.u32 %v3842_v26, %v2950_v27 }
  0x17   :  { %v2958_v32 = vld [vmem:[#allocation2 + $0xb8] sm:$0xf0]  ;;  %317 = vmatpush.bf16.msra.mxu1 %v2969_v17  ;;  %v2957_v34 = vor.u32 %v3845_v30, %v2956_v28  ;;  %v2932_v35 = vld [vmem:[#allocation2 + $0x80] sm:$0xf]  ;;  %v3840_v36 = vld [vmem:[#allocation2 + $0x8c] sm:$0xf0] }
  0x18   :  { %336 = vmatpush.bf16.msra.mxu2 %v2973_v21  ;;  %v3838_v37 = vld [vmem:[#allocation2 + $0x84] sm:$0xf]  ;;  %355 = vmatpush.bf16.msra.mxu3 %v2977_v25  ;;  %v2961_v38 = vor.u32 %v3843_v31, %v2958_v32  ;;  %v2934_v39 = vld [vmem:[#allocation2 + $0x90] sm:$0xf0]  ;;  %v2940_v40 = vld [vmem:[#allocation2 + $0x88] sm:$0xf]  ;;  %v2933_v44 = vor.u32 %v3840_v36, %v2932_v35 }
  0x19   :  { %v3841_v41 = vld [vmem:[#allocation2 + $0x94] sm:$0xf0]  ;;  %v3839_v42 = vld [vmem:[#allocation2 + $0x8c] sm:$0xf]  ;;  %v2942_v43 = vld [vmem:[#allocation2 + $0x98] sm:$0xf0]  ;;  %v2937_v45 = vor.u32 %v3838_v37, %v2934_v39 }
  0x1a   :  { %299 = vmatpush.bf16.msra.mxu0 %v2949_v29  ;;  %v2941_v46 = vor.u32 %v3841_v41, %v2940_v40  ;;  %v2916_v47 = vld [vmem:[#allocation2 + $0x60] sm:$0xf]  ;;  %v3836_v48 = vld [vmem:[#allocation2 + $0x6c] sm:$0xf0]  ;;  %v3834_v49 = vld [vmem:[#allocation2 + $0x64] sm:$0xf]  ;;  %v2945_v50 = vor.u32 %v3839_v42, %v2942_v43 }
  0x1b   :  { %318 = vmatpush.bf16.msra.mxu1 %v2953_v33  ;;  %v2918_v51 = vld [vmem:[#allocation2 + $0x70] sm:$0xf0]  ;;  %v2924_v52 = vld [vmem:[#allocation2 + $0x68] sm:$0xf]  ;;  %v3837_v53 = vld [vmem:[#allocation2 + $0x74] sm:$0xf0]  ;;  %v2917_v56 = vor.u32 %v3836_v48, %v2916_v47 }
  0x1c   :  { %337 = vmatpush.bf16.msra.mxu2 %v2957_v34  ;;  %356 = vmatpush.bf16.msra.mxu3 %v2961_v38  ;;  %v3835_v54 = vld [vmem:[#allocation2 + $0x6c] sm:$0xf]  ;;  %v2926_v55 = vld [vmem:[#allocation2 + $0x78] sm:$0xf0]  ;;  %v2921_v57 = vor.u32 %v3834_v49, %v2918_v51  ;;  %v2925_v58 = vor.u32 %v3837_v53, %v2924_v52  ;;  %v2900_v59 = vld [vmem:[#allocation2 + $0x40] sm:$0xf] }
  0x1d   :  { %v3832_v60 = vld [vmem:[#allocation2 + $0x4c] sm:$0xf0]  ;;  %v3830_v61 = vld [vmem:[#allocation2 + $0x44] sm:$0xf]  ;;  %v2929_v62 = vor.u32 %v3835_v54, %v2926_v55  ;;  %v2902_v63 = vld [vmem:[#allocation2 + $0x50] sm:$0xf0] }
  0x1e   :  { %300 = vmatpush.bf16.msra.mxu0 %v2933_v44  ;;  %v2908_v0 = vld [vmem:[#allocation2 + $0x48] sm:$0xf]  ;;  %v3833_v1 = vld [vmem:[#allocation2 + $0x54] sm:$0xf0]  ;;  %v3831_v2 = vld [vmem:[#allocation2 + $0x4c] sm:$0xf]  ;;  %v2901_v4 = vor.u32 %v3832_v60, %v2900_v59  ;;  %v2905_v5 = vor.u32 %v3830_v61, %v2902_v63 }
  0x1f   :  { %319 = vmatpush.bf16.msra.mxu1 %v2937_v45  ;;  %v2910_v3 = vld [vmem:[#allocation2 + $0x58] sm:$0xf0]  ;;  %v2909_v6 = vor.u32 %v3833_v1, %v2908_v0  ;;  %v2884_v7 = vld [vmem:[#allocation2 + $0x20] sm:$0xf]  ;;  %v3828_v8 = vld [vmem:[#allocation2 + $0x2c] sm:$0xf0] }
  0x20   :  { %338 = vmatpush.bf16.msra.mxu2 %v2941_v46  ;;  %357 = vmatpush.bf16.msra.mxu3 %v2945_v50  ;;  %v3826_v9 = vld [vmem:[#allocation2 + $0x24] sm:$0xf]  ;;  %v2913_v10 = vor.u32 %v3831_v2, %v2910_v3  ;;  %v2886_v11 = vld [vmem:[#allocation2 + $0x30] sm:$0xf0]  ;;  %v2892_v12 = vld [vmem:[#allocation2 + $0x28] sm:$0xf]  ;;  %v2885_v16 = vor.u32 %v3828_v8, %v2884_v7 }
  0x21   :  { %v3829_v13 = vld [vmem:[#allocation2 + $0x34] sm:$0xf0]  ;;  %v3827_v14 = vld [vmem:[#allocation2 + $0x2c] sm:$0xf]  ;;  %v2894_v15 = vld [vmem:[#allocation2 + $0x38] sm:$0xf0]  ;;  %v2889_v18 = vor.u32 %v3826_v9, %v2886_v11 }
  0x22   :  { %301 = vmatpush.bf16.msra.mxu0 %v2917_v56  ;;  %v2868_v17 = vld [vmem:[#allocation2] sm:$0xf]  ;;  %v2893_v19 = vor.u32 %v3829_v13, %v2892_v12  ;;  %v3824_v20 = vld [vmem:[#allocation2 + $0xc] sm:$0xf0]  ;;  %v3822_v21 = vld [vmem:[#allocation2 + $0x4] sm:$0xf]  ;;  %v2897_v23 = vor.u32 %v3827_v14, %v2894_v15 }
  0x23   :  { %320 = vmatpush.bf16.msra.mxu1 %v2921_v57  ;;  %v2870_v22 = vld [vmem:[#allocation2 + $0x10] sm:$0xf0]  ;;  %v2876_v24 = vld [vmem:[#allocation2 + $0x8] sm:$0xf]  ;;  %v3825_v25 = vld [vmem:[#allocation2 + $0x14] sm:$0xf0]  ;;  %v2869_v30 = vor.u32 %v3824_v20, %v2868_v17 }
  0x24   :  { %339 = vmatpush.bf16.msra.mxu2 %v2925_v58  ;;  %358 = vmatpush.bf16.msra.mxu3 %v2929_v62  ;;  %v3823_v26 = vld [vmem:[#allocation2 + $0xc] sm:$0xf]  ;;  %v2878_v27 = vld [vmem:[#allocation2 + $0x18] sm:$0xf0]  ;;  %v3108_v28 = vld [vmem:[#allocation7 + $0xe0] sm:$0xf]  ;;  %v2873_v33 = vor.u32 %v3822_v21, %v2870_v22  ;;  %v2877_v34 = vor.u32 %v3825_v25, %v2876_v24 }
  0x25   :  { %v3884_v29 = vld [vmem:[#allocation7 + $0xec] sm:$0xf0]  ;;  %v3882_v31 = vld [vmem:[#allocation7 + $0xe4] sm:$0xf]  ;;  %v3110_v32 = vld [vmem:[#allocation7 + $0xf0] sm:$0xf0]  ;;  %v2881_v36 = vor.u32 %v3823_v26, %v2878_v27 }
  0x26   :  { %302 = vmatpush.bf16.msra.mxu0 %v2901_v4  ;;  %v3820_v35 = vld [vmem:[%s5287_s0] sm:$0xff]  ;;  %v3109_v37 = vor.u32 %v3884_v29, %v3108_v28  ;;  %v3116_v38 = vld [vmem:[#allocation7 + $0xe8] sm:$0xf]  ;;  %v3885_v39 = vld [vmem:[#allocation7 + $0xf4] sm:$0xf0]  ;;  %v3113_v41 = vor.u32 %v3882_v31, %v3110_v32  ;;  %s2827_s26 = sshll.u32 %s5295_s8, 4  ;;  %s2828_s26 = int_to_ptr.hbm [resolvable:$true] %s2827_s26 }
  0x27   :  { %321 = vmatpush.bf16.msra.mxu1 %v2905_v5  ;;  %v3883_v40 = vld [vmem:[#allocation7 + $0xec] sm:$0xf]  ;;  %v3118_v42 = vld [vmem:[#allocation7 + $0xf8] sm:$0xf0]  ;;  %v3092_v43 = vld [vmem:[#allocation7 + $0xc0] sm:$0xf]  ;;  %v3117_v47 = vor.u32 %v3885_v39, %v3116_v38 }
  0x28   :  { %340 = vmatpush.bf16.msra.mxu2 %v2909_v6  ;;  %359 = vmatpush.bf16.msra.mxu3 %v2913_v10  ;;  %v3880_v44 = vld [vmem:[#allocation7 + $0xcc] sm:$0xf0]  ;;  %v3878_v45 = vld [vmem:[#allocation7 + $0xc4] sm:$0xf]  ;;  %v3094_v46 = vld [vmem:[#allocation7 + $0xd0] sm:$0xf0]  ;;  %v3121_v48 = vor.u32 %v3883_v40, %v3118_v42 }
  0x29   :  { %v3093_v49 = vor.u32 %v3880_v44, %v3092_v43  ;;  %v3100_v50 = vld [vmem:[#allocation7 + $0xc8] sm:$0xf]  ;;  %v3881_v51 = vld [vmem:[#allocation7 + $0xd4] sm:$0xf0]  ;;  %v3879_v52 = vld [vmem:[#allocation7 + $0xcc] sm:$0xf]  ;;  %v3097_v53 = vor.u32 %v3878_v45, %v3094_v46 }
  0x2a   :  { %303 = vmatpush.bf16.msra.mxu0 %v2885_v16  ;;  %v3102_v54 = vld [vmem:[#allocation7 + $0xd8] sm:$0xf0]  ;;  %v3076_v55 = vld [vmem:[#allocation7 + $0xa0] sm:$0xf]  ;;  %v3876_v56 = vld [vmem:[#allocation7 + $0xac] sm:$0xf0]  ;;  %v3101_v59 = vor.u32 %v3881_v51, %v3100_v50 }
  0x2b   :  { %322 = vmatpush.bf16.msra.mxu1 %v2889_v18  ;;  %v3874_v57 = vld [vmem:[#allocation7 + $0xa4] sm:$0xf]  ;;  %v3078_v58 = vld [vmem:[#allocation7 + $0xb0] sm:$0xf0]  ;;  %v3105_v60 = vor.u32 %v3879_v52, %v3102_v54  ;;  %v3077_v61 = vor.u32 %v3876_v56, %v3076_v55  ;;  %v3084_v62 = vld [vmem:[#allocation7 + $0xa8] sm:$0xf] }
  0x2c   :  { %341 = vmatpush.bf16.msra.mxu2 %v2893_v19  ;;  %360 = vmatpush.bf16.msra.mxu3 %v2897_v23  ;;  %v3877_v63 = vld [vmem:[#allocation7 + $0xb4] sm:$0xf0]  ;;  %v3875_v0 = vld [vmem:[#allocation7 + $0xac] sm:$0xf]  ;;  %v3081_v1 = vor.u32 %v3874_v57, %v3078_v58  ;;  %v3086_v2 = vld [vmem:[#allocation7 + $0xb8] sm:$0xf0] }
  0x2d   :  { %v3060_v3 = vld [vmem:[#allocation7 + $0x80] sm:$0xf]  ;;  %v3872_v4 = vld [vmem:[#allocation7 + $0x8c] sm:$0xf0]  ;;  %v3870_v5 = vld [vmem:[#allocation7 + $0x84] sm:$0xf]  ;;  %v3085_v7 = vor.u32 %v3877_v63, %v3084_v62  ;;  %v3089_v8 = vor.u32 %v3875_v0, %v3086_v2 }
  0x2e   :  { %304 = vmatpush.bf16.msra.mxu0 %v2869_v30  ;;  %v3062_v6 = vld [vmem:[#allocation7 + $0x90] sm:$0xf0]  ;;  %v3061_v9 = vor.u32 %v3872_v4, %v3060_v3  ;;  %v3068_v10 = vld [vmem:[#allocation7 + $0x88] sm:$0xf]  ;;  %v3873_v11 = vld [vmem:[#allocation7 + $0x94] sm:$0xf0] }
  0x2f   :  { %323 = vmatpush.bf16.msra.mxu1 %v2873_v33  ;;  %v3871_v12 = vld [vmem:[#allocation7 + $0x8c] sm:$0xf]  ;;  %v3065_v13 = vor.u32 %v3870_v5, %v3062_v6  ;;  %v3070_v14 = vld [vmem:[#allocation7 + $0x98] sm:$0xf0]  ;;  %v3044_v15 = vld [vmem:[#allocation7 + $0x60] sm:$0xf]  ;;  %v3069_v19 = vor.u32 %v3873_v11, %v3068_v10 }
  0x30   :  { %342 = vmatpush.bf16.msra.mxu2 %v2877_v34  ;;  %361 = vmatpush.bf16.msra.mxu3 %v2881_v36  ;;  %v3868_v16 = vld [vmem:[#allocation7 + $0x6c] sm:$0xf0]  ;;  %v3866_v17 = vld [vmem:[#allocation7 + $0x64] sm:$0xf]  ;;  %v3046_v18 = vld [vmem:[#allocation7 + $0x70] sm:$0xf0]  ;;  %v3073_v21 = vor.u32 %v3871_v12, %v3070_v14 }
  0x31   :  { %305 = vmatmul.bf16.vlgmr.msra.gmra.mxu0 %v3820_v35  ;;  %v3821_v20 = vld [vmem:[%s5287_s0 + $0x8] sm:$0xff]  ;;  %v3045_v22 = vor.u32 %v3868_v16, %v3044_v15  ;;  %v3869_v24 = vld [vmem:[#allocation7 + $0x74] sm:$0xf0]  ;;  %v3049_v26 = vor.u32 %v3866_v17, %v3046_v18  ;;  %v3054_v27 = vld [vmem:[#allocation7 + $0x78] sm:$0xf0]  ;;  %v4353_v2 = vmov 0  }
  0x32   :  { %565 = vmatpush.bf16.msrb.mxu0 %v3109_v37  ;;  %324 = vmatmul.bf16.vlgmr.msra.gmra.mxu1 %v3820_v35  ;;  %v3052_v23 = vld [vmem:[#allocation7 + $0x68] sm:$0xf]  ;;  %v3867_v25 = vld [vmem:[#allocation7 + $0x6c] sm:$0xf]  ;;  %v3028_v28 = vld [vmem:[#allocation7 + $0x40] sm:$0xf] }
  0x33   :  { %578 = vmatpush.bf16.msrb.mxu1 %v3113_v41  ;;  %343 = vmatmul.bf16.vlgmr.msra.gmra.mxu2 %v3820_v35  ;;  %v3864_v29 = vld [vmem:[#allocation7 + $0x4c] sm:$0xf0]  ;;  %v3862_v30 = vld [vmem:[#allocation7 + $0x44] sm:$0xf]  ;;  %v3030_v31 = vld [vmem:[#allocation7 + $0x50] sm:$0xf0]  ;;  %v3053_v32 = vor.u32 %v3869_v24, %v3052_v23  ;;  %v3057_v33 = vor.u32 %v3867_v25, %v3054_v27 }
  0x34   :  { %362 = vmatmul.bf16.vlgmr.msra.gmra.mxu3 %v3820_v35  ;;  %591 = vmatpush.bf16.msrb.mxu2 %v3117_v47  ;;  %v3029_v34 = vor.u32 %v3864_v29, %v3028_v28  ;;  %v3036_v35 = vld [vmem:[#allocation7 + $0x48] sm:$0xf]  ;;  %v3865_v36 = vld [vmem:[#allocation7 + $0x54] sm:$0xf0]  ;;  %v3863_v37 = vld [vmem:[#allocation7 + $0x4c] sm:$0xf]  ;;  %v3033_v38 = vor.u32 %v3862_v30, %v3030_v31 }
  0x35   :  { %604 = vmatpush.bf16.msrb.mxu3 %v3121_v48  ;;  %v3038_v39 = vld [vmem:[#allocation7 + $0x58] sm:$0xf0]  ;;  %v3012_v40 = vld [vmem:[#allocation7 + $0x20] sm:$0xf]  ;;  %v3860_v41 = vld [vmem:[#allocation7 + $0x2c] sm:$0xf0]  ;;  %v3037_v44 = vor.u32 %v3865_v36, %v3036_v35 }
  0x36   :  { %566 = vmatpush.bf16.msrb.mxu0 %v3093_v49  ;;  %v3858_v42 = vld [vmem:[#allocation7 + $0x24] sm:$0xf]  ;;  %v3014_v43 = vld [vmem:[#allocation7 + $0x30] sm:$0xf0]  ;;  %v3041_v45 = vor.u32 %v3863_v37, %v3038_v39  ;;  %v3013_v46 = vor.u32 %v3860_v41, %v3012_v40  ;;  %v3020_v47 = vld [vmem:[#allocation7 + $0x28] sm:$0xf] }
  0x37   :  { %579 = vmatpush.bf16.msrb.mxu1 %v3097_v53  ;;  %v3861_v48 = vld [vmem:[#allocation7 + $0x34] sm:$0xf0]  ;;  %v3859_v49 = vld [vmem:[#allocation7 + $0x2c] sm:$0xf]  ;;  %v3017_v50 = vor.u32 %v3858_v42, %v3014_v43  ;;  %v3022_v51 = vld [vmem:[#allocation7 + $0x38] sm:$0xf0] }
  0x38   :  { %592 = vmatpush.bf16.msrb.mxu2 %v3101_v59  ;;  %v2996_v52 = vld [vmem:[#allocation7] sm:$0xf]  ;;  %v3856_v53 = vld [vmem:[#allocation7 + $0xc] sm:$0xf0]  ;;  %v3854_v54 = vld [vmem:[#allocation7 + $0x4] sm:$0xf]  ;;  %v3021_v56 = vor.u32 %v3861_v48, %v3020_v47  ;;  %v3025_v57 = vor.u32 %v3859_v49, %v3022_v51 }
  0x39   :  { %605 = vmatpush.bf16.msrb.mxu3 %v3105_v60  ;;  %v2998_v55 = vld [vmem:[#allocation7 + $0x10] sm:$0xf0]  ;;  %v2997_v58 = vor.u32 %v3856_v53, %v2996_v52  ;;  %v3004_v59 = vld [vmem:[#allocation7 + $0x8] sm:$0xf]  ;;  %v3857_v60 = vld [vmem:[#allocation7 + $0x14] sm:$0xf0] }
  0x3a   :  { %567 = vmatpush.bf16.msrb.mxu0 %v3077_v61  ;;  %v3001_v61 = vor.u32 %v3854_v54, %v2998_v55  ;;  %v3855_v62 = vld [vmem:[#allocation7 + $0xc] sm:$0xf]  ;;  %v3006_v63 = vld [vmem:[#allocation7 + $0x18] sm:$0xf0]  ;;  %v3005_v0 = vor.u32 %v3857_v60, %v3004_v59  ;;  %v3239_v3 = vld [vmem:[#allocation7 + $0x1e0] sm:$0xf] }
  0x3b   :  { %580 = vmatpush.bf16.msrb.mxu1 %v3081_v1  ;;  %v3009_v1 = vor.u32 %v3855_v62, %v3006_v63  ;;  %v3948_v4 = vld [vmem:[#allocation7 + $0x1ec] sm:$0xf0]  ;;  %v3946_v5 = vld [vmem:[#allocation7 + $0x1e4] sm:$0xf]  ;;  %v3947_v12 = vld [vmem:[#allocation7 + $0x1ec] sm:$0xf] }
  0x3c   :  { %593 = vmatpush.bf16.msrb.mxu2 %v3085_v7  ;;  %v3240_v6 = vor.u32 %v3948_v4, %v3239_v3  ;;  %v3241_v7 = vld [vmem:[#allocation7 + $0x1f0] sm:$0xf0]  ;;  %v3223_v15 = vld [vmem:[#allocation7 + $0x1c0] sm:$0xf]  ;;  %v3944_v16 = vld [vmem:[#allocation7 + $0x1cc] sm:$0xf0] }
  0x3d   :  { %606 = vmatpush.bf16.msrb.mxu3 %v3089_v8  ;;  %v3247_v8 = vld [vmem:[#allocation7 + $0x1e8] sm:$0xf]  ;;  %v3244_v10 = vor.u32 %v3946_v5, %v3241_v7  ;;  %v3224_v17 = vor.u32 %v3944_v16, %v3223_v15  ;;  %v3942_v18 = vld [vmem:[#allocation7 + $0x1c4] sm:$0xf]  ;;  %v3943_v23 = vld [vmem:[#allocation7 + $0x1cc] sm:$0xf] }
  0x3e   :  { %568 = vmatpush.bf16.msrb.mxu0 %v3061_v9  ;;  %v3949_v9 = vld [vmem:[#allocation7 + $0x1f4] sm:$0xf0]  ;;  %v3233_v24 = vld [vmem:[#allocation7 + $0x1d8] sm:$0xf0]  ;;  %v3207_v27 = vld [vmem:[#allocation7 + $0x1a0] sm:$0xf] }
  0x3f   :  { %581 = vmatpush.bf16.msrb.mxu1 %v3065_v13  ;;  %v3248_v11 = vor.u32 %v3949_v9, %v3247_v8  ;;  %v3249_v13 = vld [vmem:[#allocation7 + $0x1f8] sm:$0xf0]  ;;  %v3940_v28 = vld [vmem:[#allocation7 + $0x1ac] sm:$0xf0]  ;;  %v3938_v29 = vld [vmem:[#allocation7 + $0x1a4] sm:$0xf] }
  0x40   :  { %594 = vmatpush.bf16.msrb.mxu2 %v3069_v19  ;;  %v3252_v14 = vor.u32 %v3947_v12, %v3249_v13  ;;  %v3225_v19 = vld [vmem:[#allocation7 + $0x1d0] sm:$0xf0]  ;;  %v3208_v30 = vor.u32 %v3940_v28, %v3207_v27  ;;  %v3939_v36 = vld [vmem:[#allocation7 + $0x1ac] sm:$0xf]  ;;  %v3217_v37 = vld [vmem:[#allocation7 + $0x1b8] sm:$0xf0] }
  0x41   :  { %607 = vmatpush.bf16.msrb.mxu3 %v3073_v21  ;;  %310 = vmatmul.bf16.gmra.mxu0 %v3821_v20  ;;  %v3228_v21 = vor.u32 %v3942_v18, %v3225_v19  ;;  %v3209_v31 = vld [vmem:[#allocation7 + $0x1b0] sm:$0xf0]  ;;  %v3191_v39 = vld [vmem:[#allocation7 + $0x180] sm:$0xf]  ;;  %v3936_v40 = vld [vmem:[#allocation7 + $0x18c] sm:$0xf0] }
  0x42   :  { %569 = vmatpush.bf16.msrb.mxu0 %v3045_v22  ;;  %329 = vmatmul.bf16.gmra.mxu1 %v3821_v20  ;;  %v3945_v22 = vld [vmem:[#allocation7 + $0x1d4] sm:$0xf0]  ;;  %v3934_v41 = vld [vmem:[#allocation7 + $0x184] sm:$0xf]  ;;  %v3192_v42 = vor.u32 %v3936_v40, %v3191_v39  ;;  %v3193_v43 = vld [vmem:[#allocation7 + $0x190] sm:$0xf0] }
  0x43   :  { %582 = vmatpush.bf16.msrb.mxu1 %v3049_v26  ;;  %348 = vmatmul.bf16.gmra.mxu2 %v3821_v20  ;;  %v3236_v26 = vor.u32 %v3943_v23, %v3233_v24  ;;  %v3935_v48 = vld [vmem:[#allocation7 + $0x18c] sm:$0xf]  ;;  %v3201_v49 = vld [vmem:[#allocation7 + $0x198] sm:$0xf0]  ;;  %v3932_v52 = vld [vmem:[#allocation7 + $0x16c] sm:$0xf0] }
  0x44   :  { %367 = vmatmul.bf16.gmra.mxu3 %v3821_v20  ;;  %595 = vmatpush.bf16.msrb.mxu2 %v3053_v32  ;;  %v3231_v20 = vld [vmem:[#allocation7 + $0x1c8] sm:$0xf]  ;;  %v3204_v51 = vor.u32 %v3935_v48, %v3201_v49  ;;  %v3930_v53 = vld [vmem:[#allocation7 + $0x164] sm:$0xf]  ;;  %v3177_v54 = vld [vmem:[#allocation7 + $0x170] sm:$0xf0] }
  0x45   :  { %608 = vmatpush.bf16.msrb.mxu3 %v3057_v33  ;;  %v3232_v25 = vor.u32 %v3945_v22, %v3231_v20  ;;  %v3215_v32 = vld [vmem:[#allocation7 + $0x1a8] sm:$0xf]  ;;  %v3941_v33 = vld [vmem:[#allocation7 + $0x1b4] sm:$0xf0]  ;;  %v3931_v59 = vld [vmem:[#allocation7 + $0x16c] sm:$0xf] }
  0x46   :  { %570 = vmatpush.bf16.msrb.mxu0 %v3029_v34  ;;  %v3212_v34 = vor.u32 %v3938_v29, %v3209_v31  ;;  %v3216_v35 = vor.u32 %v3941_v33, %v3215_v32  ;;  %v3159_v63 = vld [vmem:[#allocation7 + $0x140] sm:$0xf]  ;;  %v3161_v4 = vld [vmem:[#allocation7 + $0x150] sm:$0xf0]  ;;  %v3167_v5 = vld [vmem:[#allocation7 + $0x148] sm:$0xf] }
  0x47   :  { %583 = vmatpush.bf16.msrb.mxu1 %v3033_v38  ;;  %v3220_v38 = vor.u32 %v3939_v36, %v3217_v37  ;;  %v3927_v9 = vld [vmem:[#allocation7 + $0x14c] sm:$0xf]  ;;  %v3924_v13 = vld [vmem:[#allocation7 + $0x12c] sm:$0xf0]  ;;  %v3145_v15 = vld [vmem:[#allocation7 + $0x130] sm:$0xf0] }
  0x48   :  { %596 = vmatpush.bf16.msrb.mxu2 %v3037_v44  ;;  %v3199_v44 = vld [vmem:[#allocation7 + $0x188] sm:$0xf]  ;;  %v3925_v19 = vld [vmem:[#allocation7 + $0x134] sm:$0xf0]  ;;  %v3923_v20 = vld [vmem:[#allocation7 + $0x12c] sm:$0xf] }
  0x49   :  { %609 = vmatpush.bf16.msrb.mxu3 %v3041_v45  ;;  %v3937_v45 = vld [vmem:[#allocation7 + $0x194] sm:$0xf0]  ;;  %v3151_v18 = vld [vmem:[#allocation7 + $0x128] sm:$0xf]  ;;  %v3153_v22 = vld [vmem:[#allocation7 + $0x138] sm:$0xf0] }
  0x4a   :  { %571 = vmatpush.bf16.msrb.mxu0 %v3013_v46  ;;  %v3196_v46 = vor.u32 %v3934_v41, %v3193_v43  ;;  %v3200_v47 = vor.u32 %v3937_v45, %v3199_v44  ;;  %v3156_v23 = vor.u32 %v3923_v20, %v3153_v22  ;;  %v3918_v27 = vld [vmem:[#allocation7 + $0x104] sm:$0xf]  ;;  %v3135_v31 = vld [vmem:[#allocation7 + $0x108] sm:$0xf]  ;;  %v3921_v32 = vld [vmem:[#allocation7 + $0x114] sm:$0xf0] }
  0x4b   :  { %584 = vmatpush.bf16.msrb.mxu1 %v3017_v50  ;;  %v3175_v50 = vld [vmem:[#allocation7 + $0x160] sm:$0xf]  ;;  %v3137_v36 = vld [vmem:[#allocation7 + $0x118] sm:$0xf0]  ;;  %v3916_v39 = vld [vmem:[#allocation5 + $0xec] sm:$0xf0] }
  0x4c   :  { %597 = vmatpush.bf16.msrb.mxu2 %v3021_v56  ;;  %v3176_v55 = vor.u32 %v3932_v52, %v3175_v50  ;;  %v3180_v56 = vor.u32 %v3930_v53, %v3177_v54  ;;  %v3367_v37 = vld [vmem:[#allocation5 + $0xe0] sm:$0xf]  ;;  %v3914_v40 = vld [vmem:[#allocation5 + $0xe4] sm:$0xf]  ;;  %v3369_v41 = vld [vmem:[#allocation5 + $0xf0] sm:$0xf0] }
  0x4d   :  { %610 = vmatpush.bf16.msrb.mxu3 %v3025_v57  ;;  %v3183_v57 = vld [vmem:[#allocation7 + $0x168] sm:$0xf]  ;;  %v3372_v43 = vor.u32 %v3914_v40, %v3369_v41  ;;  %v3917_v45 = vld [vmem:[#allocation5 + $0xf4] sm:$0xf0]  ;;  %v3377_v48 = vld [vmem:[#allocation5 + $0xf8] sm:$0xf0] }
  0x4e   :  { %572 = vmatpush.bf16.msrb.mxu0 %v2997_v58  ;;  %v3933_v58 = vld [vmem:[#allocation7 + $0x174] sm:$0xf0]  ;;  %v3375_v44 = vld [vmem:[#allocation5 + $0xe8] sm:$0xf]  ;;  %v3351_v50 = vld [vmem:[#allocation5 + $0xc0] sm:$0xf] }
  0x4f   :  { %585 = vmatpush.bf16.msrb.mxu1 %v3001_v61  ;;  %v3184_v60 = vor.u32 %v3933_v58, %v3183_v57  ;;  %v3185_v61 = vld [vmem:[#allocation7 + $0x178] sm:$0xf0]  ;;  %v3910_v52 = vld [vmem:[#allocation5 + $0xc4] sm:$0xf]  ;;  %v3913_v57 = vld [vmem:[#allocation5 + $0xd4] sm:$0xf0] }
  0x50   :  { %598 = vmatpush.bf16.msrb.mxu2 %v3005_v0  ;;  %v3188_v62 = vor.u32 %v3931_v59, %v3185_v61  ;;  %v3928_v0 = vld [vmem:[#allocation7 + $0x14c] sm:$0xf0]  ;;  %v3327_v22 = vld [vmem:[#allocation5 + $0x88] sm:$0xf]  ;;  %v3305_v41 = vld [vmem:[#allocation5 + $0x70] sm:$0xf0] }
  0x51   :  { %611 = vmatpush.bf16.msrb.mxu3 %v3009_v1  ;;  %573 = vmatmul.bf16.vlgmr.msrb.gmra.mxu0 %v4353_v2  ;;  %v3926_v1 = vld [vmem:[#allocation7 + $0x144] sm:$0xf]  ;;  %v3160_v3 = vor.u32 %v3928_v0, %v3159_v63  ;;  %v3361_v63 = vld [vmem:[#allocation5 + $0xd8] sm:$0xf0]  ;;  %v115_v0 = vld [vmem:[%s5291_s4] sm:$0xf] }
  0x52   :  { %586 = vmatmul.bf16.vlgmr.msrb.gmra.mxu1 %v4353_v2  ;;  %910 = vmatpush.bf16.msra.mxu0 %v3240_v6  ;;  %v3929_v6 = vld [vmem:[#allocation7 + $0x154] sm:$0xf0]  ;;  %v3164_v7 = vor.u32 %v3926_v1, %v3161_v4  ;;  %v3335_v4 = vld [vmem:[#allocation5 + $0xa0] sm:$0xf]  ;;  %s4354_s0 = smov [#allocation9]   ;;  %s2838_s29 = sshll.u32 %s5296_s9, 4  ;;  %s2839_s29 = int_to_ptr.hbm [resolvable:$true] %s2838_s29 }
  0x53   :  { %599 = vmatmul.bf16.vlgmr.msrb.gmra.mxu2 %v4353_v2  ;;  %923 = vmatpush.bf16.msra.mxu1 %v3244_v10  ;;  %v3168_v8 = vor.u32 %v3929_v6, %v3167_v5  ;;  %v3169_v10 = vld [vmem:[#allocation7 + $0x158] sm:$0xf0]  ;;  %v3908_v5 = vld [vmem:[#allocation5 + $0xac] sm:$0xf0]  ;;  %v3906_v6 = vld [vmem:[#allocation5 + $0xa4] sm:$0xf] }
  0x54   :  { %612 = vmatmul.bf16.vlgmr.msrb.gmra.mxu3 %v4353_v2  ;;  %936 = vmatpush.bf16.msra.mxu2 %v3248_v11  ;;  %v3143_v11 = vld [vmem:[#allocation7 + $0x120] sm:$0xf]  ;;  %v3172_v12 = vor.u32 %v3927_v9, %v3169_v10  ;;  %v3343_v9 = vld [vmem:[#allocation5 + $0xa8] sm:$0xf]  ;;  %v3909_v10 = vld [vmem:[#allocation5 + $0xb4] sm:$0xf0] }
  0x55   :  { %949 = vmatpush.bf16.msra.mxu3 %v3252_v14  ;;  %v3922_v14 = vld [vmem:[#allocation7 + $0x124] sm:$0xf]  ;;  %v3144_v16 = vor.u32 %v3924_v13, %v3143_v11  ;;  %v3907_v13 = vld [vmem:[#allocation5 + $0xac] sm:$0xf]  ;;  %s2825_s27 = sshll.u32 %s4354_s0, 4  ;;  %s4355_s30 = smov [#allocation11]   ;;  %s2826_s27 = int_to_ptr.vmem [resolvable:$true] %s2825_s27 }
  0x56   :  { %911 = vmatpush.bf16.msra.mxu0 %v3224_v17  ;;  %v3148_v17 = vor.u32 %v3922_v14, %v3145_v15  ;;  %v3345_v14 = vld [vmem:[#allocation5 + $0xb8] sm:$0xf0]  ;;  %v4445_v15 = vperm.slane %v115_v0, 0  ;;  %s2836_s10 = sshll.u32 %s4355_s30, 4  ;;  %s2816_s13 = sshll.u32 %s5294_s7, 4  ;;  %s2837_s10 = int_to_ptr.vmem [resolvable:$true] %s2836_s10  ;;  %s2817_s13 = int_to_ptr.hbm [resolvable:$true] %s2816_s13 }
  0x57   :  { %924 = vmatpush.bf16.msra.mxu1 %v3228_v21  ;;  %v3152_v21 = vor.u32 %v3925_v19, %v3151_v18  ;;  %v3902_v18 = vld [vmem:[#allocation5 + $0x84] sm:$0xf] }
  0x58   :  { %937 = vmatpush.bf16.msra.mxu2 %v3232_v25  ;;  %v3127_v25 = vld [vmem:[#allocation7 + $0x100] sm:$0xf]  ;;  %5436 = vst [vmem:[#allocation16_spill] sm:$0xff] %v4445_v15 }
  0x59   :  { %950 = vmatpush.bf16.msra.mxu3 %v3236_v26  ;;  %v3920_v26 = vld [vmem:[#allocation7 + $0x10c] sm:$0xf0] }
  0x5a   :  { %912 = vmatpush.bf16.msra.mxu0 %v3208_v30  ;;  %v3128_v29 = vor.u32 %v3920_v26, %v3127_v25  ;;  %v3129_v30 = vld [vmem:[#allocation7 + $0x110] sm:$0xf0]  ;;  %v4449_v25 = vperm.slane %v115_v0, 1 }
  0x5b   :  { %925 = vmatpush.bf16.msra.mxu1 %v3212_v34  ;;  %v3132_v33 = vor.u32 %v3918_v27, %v3129_v30  ;;  %v3136_v34 = vor.u32 %v3921_v32, %v3135_v31  ;;  %v3903_v31 = vld [vmem:[#allocation5 + $0x8c] sm:$0xf]  ;;  %v3329_v32 = vld [vmem:[#allocation5 + $0x98] sm:$0xf0] }
  0x5c   :  { %938 = vmatpush.bf16.msra.mxu2 %v3216_v35  ;;  %v3919_v35 = vld [vmem:[#allocation7 + $0x10c] sm:$0xf]  ;;  %5437 = vst [vmem:[#allocation17_spill] sm:$0xff] %v4449_v25 }
  0x5d   :  { %951 = vmatpush.bf16.msra.mxu3 %v3220_v38  ;;  %v3140_v38 = vor.u32 %v3919_v35, %v3137_v36  ;;  %v3332_v35 = vor.u32 %v3903_v31, %v3329_v32 }
  0x5e   :  { %913 = vmatpush.bf16.msra.mxu0 %v3192_v42  ;;  %v3368_v42 = vor.u32 %v3916_v39, %v3367_v37  ;;  %v3303_v37 = vld [vmem:[#allocation5 + $0x60] sm:$0xf]  ;;  %v3898_v39 = vld [vmem:[#allocation5 + $0x64] sm:$0xf] }
  0x5f   :  { %926 = vmatpush.bf16.msra.mxu1 %v3196_v46  ;;  %v3915_v46 = vld [vmem:[#allocation5 + $0xec] sm:$0xf] }
  0x60   :  { %939 = vmatpush.bf16.msra.mxu2 %v3200_v47  ;;  %v3376_v47 = vor.u32 %v3917_v45, %v3375_v44  ;;  %v3380_v49 = vor.u32 %v3915_v46, %v3377_v48  ;;  %v3308_v44 = vor.u32 %v3898_v39, %v3305_v41  ;;  %v3899_v46 = vld [vmem:[#allocation5 + $0x6c] sm:$0xf]  ;;  %v4459_v48 = vperm.slane %v115_v0, 2 }
  0x61   :  { %952 = vmatpush.bf16.msra.mxu3 %v3204_v51  ;;  %v3912_v51 = vld [vmem:[#allocation5 + $0xcc] sm:$0xf0] }
  0x62   :  { %914 = vmatpush.bf16.msra.mxu0 %v3176_v55  ;;  %v3352_v54 = vor.u32 %v3912_v51, %v3351_v50  ;;  %v3353_v55 = vld [vmem:[#allocation5 + $0xd0] sm:$0xf0]  ;;  %5440 = vst [vmem:[#allocation20_spill] sm:$0xff] %v4459_v48  ;;  %v3287_v51 = vld [vmem:[#allocation5 + $0x40] sm:$0xf] }
  0x63   :  { %927 = vmatpush.bf16.msra.mxu1 %v3180_v56  ;;  %v3359_v56 = vld [vmem:[#allocation5 + $0xc8] sm:$0xf] }
  0x64   :  { %940 = vmatpush.bf16.msra.mxu2 %v3184_v60  ;;  %v3356_v60 = vor.u32 %v3910_v52, %v3353_v55  ;;  %v3360_v61 = vor.u32 %v3913_v57, %v3359_v56  ;;  %v3896_v52 = vld [vmem:[#allocation5 + $0x4c] sm:$0xf0]  ;;  %v3289_v57 = vld [vmem:[#allocation5 + $0x50] sm:$0xf0] }
  0x65   :  { %953 = vmatpush.bf16.msra.mxu3 %v3188_v62  ;;  %v3911_v62 = vld [vmem:[#allocation5 + $0xcc] sm:$0xf]  ;;  %v3288_v56 = vor.u32 %v3896_v52, %v3287_v51  ;;  %v3978_v51 = vld [vmem:[#allocation7 + $0xe4] sm:$0xf]  ;;  %v3501_v52 = vld [vmem:[#allocation7 + $0xf0] sm:$0xf0] }
  0x66   :  { %915 = vmatpush.bf16.msra.mxu0 %v3160_v3  ;;  %v3364_v3 = vor.u32 %v3911_v62, %v3361_v63 }
  0x67   :  { %928 = vmatpush.bf16.msra.mxu1 %v3164_v7  ;;  %v3336_v7 = vor.u32 %v3908_v5, %v3335_v4  ;;  %v3895_v5 = vld [vmem:[#allocation5 + $0x4c] sm:$0xf] }
  0x68   :  { %941 = vmatpush.bf16.msra.mxu2 %v3168_v8  ;;  %v3337_v8 = vld [vmem:[#allocation5 + $0xb0] sm:$0xf0] }
  0x69   :  { %954 = vmatpush.bf16.msra.mxu3 %v3172_v12  ;;  %v3340_v11 = vor.u32 %v3906_v6, %v3337_v8  ;;  %v3344_v12 = vor.u32 %v3909_v10, %v3343_v9  ;;  %v3297_v6 = vld [vmem:[#allocation5 + $0x58] sm:$0xf0]  ;;  %v3271_v10 = vld [vmem:[#allocation5 + $0x20] sm:$0xf] }
  0x6a   :  { %916 = vmatpush.bf16.msra.mxu0 %v3144_v16  ;;  %v3348_v16 = vor.u32 %v3907_v13, %v3345_v14  ;;  %v3300_v9 = vor.u32 %v3895_v5, %v3297_v6  ;;  %v3273_v14 = vld [vmem:[#allocation5 + $0x30] sm:$0xf0] }
  0x6b   :  { %929 = vmatpush.bf16.msra.mxu1 %v3148_v17  ;;  %v3904_v17 = vld [vmem:[#allocation5 + $0x8c] sm:$0xf0] }
  0x6c   :  { %942 = vmatpush.bf16.msra.mxu2 %v3152_v21  ;;  %v3321_v21 = vld [vmem:[#allocation5 + $0x90] sm:$0xf0] }
  0x6d   :  { %955 = vmatpush.bf16.msra.mxu3 %v3156_v23  ;;  %v3905_v23 = vld [vmem:[#allocation5 + $0x94] sm:$0xf0] }
  0x6e   :  { %917 = vmatpush.bf16.msra.mxu0 %v3128_v29  ;;  %v3324_v29 = vor.u32 %v3902_v18, %v3321_v21  ;;  %v3328_v30 = vor.u32 %v3905_v23, %v3327_v22  ;;  %v3281_v21 = vld [vmem:[#allocation5 + $0x38] sm:$0xf0]  ;;  %v3255_v23 = vld [vmem:[#allocation5] sm:$0xf] }
  0x6f   :  { %930 = vmatpush.bf16.msra.mxu1 %v3132_v33 }
  0x70   :  { %943 = vmatpush.bf16.msra.mxu2 %v3136_v34 }
  0x71   :  { %956 = vmatpush.bf16.msra.mxu3 %v3140_v38  ;;  %918 = vmatmul.bf16.vlgmr.msra.gmra.mxu0 %v4353_v2  ;;  %v3900_v38 = vld [vmem:[#allocation5 + $0x6c] sm:$0xf0] }
  0x72   :  { %1122 = vmatpush.bf16.msrb.mxu0 %v3368_v42  ;;  %931 = vmatmul.bf16.vlgmr.msra.gmra.mxu1 %v4353_v2  ;;  %v3304_v40 = vor.u32 %v3900_v38, %v3303_v37  ;;  %v3311_v42 = vld [vmem:[#allocation5 + $0x68] sm:$0xf]  ;;  %v3889_v37 = vld [vmem:[#allocation5 + $0x14] sm:$0xf0] }
  0x73   :  { %1135 = vmatpush.bf16.msrb.mxu1 %v3372_v43  ;;  %944 = vmatmul.bf16.vlgmr.msra.gmra.mxu2 %v4353_v2  ;;  %v3901_v43 = vld [vmem:[#allocation5 + $0x74] sm:$0xf0] }
  0x74   :  { %1148 = vmatpush.bf16.msrb.mxu2 %v3376_v47  ;;  %957 = vmatmul.bf16.vlgmr.msra.gmra.mxu3 %v4353_v2  ;;  %v3319_v2 = vld [vmem:[#allocation5 + $0x80] sm:$0xf]  ;;  %v3312_v45 = vor.u32 %v3901_v43, %v3311_v42  ;;  %v3313_v47 = vld [vmem:[#allocation5 + $0x78] sm:$0xf0]  ;;  %v3887_v43 = vld [vmem:[#allocation5 + $0xc] sm:$0xf] }
  0x75   :  { %1161 = vmatpush.bf16.msrb.mxu3 %v3380_v49  ;;  %v3320_v20 = vor.u32 %v3904_v17, %v3319_v2  ;;  %v4461_v49 = vperm.slane %v115_v0, 3  ;;  %v3316_v50 = vor.u32 %v3899_v46, %v3313_v47  ;;  %v3893_v2 = vld [vmem:[#allocation5 + $0x34] sm:$0xf0] }
  0x76   :  { %1123 = vmatpush.bf16.msrb.mxu0 %v3352_v54  ;;  %v3894_v54 = vld [vmem:[#allocation5 + $0x44] sm:$0xf] }
  0x77   :  { %1136 = vmatpush.bf16.msrb.mxu1 %v3356_v60  ;;  %5441 = vst [vmem:[#allocation21_spill] sm:$0xff] %v4461_v49  ;;  %v3295_v60 = vld [vmem:[#allocation5 + $0x48] sm:$0xf]  ;;  %v3292_v0 = vor.u32 %v3894_v54, %v3289_v57  ;;  %v3981_v57 = vld [vmem:[#allocation7 + $0xf4] sm:$0xf0] }
  0x78   :  { %1149 = vmatpush.bf16.msrb.mxu2 %v3360_v61  ;;  %v3897_v61 = vld [vmem:[#allocation5 + $0x54] sm:$0xf0] }
  0x79   :  { %1162 = vmatpush.bf16.msrb.mxu3 %v3364_v3  ;;  %v3296_v4 = vor.u32 %v3897_v61, %v3295_v60  ;;  %v3979_v60 = vld [vmem:[#allocation7 + $0xec] sm:$0xf] }
  0x7a   :  { %1124 = vmatpush.bf16.msrb.mxu0 %v3336_v7 }
  0x7b   :  { %1137 = vmatpush.bf16.msrb.mxu1 %v3340_v11  ;;  %v3892_v11 = vld [vmem:[#allocation5 + $0x2c] sm:$0xf0] }
  0x7c   :  { %1150 = vmatpush.bf16.msrb.mxu2 %v3344_v12  ;;  %v3890_v12 = vld [vmem:[#allocation5 + $0x24] sm:$0xf]  ;;  %v3272_v13 = vor.u32 %v3892_v11, %v3271_v10 }
  0x7d   :  { %1163 = vmatpush.bf16.msrb.mxu3 %v3348_v16  ;;  %v3279_v16 = vld [vmem:[#allocation5 + $0x28] sm:$0xf]  ;;  %v3276_v17 = vor.u32 %v3890_v12, %v3273_v14  ;;  %v3974_v10 = vld [vmem:[#allocation7 + $0xc4] sm:$0xf]  ;;  %v3485_v12 = vld [vmem:[#allocation7 + $0xd0] sm:$0xf0] }
  0x7e   :  { %1125 = vmatpush.bf16.msrb.mxu0 %v3320_v20  ;;  %v3280_v18 = vor.u32 %v3893_v2, %v3279_v16  ;;  %v3891_v20 = vld [vmem:[#allocation5 + $0x2c] sm:$0xf]  ;;  %v3977_v14 = vld [vmem:[#allocation7 + $0xd4] sm:$0xf0]  ;;  %v4495_v16 = vor.u32 %v3974_v10, %v3485_v12  ;;  %v3461_v12 = vld [vmem:[#allocation7 + $0x98] sm:$0xf0] }
  0x7f   :  { %1138 = vmatpush.bf16.msrb.mxu1 %v3324_v29  ;;  %v3284_v22 = vor.u32 %v3891_v20, %v3281_v21  ;;  %v3886_v29 = vld [vmem:[#allocation5 + $0x4] sm:$0xf] }
  0x80   :  { %1151 = vmatpush.bf16.msrb.mxu2 %v3328_v30 }
  0x81   :  { %1164 = vmatpush.bf16.msrb.mxu3 %v3332_v35  ;;  %v3263_v35 = vld [vmem:[#allocation5 + $0x8] sm:$0xf] }
  0x82   :  { %1126 = vmatpush.bf16.msrb.mxu0 %v3304_v40  ;;  %v3264_v42 = vor.u32 %v3889_v37, %v3263_v35  ;;  %v3469_v35 = vld [vmem:[#allocation7 + $0xb0] sm:$0xf0]  ;;  %v3475_v37 = vld [vmem:[#allocation7 + $0xa8] sm:$0xf] }
  0x83   :  { %1139 = vmatpush.bf16.msrb.mxu1 %v3308_v44  ;;  %v3265_v44 = vld [vmem:[#allocation5 + $0x18] sm:$0xf0] }
  0x84   :  { %1152 = vmatpush.bf16.msrb.mxu2 %v3312_v45  ;;  %v3499_v45 = vld [vmem:[#allocation7 + $0xe0] sm:$0xf]  ;;  %v3268_v47 = vor.u32 %v3887_v43, %v3265_v44  ;;  %v3971_v43 = vld [vmem:[#allocation7 + $0xac] sm:$0xf]  ;;  %v3477_v44 = vld [vmem:[#allocation7 + $0xb8] sm:$0xf0] }
  0x85   :  { %1165 = vmatpush.bf16.msrb.mxu3 %v3316_v50  ;;  %v3980_v50 = vld [vmem:[#allocation7 + $0xec] sm:$0xf0] }
  0x86   :  { %1127 = vmatpush.bf16.msrb.mxu0 %v3288_v56  ;;  %v3507_v56 = vld [vmem:[#allocation7 + $0xe8] sm:$0xf] }
  0x87   :  { %1140 = vmatpush.bf16.msrb.mxu1 %v3292_v0  ;;  %v3509_v0 = vld [vmem:[#allocation7 + $0xf8] sm:$0xf0] }
  0x88   :  { %1153 = vmatpush.bf16.msrb.mxu2 %v3296_v4  ;;  %v3483_v4 = vld [vmem:[#allocation7 + $0xc0] sm:$0xf]  ;;  %v4488_v6 = vor.u32 %v3979_v60, %v3509_v0  ;;  %v3459_v0 = vld [vmem:[#allocation7 + $0x88] sm:$0xf] }
  0x89   :  { %1166 = vmatpush.bf16.msrb.mxu3 %v3300_v9  ;;  %v3976_v9 = vld [vmem:[#allocation7 + $0xcc] sm:$0xf0] }
  0x8a   :  { %1128 = vmatpush.bf16.msrb.mxu0 %v3272_v13  ;;  %v4492_v11 = vor.u32 %v3976_v9, %v3483_v4  ;;  %v3491_v13 = vld [vmem:[#allocation7 + $0xc8] sm:$0xf]  ;;  %v3969_v4 = vld [vmem:[#allocation7 + $0x94] sm:$0xf0] }
  0x8b   :  { %1141 = vmatpush.bf16.msrb.mxu1 %v3276_v17  ;;  %v4497_v2 = vor.u32 %v3977_v14, %v3491_v13  ;;  %v3975_v17 = vld [vmem:[#allocation7 + $0xcc] sm:$0xf] }
  0x8c   :  { %1154 = vmatpush.bf16.msrb.mxu2 %v3280_v18  ;;  %v3493_v18 = vld [vmem:[#allocation7 + $0xd8] sm:$0xf0] }
  0x8d   :  { %1167 = vmatpush.bf16.msrb.mxu3 %v3284_v22  ;;  %v4501_v22 = vor.u32 %v3975_v17, %v3493_v18  ;;  %v4533_v17 = vor.u32 %v3969_v4, %v3459_v0  ;;  %v3421_v0 = vld [vmem:[#allocation7 + $0x50] sm:$0xf0] }
  0x90   :  { %1155 = vmatpush.bf16.msrb.mxu2 %v3264_v42 }
  0x91   :  { %1168 = vmatpush.bf16.msrb.mxu3 %v3268_v47  ;;  %v3451_v47 = vld [vmem:[#allocation7 + $0x80] sm:$0xf] }
  0x95   :  { %1485 = vmatpush.bf16.msra.mxu3 %v4488_v6 }
  0x99   :  { %1486 = vmatpush.bf16.msra.mxu3 %v4501_v22 }
  0xae   :  { %v4426_v24 = vpop.f32.mrf.mxu0 }
  0xaf   :  { %v4428_v28 = vpop.f32.mrf.mxu1  ;;  %v307_v30 = vadd.f32 %v4426_v24, %v4445_v15 }
  0xb0   :  { %v326_v38 = vadd.f32 %v4428_v28, %v4449_v25  ;;  %v4483_v28 = vor.u32 %v3978_v51, %v3501_v52 }
  0xb6   :  { %v4430_v53 = vpop.f32.mrf.mxu2  ;;  %v4435_v59 = vpop.f32.mrf.mxu0 }
  0xb7   :  { %v4433_v58 = vpop.f32.mrf.mxu3  ;;  %v4441_v1 = vpop.f32.mrf.mxu1  ;;  %v345_v9 = vadd.f32 %v4430_v53, %v4459_v48 }
  0xb8   :  { %v364_v20 = vadd.f32 %v4433_v58, %v4461_v49 }
  0xbe   :  { %v4447_v19 = vpop.f32.mrf.mxu2  ;;  %v311_v27 = vpop.f32.mrf.mxu0 }
  0xbf   :  { %v4451_v26 = vpop.f32.mrf.mxu3  ;;  %v4454_v33 = vadd.f32 %v311_v27, %v4445_v15  ;;  %v330_v34 = vpop.f32.mrf.mxu1  ;;  %v3888_v27 = vld [vmem:[#allocation5 + $0xc] sm:$0xf0] }
  0xc0   :  { %v4457_v36 = vadd.f32 %v330_v34, %v4449_v25  ;;  %v3256_v32 = vor.u32 %v3888_v27, %v3255_v23  ;;  %v3257_v34 = vld [vmem:[#allocation5 + $0x10] sm:$0xf0]  ;;  %v3467_v23 = vld [vmem:[#allocation7 + $0xa0] sm:$0xf]  ;;  %v3972_v27 = vld [vmem:[#allocation7 + $0xac] sm:$0xf0] }
  0xc1   :  { %5438 = vst [vmem:[#allocation18_spill] sm:$0xff] %v4454_v33  ;;  %v3260_v41 = vor.u32 %v3886_v29, %v3257_v34  ;;  %v3970_v29 = vld [vmem:[#allocation7 + $0xa4] sm:$0xf]  ;;  %v4504_v34 = vor.u32 %v3972_v27, %v3467_v23  ;;  %v3964_v23 = vld [vmem:[#allocation7 + $0x6c] sm:$0xf0] }
  0xc2   :  { %5439 = vst [vmem:[#allocation19_spill] sm:$0xff] %v4457_v36  ;;  %1129 = vmatpush.bf16.msrb.mxu0 %v3256_v32  ;;  %v4508_v58 = vor.u32 %v3970_v29, %v3469_v35  ;;  %v4032_v36 = vld [vmem:[#allocation7 + $0x18c] sm:$0xf0] }
  0xc3   :  { %1142 = vmatpush.bf16.msrb.mxu1 %v3260_v41 }
  0xc6   :  { %v349_v55 = vpop.f32.mrf.mxu2  ;;  %v4466_v3 = vpop.f32.mrf.mxu0 }
  0xc7   :  { %v4464_v62 = vadd.f32 %v349_v55, %v4459_v48  ;;  %v368_v63 = vpop.f32.mrf.mxu3  ;;  %5443 = vst [vmem:[#allocation23_spill] sm:$0xff] %v4466_v3  ;;  %v4471_v8 = vpop.f32.mrf.mxu1  ;;  %v4481_v55 = vor.u32 %v3980_v50, %v3499_v45  ;;  %1459 = vmatpush.bf16.msra.mxu1 %v4483_v28  ;;  %v4513_v45 = vor.u32 %v3971_v43, %v3477_v44  ;;  %v3968_v50 = vld [vmem:[#allocation7 + $0x8c] sm:$0xf0]  ;;  %v3419_v44 = vld [vmem:[#allocation7 + $0x40] sm:$0xf] }
  0xc8   :  { %v4469_v7 = vadd.f32 %v368_v63, %v4461_v49  ;;  %5445 = vst [vmem:[#allocation25_spill] sm:$0xff] %v4471_v8  ;;  %v4485_v63 = vor.u32 %v3981_v57, %v3507_v56  ;;  %v3966_v56 = vld [vmem:[#allocation7 + $0x84] sm:$0xf]  ;;  %v3453_v57 = vld [vmem:[#allocation7 + $0x90] sm:$0xf0] }
  0xc9   :  { %5442 = vst [vmem:[#allocation22_spill] sm:$0xff] %v4464_v62  ;;  %1446 = vmatpush.bf16.msra.mxu0 %v4481_v55  ;;  %1487 = vmatpush.bf16.msra.mxu3 %v4513_v45  ;;  %v3953_v3 = vld [vmem:[#allocation7 + $0x14] sm:$0xf0]  ;;  %v3951_v62 = vld [vmem:[#allocation7 + $0xc] sm:$0xf] }
  0xca   :  { %5444 = vst [vmem:[#allocation24_spill] sm:$0xff] %v4469_v7  ;;  %1472 = vmatpush.bf16.msra.mxu2 %v4485_v63 }
  0xcb   :  { %1460 = vmatpush.bf16.msra.mxu1 %v4495_v16 }
  0xcd   :  { %1447 = vmatpush.bf16.msra.mxu0 %v4492_v11 }
  0xce   :  { %v4475_v31 = vpop.f32.mrf.mxu2  ;;  %v574_v40 = vpop.f32.mrf.mxu0  ;;  %1473 = vmatpush.bf16.msra.mxu2 %v4497_v2 }
  0xcf   :  { %5446 = vst [vmem:[#allocation26_spill] sm:$0xff] %v4475_v31  ;;  %v4479_v39 = vpop.f32.mrf.mxu3  ;;  %v617_v24 = vadd.f32 %v574_v40, %v307_v30  ;;  %v587_v46 = vpop.f32.mrf.mxu1  ;;  %1461 = vmatpush.bf16.msra.mxu1 %v4508_v58  ;;  %v3950_v31 = vld [vmem:[#allocation7 + $0x4] sm:$0xf] }
  0xd0   :  { %5447 = vst [vmem:[#allocation27_spill] sm:$0xff] %v4479_v39  ;;  %v618_v54 = vadd.f32 %v587_v46, %v326_v38  ;;  %v3973_v38 = vld [vmem:[#allocation7 + $0xb4] sm:$0xf0]  ;;  %v3389_v39 = vld [vmem:[#allocation7 + $0x10] sm:$0xf0] }
  0xd1   :  { %v3122_v61 = vmul.f32 -1.442695, %v617_v24  ;;  %v4510_v42 = vor.u32 %v3973_v38, %v3475_v37  ;;  %1448 = vmatpush.bf16.msra.mxu0 %v4504_v34  ;;  %v3443_v37 = vld [vmem:[#allocation7 + $0x68] sm:$0xf]  ;;  %v3965_v38 = vld [vmem:[#allocation7 + $0x74] sm:$0xf0] }
  0xd2   :  { %v3123_v5 = vmul.f32 -1.442695, %v618_v54  ;;  %v4518_v54 = vor.u32 %v3968_v50, %v3451_v47  ;;  %v4545_v43 = vor.u32 %v3965_v38, %v3443_v37  ;;  %v3956_v38 = vld [vmem:[#allocation7 + $0x2c] sm:$0xf0] }
  0xd3   :  { %4064 = vpow2.f32 %v3122_v61  ;;  %1474 = vmatpush.bf16.msra.mxu2 %v4510_v42  ;;  %v4524_v61 = vor.u32 %v3966_v56, %v3453_v57  ;;  %v3958_v57 = vld [vmem:[#allocation7 + $0x44] sm:$0xf] }
  0xd4   :  { %4066 = vpow2.f32 %v3123_v5  ;;  %v3967_v5 = vld [vmem:[#allocation7 + $0x8c] sm:$0xf] }
  0xd5   :  { %1449 = vmatpush.bf16.msra.mxu0 %v4518_v54  ;;  %v4535_v18 = vor.u32 %v3967_v5, %v3461_v12  ;;  %1462 = vmatpush.bf16.msra.mxu1 %v4524_v61  ;;  %v3961_v12 = vld [vmem:[#allocation7 + $0x54] sm:$0xf0] }
  0xd6   :  { %v600_v21 = vpop.f32.mrf.mxu2  ;;  %v576_v32 = vpop.f32.mrf.mxu0 }
  0xd7   :  { %v613_v30 = vpop.f32.mrf.mxu3  ;;  %v589_v41 = vpop.f32.mrf.mxu1  ;;  %v619_v27 = vadd.f32 %v600_v21, %v345_v9  ;;  %v3437_v32 = vld [vmem:[#allocation7 + $0x70] sm:$0xf0]  ;;  %1475 = vmatpush.bf16.msra.mxu2 %v4533_v17  ;;  %1488 = vmatpush.bf16.msra.mxu3 %v4535_v18  ;;  %v3445_v21 = vld [vmem:[#allocation7 + $0x78] sm:$0xf0]  ;;  %v4562_v9 = vor.u32 %v3958_v57, %v3421_v0 }
  0xd8   :  { %v620_v40 = vadd.f32 %v613_v30, %v364_v20  ;;  %v3435_v20 = vld [vmem:[#allocation7 + $0x60] sm:$0xf]  ;;  %v3962_v30 = vld [vmem:[#allocation7 + $0x64] sm:$0xf]  ;;  %v3405_v57 = vld [vmem:[#allocation7 + $0x30] sm:$0xf0] }
  0xd9   :  { %v4065_v24 = vpop.eup %4064  ;;  %v4539_v53 = vor.u32 %v3964_v23, %v3435_v20  ;;  %v4543_v35 = vor.u32 %v3962_v30, %v3437_v32  ;;  %v3429_v23 = vld [vmem:[#allocation7 + $0x58] sm:$0xf0] }
  0xda   :  { %v3124_v46 = vmul.f32 -1.442695, %v620_v40  ;;  %v4067_v51 = vpop.eup %4066  ;;  %v4515_v52 = vadd.f32 1.0, %v4065_v24  ;;  %v3963_v40 = vld [vmem:[#allocation7 + $0x6c] sm:$0xf] }
  0xdb   :  { %v4520_v60 = vadd.f32 1.0, %v4067_v51  ;;  %v3960_v24 = vld [vmem:[#allocation7 + $0x4c] sm:$0xf0]  ;;  %1450 = vmatpush.bf16.msra.mxu0 %v4539_v53  ;;  %v4553_v51 = vor.u32 %v3963_v40, %v3445_v21  ;;  %1463 = vmatpush.bf16.msra.mxu1 %v4543_v35 }
  0xdc   :  { %4068 = vpow2.f32 %v3124_v46  ;;  %v634_v13 = vand.u32 2147483647, %v4515_v52  ;;  %v636_v29 = vand.u32 2147483648, %v4515_v52  ;;  %v4555_v56 = vor.u32 %v3960_v24, %v3419_v44  ;;  %1476 = vmatpush.bf16.msra.mxu2 %v4545_v43  ;;  %v3954_v24 = vld [vmem:[#allocation7 + $0x24] sm:$0xf] }
  0xdd   :  { %4070 = vrcp.f32 %v4515_v52  ;;  %v655_v47 = vand.u32 2147483648, %v4520_v60  ;;  %1489 = vmatpush.bf16.msra.mxu3 %v4553_v51  ;;  %vm630_vm1 = vweird.f32 %v4515_v52  ;;  %v653_v32 = vand.u32 2147483647, %v4520_v60 }
  0xde   :  { %4072 = vrcp.f32 %v4520_v60  ;;  %v602_v10 = vpop.f32.mrf.mxu2  ;;  %vm4574_vm2 = vcmp.eq.f32.partialorder %v634_v13, 8.507059e+37  ;;  %v637_v13 = vor.u32 1.1754944e-38, %v636_v29  ;;  %vm649_vm5 = vweird.f32 %v4520_v60 }
  0xdf   :  { %v615_v14 = vpop.f32.mrf.mxu3  ;;  %4074 = vtanh.f32 %v619_v27  ;;  %v3427_v10 = vld [vmem:[#allocation7 + $0x48] sm:$0xf]  ;;  %v3403_v27 = vld [vmem:[#allocation7 + $0x20] sm:$0xf]  ;;  %1451 = vmatpush.bf16.msra.mxu0 %v4555_v56  ;;  %v656_v0 = vor.u32 1.1754944e-38, %v655_v47  ;;  %1464 = vmatpush.bf16.msra.mxu1 %v4562_v9  ;;  %vm654_vm7 = vcmp.eq.f32.partialorder %v653_v32, 8.507059e+37 }
  0xe0   :  { %v3959_v14 = vld [vmem:[#allocation7 + $0x4c] sm:$0xf]  ;;  %v4572_v37 = vor.u32 %v3961_v12, %v3427_v10  ;;  %v4581_v44 = vor.u32 %v3956_v38, %v3403_v27  ;;  %v4591_v10 = vor.u32 %v3954_v24, %v3405_v57  ;;  %v3411_v12 = vld [vmem:[#allocation7 + $0x28] sm:$0xf]  ;;  %v3413_v27 = vld [vmem:[#allocation7 + $0x38] sm:$0xf0] }
  0xe1   :  { %v4579_v21 = vor.u32 %v3959_v14, %v3429_v23  ;;  %v3957_v14 = vld [vmem:[#allocation7 + $0x34] sm:$0xf0]  ;;  %v3955_v23 = vld [vmem:[#allocation7 + $0x2c] sm:$0xf]  ;;  %v3952_v57 = vld [vmem:[#allocation7 + $0xc] sm:$0xf0] }
  0xe2   :  { %v4069_v41 = vpop.eup %4068  ;;  %1477 = vmatpush.bf16.msra.mxu2 %v4572_v37  ;;  %v4597_v47 = vor.u32 %v3957_v14, %v3411_v12  ;;  %v4600_v24 = vor.u32 %v3955_v23, %v3413_v27  ;;  %v3395_v14 = vld [vmem:[#allocation7 + $0x8] sm:$0xf]  ;;  %v3397_v27 = vld [vmem:[#allocation7 + $0x18] sm:$0xf0] }
  0xe3   :  { %v4547_v46 = vpop.eup %4070  ;;  %v4550_v50 = vadd.f32 1.0, %v4069_v41  ;;  %1490 = vmatpush.bf16.msra.mxu3 %v4579_v21  ;;  %1452 = vmatpush.bf16.msra.mxu0 %v4581_v44 }
  0xe4   :  { %v4557_v4 = vpop.eup %4072  ;;  %v626_v5 = vmul.f32 %v4547_v46, %v4515_v52  ;;  %vm631_vm0 = vweird.f32 %v4547_v46  ;;  %1465 = vmatpush.bf16.msra.mxu1 %v4591_v10 }
  0xe5   :  { %v645_v20 = vmul.f32 %v4557_v4, %v4520_v60  ;;  %4076 = vrcp.f32 %v4550_v50  ;;  %vm4586_vm3 = vmor %vm630_vm1, %vm631_vm0  ;;  %vm650_vm4 = vweird.f32 %v4557_v4  ;;  %v4075_v29 = vpop.eup %4074  ;;  %v4614_v60 = vor.u32 %v3950_v31, %v3389_v39 }
  0xe6   :  { %v627_v30 = vsub.f32 1.0, %v626_v5  ;;  %vm651_vm6 = vmor %vm649_vm5, %vm650_vm4  ;;  %1478 = vmatpush.bf16.msra.mxu2 %v4597_v47  ;;  %vm669_vm9 = vweird.f32 %v4550_v50 }
  0xe7   :  { %v646_v40 = vsub.f32 1.0, %v645_v20  ;;  %1491 = vmatpush.bf16.msra.mxu3 %v4600_v24 }
  0xe8   :  { %v628_v52 = vmul.f32 %v4547_v46, %v627_v30  ;;  %v3387_v30 = vld [vmem:[#allocation7] sm:$0xf]  ;;  %1466 = vmatpush.bf16.msra.mxu1 %v4614_v60 }
  0xe9   :  { %v647_v20 = vmul.f32 %v4557_v4, %v646_v40  ;;  %v4605_v12 = vor.u32 %v3952_v57, %v3387_v30 }
  0xea   :  { %v629_v38 = vadd.f32 %v4547_v46, %v628_v52 }
  0xeb   :  { %v4077_v40 = vpop.eup %4076  ;;  %v648_v8 = vadd.f32 %v4557_v4, %v647_v20  ;;  %v4616_v20 = vor.u32 %v3953_v3, %v3395_v14  ;;  %1453 = vmatpush.bf16.msra.mxu0 %v4605_v12  ;;  %v3630_v14 = vld [vmem:[#allocation7 + $0x1e0] sm:$0xf] }
  0xec   :  { %v633_v52 = vsel %vm4586_vm3, %v4547_v46, %v629_v38  ;;  %v665_v23 = vmul.f32 %v4077_v40, %v4550_v50  ;;  %v4623_v46 = vor.u32 %v3951_v62, %v3397_v27  ;;  %vm670_vm8 = vweird.f32 %v4077_v40  ;;  %v3638_v27 = vld [vmem:[#allocation7 + $0x1e8] sm:$0xf] }
  0xed   :  { %5452 = vst [vmem:[#allocation28_spill] sm:$0xff] %v4616_v20  ;;  %v638_v30 = vsel %vm4574_vm2, %v637_v13, %v633_v52  ;;  %v652_v57 = vsel %vm651_vm6, %v4557_v4, %v648_v8  ;;  %1479 = vmatpush.bf16.msra.mxu2 %v4616_v20  ;;  %v675_v62 = vand.u32 2147483648, %v4550_v50  ;;  %vm671_vm10 = vmor %vm669_vm9, %vm670_vm8  ;;  %v4044_v52 = vld [vmem:[#allocation7 + $0x1ec] sm:$0xf0]  ;;  %v3998_v20 = vld [vmem:[#allocation5 + $0x84] sm:$0xf] }
  0xee   :  { %5453 = vst [vmem:[#allocation29_spill] sm:$0xff] %v4623_v46  ;;  %v657_v5 = vsel %vm654_vm7, %v656_v0, %v652_v57  ;;  %v680_v38 = vmul.f32 %v4075_v29, %v638_v30  ;;  %v666_v7 = vsub.f32 1.0, %v665_v23  ;;  %1492 = vmatpush.bf16.msra.mxu3 %v4623_v46  ;;  %v4636_v23 = vor.u32 %v4044_v52, %v3630_v14  ;;  %v4045_v30 = vld [vmem:[#allocation7 + $0x1f4] sm:$0xf0]  ;;  %v4039_v14 = vld [vmem:[#allocation7 + $0x1cc] sm:$0xf] }
  0xef   :  { %v679_v31 = vmul.f32 0.0, %v657_v5  ;;  %v676_v32 = vor.u32 1.1754944e-38, %v675_v62  ;;  %v4640_v5 = vor.u32 %v4045_v30, %v3638_v27  ;;  %v4040_v62 = vld [vmem:[#allocation7 + $0x1cc] sm:$0xf0]  ;;  %v3624_v52 = vld [vmem:[#allocation7 + $0x1d8] sm:$0xf0] }
  0xf0   :  { %v667_v3 = vmul.f32 %v4077_v40, %v666_v7  ;;  %v673_v7 = vand.u32 2147483647, %v4550_v50  ;;  %v4042_v50 = vld [vmem:[#allocation7 + $0x1e4] sm:$0xf]  ;;  %5454 = vst [vmem:[#allocation30_spill] sm:$0xff] %v4636_v23 }
  0xf1   :  { %v4627_v39 = vadd.f32 %v680_v38, %v679_v31  ;;  %5456 = vst [vmem:[#allocation32_spill] sm:$0xff] %v4640_v5  ;;  %v4043_v38 = vld [vmem:[#allocation7 + $0x1ec] sm:$0xf]  ;;  %v3640_v31 = vld [vmem:[#allocation7 + $0x1f8] sm:$0xf0] }
  0xf2   :  { %v668_v8 = vadd.f32 %v4077_v40, %v667_v3  ;;  %vm674_vm11 = vcmp.eq.f32.partialorder %v673_v7, 8.507059e+37  ;;  %v4643_v3 = vor.u32 %v4043_v38, %v3640_v31  ;;  %v4038_v7 = vld [vmem:[#allocation7 + $0x1c4] sm:$0xf]  ;;  %v4036_v27 = vld [vmem:[#allocation7 + $0x1ac] sm:$0xf0] }
  0xf3   :  { %4078 = vtanh.f32 %v4627_v39  ;;  %1253 = vst [vmem:[#allocation11] sm:$0xff] %v4627_v39  ;;  %v4034_v30 = vld [vmem:[#allocation7 + $0x1a4] sm:$0xf]  ;;  %v3600_v38 = vld [vmem:[#allocation7 + $0x1b0] sm:$0xf0] }
  0xf4   :  { %v672_v4 = vsel %vm671_vm10, %v4077_v40, %v668_v8  ;;  %v3632_v40 = vld [vmem:[#allocation7 + $0x1f0] sm:$0xf0]  ;;  %5457 = vst [vmem:[#allocation33_spill] sm:$0xff] %v4643_v3  ;;  %v3614_v8 = vld [vmem:[#allocation7 + $0x1c0] sm:$0xf] }
  0xf5   :  { %v677_v0 = vsel %vm674_vm11, %v676_v32, %v672_v4  ;;  %v4638_v57 = vor.u32 %v4042_v50, %v3632_v40  ;;  %v4648_v4 = vor.u32 %v4040_v62, %v3614_v8  ;;  %v3616_v32 = vld [vmem:[#allocation7 + $0x1d0] sm:$0xf0]  ;;  %v3598_v50 = vld [vmem:[#allocation7 + $0x1a0] sm:$0xf]  ;;  %v4655_v40 = vor.u32 %v4039_v14, %v3624_v52  ;;  %v3606_v62 = vld [vmem:[#allocation7 + $0x1a8] sm:$0xf]  ;;  %v4672_v52 = vpop.f32.mrf.mxu0 }
  0xf6   :  { %v4659_v31 = vor.u32 %v4036_v27, %v3598_v50  ;;  %v4661_v8 = vor.u32 %v4034_v30, %v3600_v38  ;;  %v4674_v50 = vpop.f32.mrf.mxu1 }
  0xf7   :  { %5455 = vst [vmem:[#allocation31_spill] sm:$0xff] %v4638_v57  ;;  %v4676_v30 = vpop.f32.mrf.mxu3 }
  0xf8   :  { %5458 = vst [vmem:[#allocation34_spill] sm:$0xff] %v4648_v4 }
  0xf9   :  { %v4079_v41 = vpop.eup %4078  ;;  %5461 = vst [vmem:[#allocation37_spill] sm:$0xff] %v4655_v40 }
  0xfa   :  { %v683_v13 = vmul.f32 %v4079_v41, %v677_v0  ;;  %v3622_v41 = vld [vmem:[#allocation7 + $0x1c8] sm:$0xf]  ;;  %v4041_v0 = vld [vmem:[#allocation7 + $0x1d4] sm:$0xf0]  ;;  %5462 = vst [vmem:[#allocation38_spill] sm:$0xff] %v4659_v31 }
  0xfb   :  { %5463 = vst [vmem:[#allocation39_spill] sm:$0xff] %v4661_v8 }
  0xfc   :  { %v684_v29 = vpack.c.bf16 %v683_v13, %v683_v13  ;;  %1252 = vst [vmem:[#allocation9] sm:$0xff] %v683_v13  ;;  %v4650_v13 = vor.u32 %v4038_v7, %v3616_v32  ;;  %v4037_v7 = vld [vmem:[#allocation7 + $0x1b4] sm:$0xf0]  ;;  %v4035_v32 = vld [vmem:[#allocation7 + $0x1ac] sm:$0xf] }
  0xfd   :  { %v921_v27 = vpop.f32.mrf.mxu0  ;;  %2830 = dma.vmem_to_hbm [thread:$0]  %s2826_s27, 128, %s2828_s26, [#allocation10]  }
  0xfe   :  { %1130 = vmatmul.bf16.vlgmr.msrb.gmra.mxu0 %v684_v29  ;;  %1143 = vmatmul.bf16.vlgmr.msrb.gmra.mxu1 %v684_v29  ;;  %5459 = vst [vmem:[#allocation35_spill] sm:$0xff] %v4650_v13  ;;  %v934_v38 = vpop.f32.mrf.mxu1  ;;  %2841 = dma.vmem_to_hbm [thread:$0]  %s2837_s10, 128, %s2839_s29, [#allocation10]  }
  0xff   :  { %1156 = vmatmul.bf16.vlgmr.msrb.gmra.mxu2 %v684_v29  ;;  %1169 = vmatmul.bf16.vlgmr.msrb.gmra.mxu3 %v684_v29  ;;  %v3592_v38 = vld [vmem:[#allocation7 + $0x198] sm:$0xf0] }
 0x100   :  { %1791 = vmatpush.bf16.msrb.mxu0 %v4636_v23  ;;  %1804 = vmatpush.bf16.msrb.mxu1 %v4638_v57 }
 0x101   :  { %1817 = vmatpush.bf16.msrb.mxu2 %v4640_v5  ;;  %1830 = vmatpush.bf16.msrb.mxu3 %v4643_v3  ;;  %v3760_v3 = vld [vmem:[#allocation5 + $0xf0] sm:$0xf0]  ;;  %v4009_v5 = vld [vmem:[#allocation5 + $0xd4] sm:$0xf0] }
 0x104   :  { %1792 = vmatpush.bf16.msrb.mxu0 %v4648_v4  ;;  %1805 = vmatpush.bf16.msrb.mxu1 %v4650_v13  ;;  %v4028_v13 = vld [vmem:[#allocation7 + $0x16c] sm:$0xf0]  ;;  %v4029_v4 = vld [vmem:[#allocation7 + $0x174] sm:$0xf0] }
 0x105   :  { %1831 = vmatpush.bf16.msrb.mxu3 %v4655_v40  ;;  %v4033_v40 = vld [vmem:[#allocation7 + $0x194] sm:$0xf0] }
 0x108   :  { %1793 = vmatpush.bf16.msrb.mxu0 %v4659_v31  ;;  %1806 = vmatpush.bf16.msrb.mxu1 %v4661_v8  ;;  %v4030_v8 = vld [vmem:[#allocation7 + $0x184] sm:$0xf] }
 0x10e   :  { %1454 = vmatmul.bf16.vlgmr.msra.gmra.mxu0 %v684_v29  ;;  %1467 = vmatmul.bf16.vlgmr.msra.gmra.mxu1 %v684_v29 }
 0x10f   :  { %1480 = vmatmul.bf16.vlgmr.msra.gmra.mxu2 %v684_v29  ;;  %1493 = vmatmul.bf16.vlgmr.msra.gmra.mxu3 %v684_v29  ;;  %v4652_v29 = vor.u32 %v4041_v0, %v3622_v41  ;;  %v4664_v41 = vor.u32 %v4037_v7, %v3606_v62  ;;  %v3608_v0 = vld [vmem:[#allocation7 + $0x1b8] sm:$0xf0]  ;;  %v4678_v62 = vpop.f32.mrf.mxu2  ;;  %v960_v7 = vpop.f32.mrf.mxu3 }
 0x110   :  { %v4666_v14 = vor.u32 %v4035_v32, %v3608_v0  ;;  %v3582_v0 = vld [vmem:[#allocation7 + $0x180] sm:$0xf] }
 0x111   :  { %5460 = vst [vmem:[#allocation36_spill] sm:$0xff] %v4652_v29  ;;  %1818 = vmatpush.bf16.msrb.mxu2 %v4652_v29  ;;  %v4680_v33 = vor.u32 %v4032_v36, %v3582_v0  ;;  %v4031_v29 = vld [vmem:[#allocation7 + $0x18c] sm:$0xf]  ;;  %v4026_v36 = vld [vmem:[#allocation7 + $0x164] sm:$0xf] }
 0x112   :  { %5464 = vst [vmem:[#allocation40_spill] sm:$0xff] %v4664_v41  ;;  %1832 = vmatpush.bf16.msrb.mxu3 %v4666_v14  ;;  %v4688_v7 = vor.u32 %v4031_v29, %v3592_v38  ;;  %v3550_v38 = vld [vmem:[#allocation7 + $0x140] sm:$0xf] }
 0x113   :  { %5465 = vst [vmem:[#allocation41_spill] sm:$0xff] %v4666_v14  ;;  %v3590_v14 = vld [vmem:[#allocation7 + $0x188] sm:$0xf]  ;;  %1794 = vmatpush.bf16.msrb.mxu0 %v4680_v33 }
 0x114   :  { %5466 = vst [vmem:[#allocation42_spill] sm:$0xff] %v4680_v33  ;;  %v4685_v27 = vor.u32 %v4033_v40, %v3590_v14  ;;  %v4027_v14 = vld [vmem:[#allocation7 + $0x16c] sm:$0xf] }
 0x115   :  { %1819 = vmatpush.bf16.msrb.mxu2 %v4664_v41  ;;  %v3584_v41 = vld [vmem:[#allocation7 + $0x190] sm:$0xf0]  ;;  %5469 = vst [vmem:[#allocation45_spill] sm:$0xff] %v4688_v7 }
 0x116   :  { %v4682_v31 = vor.u32 %v4030_v8, %v3584_v41  ;;  %5468 = vst [vmem:[#allocation44_spill] sm:$0xff] %v4685_v27  ;;  %v3568_v8 = vld [vmem:[#allocation7 + $0x170] sm:$0xf0]  ;;  %v3574_v41 = vld [vmem:[#allocation7 + $0x168] sm:$0xf]  ;;  %1833 = vmatpush.bf16.msrb.mxu3 %v4688_v7 }
 0x117   :  { %v947_v32 = vpop.f32.mrf.mxu2  ;;  %v4694_v33 = vor.u32 %v4026_v36, %v3568_v8  ;;  %v4696_v40 = vor.u32 %v4029_v4, %v3574_v41  ;;  %v3552_v7 = vld [vmem:[#allocation7 + $0x150] sm:$0xf0]  ;;  %v3558_v36 = vld [vmem:[#allocation7 + $0x148] sm:$0xf]  ;;  %v4025_v8 = vld [vmem:[#allocation7 + $0x154] sm:$0xf0] }
 0x118   :  { %5467 = vst [vmem:[#allocation43_spill] sm:$0xff] %v4682_v31  ;;  %1807 = vmatpush.bf16.msrb.mxu1 %v4682_v31  ;;  %v3566_v32 = vld [vmem:[#allocation7 + $0x160] sm:$0xf]  ;;  %v3576_v31 = vld [vmem:[#allocation7 + $0x178] sm:$0xf0]  ;;  %v4708_v41 = vor.u32 %v4025_v8, %v3558_v36 }
 0x119   :  { %1820 = vmatpush.bf16.msrb.mxu2 %v4685_v27  ;;  %v4691_v0 = vor.u32 %v4028_v13, %v3566_v32  ;;  %5471 = vst [vmem:[#allocation47_spill] sm:$0xff] %v4694_v33  ;;  %v4699_v29 = vor.u32 %v4027_v14, %v3576_v31  ;;  %v4024_v13 = vld [vmem:[#allocation7 + $0x14c] sm:$0xf0]  ;;  %v4022_v32 = vld [vmem:[#allocation7 + $0x144] sm:$0xf] }
 0x11a   :  { %5472 = vst [vmem:[#allocation48_spill] sm:$0xff] %v4696_v40  ;;  %v4703_v27 = vor.u32 %v4024_v13, %v3550_v38  ;;  %v4706_v4 = vor.u32 %v4022_v32, %v3552_v7  ;;  %v4023_v31 = vld [vmem:[#allocation7 + $0x14c] sm:$0xf]  ;;  %v3560_v14 = vld [vmem:[#allocation7 + $0x158] sm:$0xf0] }
 0x11b   :  { %5470 = vst [vmem:[#allocation46_spill] sm:$0xff] %v4691_v0  ;;  %1795 = vmatpush.bf16.msrb.mxu0 %v4691_v0  ;;  %1834 = vmatpush.bf16.msrb.mxu3 %v4699_v29  ;;  %v4020_v38 = vld [vmem:[#allocation7 + $0x12c] sm:$0xf0]  ;;  %v4018_v13 = vld [vmem:[#allocation7 + $0x124] sm:$0xf] }
 0x11c   :  { %5473 = vst [vmem:[#allocation49_spill] sm:$0xff] %v4699_v29  ;;  %1808 = vmatpush.bf16.msrb.mxu1 %v4694_v33  ;;  %v4711_v33 = vor.u32 %v4023_v31, %v3560_v14  ;;  %v3536_v29 = vld [vmem:[#allocation7 + $0x130] sm:$0xf0]  ;;  %v3542_v7 = vld [vmem:[#allocation7 + $0x128] sm:$0xf] }
 0x11d   :  { %1821 = vmatpush.bf16.msrb.mxu2 %v4696_v40  ;;  %5474 = vst [vmem:[#allocation50_spill] sm:$0xff] %v4703_v27  ;;  %v3534_v40 = vld [vmem:[#allocation7 + $0x120] sm:$0xf]  ;;  %v4021_v32 = vld [vmem:[#allocation7 + $0x134] sm:$0xf0]  ;;  %v4718_v36 = vor.u32 %v4018_v13, %v3536_v29 }
 0x11e   :  { %5475 = vst [vmem:[#allocation51_spill] sm:$0xff] %v4706_v4  ;;  %v4715_v0 = vor.u32 %v4020_v38, %v3534_v40  ;;  %v4720_v8 = vor.u32 %v4021_v32, %v3542_v7  ;;  %v4019_v31 = vld [vmem:[#allocation7 + $0x12c] sm:$0xf]  ;;  %v3544_v14 = vld [vmem:[#allocation7 + $0x138] sm:$0xf0] }
 0x11f   :  { %5476 = vst [vmem:[#allocation52_spill] sm:$0xff] %v4708_v41  ;;  %1796 = vmatpush.bf16.msrb.mxu0 %v4703_v27  ;;  %1835 = vmatpush.bf16.msrb.mxu3 %v4711_v33  ;;  %v3518_v40 = vld [vmem:[#allocation7 + $0x100] sm:$0xf]  ;;  %v4016_v38 = vld [vmem:[#allocation7 + $0x10c] sm:$0xf0] }
 0x120   :  { %5477 = vst [vmem:[#allocation53_spill] sm:$0xff] %v4711_v33  ;;  %1809 = vmatpush.bf16.msrb.mxu1 %v4706_v4  ;;  %v4723_v4 = vor.u32 %v4019_v31, %v3544_v14  ;;  %v4728_v33 = vor.u32 %v4016_v38, %v3518_v40  ;;  %v3520_v29 = vld [vmem:[#allocation7 + $0x110] sm:$0xf0]  ;;  %v3526_v13 = vld [vmem:[#allocation7 + $0x108] sm:$0xf] }
 0x121   :  { %1822 = vmatpush.bf16.msrb.mxu2 %v4708_v41  ;;  %5478 = vst [vmem:[#allocation54_spill] sm:$0xff] %v4715_v0  ;;  %v4014_v41 = vld [vmem:[#allocation7 + $0x104] sm:$0xf]  ;;  %v4017_v7 = vld [vmem:[#allocation7 + $0x114] sm:$0xf0] }
 0x122   :  { %5479 = vst [vmem:[#allocation55_spill] sm:$0xff] %v4718_v36  ;;  %v4730_v32 = vor.u32 %v4014_v41, %v3520_v29  ;;  %v4732_v27 = vor.u32 %v4017_v7, %v3526_v13  ;;  %v4015_v31 = vld [vmem:[#allocation7 + $0x10c] sm:$0xf]  ;;  %v3528_v14 = vld [vmem:[#allocation7 + $0x118] sm:$0xf0] }
 0x123   :  { %5480 = vst [vmem:[#allocation56_spill] sm:$0xff] %v4720_v8  ;;  %1797 = vmatpush.bf16.msrb.mxu0 %v4715_v0  ;;  %1836 = vmatpush.bf16.msrb.mxu3 %v4723_v4  ;;  %v3758_v0 = vld [vmem:[#allocation5 + $0xe0] sm:$0xf]  ;;  %v3766_v38 = vld [vmem:[#allocation5 + $0xe8] sm:$0xf] }
 0x124   :  { %5481 = vst [vmem:[#allocation57_spill] sm:$0xff] %v4723_v4  ;;  %1810 = vmatpush.bf16.msrb.mxu1 %v4718_v36  ;;  %v4012_v4 = vld [vmem:[#allocation5 + $0xec] sm:$0xf0]  ;;  %v4010_v36 = vld [vmem:[#allocation5 + $0xe4] sm:$0xf] }
 0x125   :  { %1823 = vmatpush.bf16.msrb.mxu2 %v4720_v8  ;;  %5482 = vst [vmem:[#allocation58_spill] sm:$0xff] %v4728_v33  ;;  %v4735_v8 = vor.u32 %v4015_v31, %v3528_v14  ;;  %v4739_v40 = vor.u32 %v4012_v4, %v3758_v0  ;;  %v4741_v41 = vor.u32 %v4010_v36, %v3760_v3  ;;  %v4013_v29 = vld [vmem:[#allocation5 + $0xf4] sm:$0xf0]  ;;  %v4011_v13 = vld [vmem:[#allocation5 + $0xec] sm:$0xf] }
 0x126   :  { %5483 = vst [vmem:[#allocation59_spill] sm:$0xff] %v4730_v32  ;;  %v4746_v7 = vld [vmem:[%s5291_s4 + $0x4] sm:$0xf]  ;;  %v4749_v31 = vor.u32 %v4013_v29, %v3766_v38  ;;  %v3768_v14 = vld [vmem:[#allocation5 + $0xf8] sm:$0xf0] }
 0x127   :  { %5484 = vst [vmem:[#allocation60_spill] sm:$0xff] %v4732_v27  ;;  %1798 = vmatpush.bf16.msrb.mxu0 %v4728_v33  ;;  %1837 = vmatpush.bf16.msrb.mxu3 %v4735_v8  ;;  %v4753_v0 = vor.u32 %v4011_v13, %v3768_v14  ;;  %v3742_v3 = vld [vmem:[#allocation5 + $0xc0] sm:$0xf]  ;;  %v4008_v4 = vld [vmem:[#allocation5 + $0xcc] sm:$0xf0]  ;;  %v1177_v13 = vperm.slane %v4746_v7, 0 }
 0x128   :  { %5485 = vst [vmem:[#allocation61_spill] sm:$0xff] %v4735_v8  ;;  %1811 = vmatpush.bf16.msrb.mxu1 %v4730_v32  ;;  %v4006_v36 = vld [vmem:[#allocation5 + $0xc4] sm:$0xf]  ;;  %v3744_v32 = vld [vmem:[#allocation5 + $0xd0] sm:$0xf0]  ;;  %v1178_v14 = vperm.slane %v4746_v7, 1 }
 0x129   :  { %1824 = vmatpush.bf16.msrb.mxu2 %v4732_v27  ;;  %5486 = vst [vmem:[#allocation62_spill] sm:$0xff] %v4739_v40  ;;  %v4756_v27 = vor.u32 %v4008_v4, %v3742_v3  ;;  %v3750_v33 = vld [vmem:[#allocation5 + $0xc8] sm:$0xf]  ;;  %v4759_v38 = vor.u32 %v4006_v36, %v3744_v32  ;;  %v4007_v8 = vld [vmem:[#allocation5 + $0xcc] sm:$0xf] }
 0x12a   :  { %5487 = vst [vmem:[#allocation63_spill] sm:$0xff] %v4741_v41  ;;  %v4761_v29 = vor.u32 %v4009_v5, %v3750_v33  ;;  %v3726_v3 = vld [vmem:[#allocation5 + $0xa0] sm:$0xf]  ;;  %v4004_v4 = vld [vmem:[#allocation5 + $0xac] sm:$0xf0] }
 0x12b   :  { %5488 = vst [vmem:[#allocation64_spill] sm:$0xff] %v4749_v31  ;;  %2003 = vmatpush.bf16.msra.mxu0 %v4739_v40  ;;  %2042 = vmatpush.bf16.msra.mxu3 %v4753_v0  ;;  %v4770_v32 = vor.u32 %v4004_v4, %v3726_v3  ;;  %v3728_v33 = vld [vmem:[#allocation5 + $0xb0] sm:$0xf0]  ;;  %v3734_v5 = vld [vmem:[#allocation5 + $0xa8] sm:$0xf] }
 0x12c   :  { %2016 = vmatpush.bf16.msra.mxu1 %v4741_v41  ;;  %5489 = vst [vmem:[#allocation65_spill] sm:$0xff] %v4753_v0  ;;  %v3752_v41 = vld [vmem:[#allocation5 + $0xd8] sm:$0xf0]  ;;  %v4005_v36 = vld [vmem:[#allocation5 + $0xb4] sm:$0xf0] }
 0x12d   :  { %2029 = vmatpush.bf16.msra.mxu2 %v4749_v31  ;;  %5490 = vst [vmem:[#allocation66_spill] sm:$0xff] %v4756_v27  ;;  %v4765_v40 = vor.u32 %v4007_v8, %v3752_v41  ;;  %v4002_v31 = vld [vmem:[#allocation5 + $0xa4] sm:$0xf]  ;;  %v4775_v41 = vor.u32 %v4005_v36, %v3734_v5  ;;  %v3710_v3 = vld [vmem:[#allocation5 + $0x80] sm:$0xf] }
 0x12e   :  { %5491 = vst [vmem:[#allocation67_spill] sm:$0xff] %v4759_v38  ;;  %v4773_v8 = vor.u32 %v4002_v31, %v3728_v33  ;;  %v4000_v4 = vld [vmem:[#allocation5 + $0x8c] sm:$0xf0]  ;;  %v3712_v5 = vld [vmem:[#allocation5 + $0x90] sm:$0xf0] }
 0x12f   :  { %5492 = vst [vmem:[#allocation68_spill] sm:$0xff] %v4761_v29  ;;  %2004 = vmatpush.bf16.msra.mxu0 %v4756_v27  ;;  %2043 = vmatpush.bf16.msra.mxu3 %v4765_v40  ;;  %v4003_v27 = vld [vmem:[#allocation5 + $0xac] sm:$0xf]  ;;  %v4784_v33 = vor.u32 %v4000_v4, %v3710_v3  ;;  %v3718_v36 = vld [vmem:[#allocation5 + $0x88] sm:$0xf] }
 0x130   :  { %5493 = vst [vmem:[#allocation69_spill] sm:$0xff] %v4765_v40  ;;  %2017 = vmatpush.bf16.msra.mxu1 %v4759_v38  ;;  %v3736_v38 = vld [vmem:[#allocation5 + $0xb8] sm:$0xf0]  ;;  %v3994_v3 = vld [vmem:[#allocation5 + $0x64] sm:$0xf] }
 0x131   :  { %2030 = vmatpush.bf16.msra.mxu2 %v4761_v29  ;;  %5494 = vst [vmem:[#allocation70_spill] sm:$0xff] %v4770_v32  ;;  %v4779_v29 = vor.u32 %v4003_v27, %v3736_v38  ;;  %v3999_v27 = vld [vmem:[#allocation5 + $0x8c] sm:$0xf] }
 0x132   :  { %5495 = vst [vmem:[#allocation71_spill] sm:$0xff] %v4773_v8 }
 0x133   :  { %5496 = vst [vmem:[#allocation72_spill] sm:$0xff] %v4775_v41  ;;  %2005 = vmatpush.bf16.msra.mxu0 %v4770_v32  ;;  %2044 = vmatpush.bf16.msra.mxu3 %v4779_v29 }
 0x134   :  { %5497 = vst [vmem:[#allocation73_spill] sm:$0xff] %v4779_v29  ;;  %2018 = vmatpush.bf16.msra.mxu1 %v4773_v8 }
 0x135   :  { %2031 = vmatpush.bf16.msra.mxu2 %v4775_v41  ;;  %5498 = vst [vmem:[#allocation74_spill] sm:$0xff] %v4784_v33 }
 0x137   :  { %2006 = vmatpush.bf16.msra.mxu0 %v4784_v33  ;;  %v3995_v33 = vld [vmem:[#allocation5 + $0x6c] sm:$0xf] }
 0x17b   :  { %v1131_v0 = vpop.f32.mrf.mxu0  ;;  %v1144_v57 = vpop.f32.mrf.mxu1 }
 0x17c   :  { %v1132_v23 = vadd.f32 %v1131_v0, %v4672_v52  ;;  %v1145_v46 = vadd.f32 %v1144_v57, %v4674_v50  ;;  %v4001_v52 = vld [vmem:[#allocation5 + $0x94] sm:$0xf0]  ;;  %v4787_v57 = vor.u32 %v3998_v20, %v3712_v5  ;;  %v3720_v0 = vld [vmem:[#allocation5 + $0x98] sm:$0xf0] }
 0x17d   :  { %v4789_v50 = vor.u32 %v4001_v52, %v3718_v36  ;;  %v3997_v36 = vld [vmem:[#allocation5 + $0x74] sm:$0xf0] }
 0x17e   :  { %v1185_v40 = vadd.f32 %v1177_v13, %v1132_v23  ;;  %v1186_v31 = vadd.f32 %v1178_v14, %v1145_v46  ;;  %5499 = vst [vmem:[#allocation75_spill] sm:$0xff] %v4787_v57  ;;  %v1180_v23 = vperm.slane %v4746_v7, 3  ;;  %v4792_v46 = vor.u32 %v3999_v27, %v3720_v0  ;;  %2019 = vmatpush.bf16.msra.mxu1 %v4787_v57  ;;  %v3694_v13 = vld [vmem:[#allocation5 + $0x60] sm:$0xf]  ;;  %v3996_v14 = vld [vmem:[#allocation5 + $0x6c] sm:$0xf0] }
 0x17f   :  { %5500 = vst [vmem:[#allocation76_spill] sm:$0xff] %v4789_v50  ;;  %2032 = vmatpush.bf16.msra.mxu2 %v4789_v50  ;;  %v4797_v5 = vor.u32 %v3996_v14, %v3694_v13  ;;  %v3992_v14 = vld [vmem:[#allocation5 + $0x4c] sm:$0xf0] }
 0x180   :  { %v3382_v38 = vmul.f32 -1.442695, %v1185_v40  ;;  %v3383_v8 = vmul.f32 -1.442695, %v1186_v31  ;;  %5501 = vst [vmem:[#allocation77_spill] sm:$0xff] %v4792_v46  ;;  %2045 = vmatpush.bf16.msra.mxu3 %v4792_v46 }
 0x181   :  { %5502 = vst [vmem:[#allocation78_spill] sm:$0xff] %v4797_v5  ;;  %v3696_v40 = vld [vmem:[#allocation5 + $0x70] sm:$0xf0]  ;;  %v3702_v31 = vld [vmem:[#allocation5 + $0x68] sm:$0xf]  ;;  %2007 = vmatpush.bf16.msra.mxu0 %v4797_v5 }
 0x182   :  { %4080 = vpow2.f32 %v3382_v38  ;;  %v1157_v20 = vpop.f32.mrf.mxu2  ;;  %v1170_v4 = vpop.f32.mrf.mxu3  ;;  %v4801_v57 = vor.u32 %v3994_v3, %v3696_v40  ;;  %v3704_v38 = vld [vmem:[#allocation5 + $0x78] sm:$0xf0]  ;;  %v4803_v29 = vor.u32 %v3997_v36, %v3702_v31  ;;  %v3680_v3 = vld [vmem:[#allocation5 + $0x50] sm:$0xf0]  ;;  %v3686_v40 = vld [vmem:[#allocation5 + $0x48] sm:$0xf] }
 0x183   :  { %4082 = vpow2.f32 %v3383_v8  ;;  %v1171_v52 = vadd.f32 %v1170_v4, %v4676_v30  ;;  %v1133_v27 = vpop.f32.mrf.mxu0  ;;  %v1146_v0 = vpop.f32.mrf.mxu1  ;;  %v4805_v41 = vor.u32 %v3995_v33, %v3704_v38  ;;  %v3678_v8 = vld [vmem:[#allocation5 + $0x40] sm:$0xf]  ;;  %v3990_v30 = vld [vmem:[#allocation5 + $0x44] sm:$0xf]  ;;  %v3991_v31 = vld [vmem:[#allocation5 + $0x4c] sm:$0xf] }
 0x184   :  { %5503 = vst [vmem:[#allocation79_spill] sm:$0xff] %v4801_v57  ;;  %2020 = vmatpush.bf16.msra.mxu1 %v4801_v57  ;;  %2033 = vmatpush.bf16.msra.mxu2 %v4803_v29  ;;  %v4810_v4 = vor.u32 %v3992_v14, %v3678_v8  ;;  %v3993_v27 = vld [vmem:[#allocation5 + $0x54] sm:$0xf0]  ;;  %v4813_v33 = vor.u32 %v3990_v30, %v3680_v3  ;;  %v3688_v36 = vld [vmem:[#allocation5 + $0x58] sm:$0xf0] }
 0x185   :  { %5504 = vst [vmem:[#allocation80_spill] sm:$0xff] %v4803_v29  ;;  %v1188_v13 = vadd.f32 %v1180_v23, %v1171_v52  ;;  %2046 = vmatpush.bf16.msra.mxu3 %v4805_v41  ;;  %v4815_v23 = vor.u32 %v3993_v27, %v3686_v40  ;;  %v4817_v38 = vor.u32 %v3991_v31, %v3688_v36  ;;  %v3988_v8 = vld [vmem:[#allocation5 + $0x2c] sm:$0xf0] }
 0x186   :  { %5505 = vst [vmem:[#allocation81_spill] sm:$0xff] %v4805_v41  ;;  %2008 = vmatpush.bf16.msra.mxu0 %v4810_v4  ;;  %v309_v27 = vadd.f32 %v4435_v59, %v4445_v15 }
 0x187   :  { %5506 = vst [vmem:[#allocation82_spill] sm:$0xff] %v4810_v4  ;;  %v3384_v0 = vmul.f32 -1.442695, %v1188_v13  ;;  %v3662_v13 = vld [vmem:[#allocation5 + $0x20] sm:$0xf] }
 0x188   :  { %5507 = vst [vmem:[#allocation83_spill] sm:$0xff] %v4813_v33  ;;  %v4081_v52 = vpop.eup %4080  ;;  %2021 = vmatpush.bf16.msra.mxu1 %v4813_v33  ;;  %2034 = vmatpush.bf16.msra.mxu2 %v4815_v23  ;;  %v4826_v40 = vor.u32 %v3988_v8, %v3662_v13  ;;  %v1158_v13 = vadd.f32 %v1157_v20, %v4678_v62  ;;  %v1179_v8 = vperm.slane %v4746_v7, 2  ;;  %v3984_v4 = vld [vmem:[#allocation5 + $0xc] sm:$0xf0]  ;;  %v3982_v7 = vld [vmem:[#allocation5 + $0x4] sm:$0xf] }
 0x189   :  { %5508 = vst [vmem:[#allocation84_spill] sm:$0xff] %v4815_v23  ;;  %v4083_v57 = vpop.eup %4082  ;;  %v4819_v5 = vadd.f32 1.0, %v4081_v52  ;;  %4084 = vpow2.f32 %v3384_v0  ;;  %v328_v0 = vadd.f32 %v4441_v1, %v4449_v25  ;;  %2047 = vmatpush.bf16.msra.mxu3 %v4817_v38  ;;  %v3664_v52 = vld [vmem:[#allocation5 + $0x30] sm:$0xf0]  ;;  %v3987_v1 = vld [vmem:[#allocation5 + $0x2c] sm:$0xf] }
 0x18a   :  { %5509 = vst [vmem:[#allocation85_spill] sm:$0xff] %v4817_v38  ;;  %v4823_v14 = vadd.f32 1.0, %v4083_v57  ;;  %v1159_v30 = vpop.f32.mrf.mxu2  ;;  %v1172_v3 = vpop.f32.mrf.mxu3  ;;  %v3986_v57 = vld [vmem:[#allocation5 + $0x24] sm:$0xf]  ;;  %2009 = vmatpush.bf16.msra.mxu0 %v4826_v40  ;;  %v3672_v25 = vld [vmem:[#allocation5 + $0x38] sm:$0xf0]  ;;  %v1187_v20 = vadd.f32 %v1179_v8, %v1158_v13 }
 0x18b   :  { %5510 = vst [vmem:[#allocation86_spill] sm:$0xff] %v4826_v40  ;;  %4086 = vrcp.f32 %v4819_v5  ;;  %v1455_v31 = vpop.f32.mrf.mxu0  ;;  %v1468_v36 = vpop.f32.mrf.mxu1  ;;  %v3670_v30 = vld [vmem:[#allocation5 + $0x28] sm:$0xf]  ;;  %v3989_v3 = vld [vmem:[#allocation5 + $0x34] sm:$0xf0]  ;;  %v4838_v23 = vor.u32 %v3986_v57, %v3664_v52  ;;  %v4842_v50 = vor.u32 %v3987_v1, %v3672_v25  ;;  %vm1198_vm13 = vweird.f32 %v4819_v5 }
 0x18c   :  { %4088 = vrcp.f32 %v4823_v14  ;;  %v1498_v59 = vadd.f32 %v1455_v31, %v309_v27  ;;  %v1499_v15 = vadd.f32 %v1468_v36, %v328_v0  ;;  %v4840_v33 = vor.u32 %v3989_v3, %v3670_v30  ;;  %v3646_v38 = vld [vmem:[#allocation5] sm:$0xf]  ;;  %v3648_v0 = vld [vmem:[#allocation5 + $0x10] sm:$0xf0]  ;;  %v3654_v25 = vld [vmem:[#allocation5 + $0x8] sm:$0xf] }
 0x18d   :  { %5511 = vst [vmem:[#allocation87_spill] sm:$0xff] %v4838_v23  ;;  %v4844_v62 = vor.u32 %v3984_v4, %v3646_v38  ;;  %2022 = vmatpush.bf16.msra.mxu1 %v4838_v23  ;;  %2048 = vmatpush.bf16.msra.mxu3 %v4842_v50  ;;  %v366_v38 = vadd.f32 %v4451_v26, %v4461_v49  ;;  %v3985_v52 = vld [vmem:[#allocation5 + $0x14] sm:$0xf0]  ;;  %v3983_v30 = vld [vmem:[#allocation5 + $0xc] sm:$0xf]  ;;  %vm1217_vm15 = vweird.f32 %v4823_v14 }
 0x18e   :  { %5512 = vst [vmem:[#allocation88_spill] sm:$0xff] %v4840_v33  ;;  %v3513_v29 = vmul.f32 -1.442695, %v1498_v59  ;;  %v3514_v46 = vmul.f32 -1.442695, %v1499_v15  ;;  %2035 = vmatpush.bf16.msra.mxu2 %v4840_v33  ;;  %v4852_v15 = vor.u32 %v3982_v7, %v3648_v0  ;;  %v1204_v0 = vand.u32 2147483648, %v4819_v5 }
 0x18f   :  { %v4085_v41 = vpop.eup %4084  ;;  %5513 = vst [vmem:[#allocation89_spill] sm:$0xff] %v4842_v50  ;;  %2010 = vmatpush.bf16.msra.mxu0 %v4844_v62  ;;  %v1202_v1 = vand.u32 2147483647, %v4819_v5  ;;  %v4862_v49 = vor.u32 %v3985_v52, %v3654_v25  ;;  %v1223_v50 = vand.u32 2147483648, %v4823_v14 }
 0x190   :  { %5514 = vst [vmem:[#allocation90_spill] sm:$0xff] %v4844_v62  ;;  %v4846_v27 = vadd.f32 1.0, %v4085_v41  ;;  %4090 = vpow2.f32 %v3513_v29  ;;  %v3656_v29 = vld [vmem:[#allocation5 + $0x18] sm:$0xf0] }
 0x191   :  { %v4087_v31 = vpop.eup %4086  ;;  %5515 = vst [vmem:[#allocation91_spill] sm:$0xff] %v4852_v15  ;;  %2023 = vmatpush.bf16.msra.mxu1 %v4852_v15  ;;  %v4864_v62 = vor.u32 %v3983_v30, %v3656_v29  ;;  %vm1203_vm1 = vcmp.eq.f32.partialorder %v1202_v1, 8.507059e+37 }
 0x192   :  { %v4089_v4 = vpop.eup %4088  ;;  %v1194_v41 = vmul.f32 %v4087_v31, %v4819_v5  ;;  %4092 = vrcp.f32 %v4846_v27  ;;  %v1481_v36 = vpop.f32.mrf.mxu2  ;;  %5516 = vst [vmem:[#allocation92_spill] sm:$0xff] %v4862_v49  ;;  %vm1199_vm12 = vweird.f32 %v4087_v31  ;;  %2036 = vmatpush.bf16.msra.mxu2 %v4862_v49  ;;  %v1205_v5 = vor.u32 1.1754944e-38, %v1204_v0 }
 0x193   :  { %v1494_v57 = vpop.f32.mrf.mxu3  ;;  %v1213_v13 = vmul.f32 %v4089_v4, %v4823_v14  ;;  %4094 = vpow2.f32 %v3514_v46  ;;  %v1457_v8 = vpop.f32.mrf.mxu0  ;;  %5517 = vst [vmem:[#allocation93_spill] sm:$0xff] %v4864_v62  ;;  %vm1218_vm14 = vweird.f32 %v4089_v4  ;;  %2049 = vmatpush.bf16.msra.mxu3 %v4864_v62  ;;  %vm1200_vm0 = vmor %vm1198_vm13, %vm1199_vm12  ;;  %vm1237_vm5 = vweird.f32 %v4846_v27 }
 0x194   :  { %v1470_v3 = vpop.f32.mrf.mxu1  ;;  %v1195_v59 = vsub.f32 1.0, %v1194_v41  ;;  %4096 = vtanh.f32 %v1187_v20  ;;  %v1501_v7 = vadd.f32 %v1494_v57, %v366_v38  ;;  %v1221_v20 = vand.u32 2147483647, %v4823_v14  ;;  %vm1219_vm2 = vmor %vm1217_vm15, %vm1218_vm14 }
 0x195   :  { %v1214_v26 = vsub.f32 1.0, %v1213_v13  ;;  %v1224_v3 = vor.u32 1.1754944e-38, %v1223_v50  ;;  %v347_v50 = vadd.f32 %v4447_v19, %v4459_v48  ;;  %v1241_v19 = vand.u32 2147483647, %v4846_v27  ;;  %v5546_v48 = vld [vmem:[#allocation54_spill] sm:$0xff] }
 0x196   :  { %v1196_v33 = vmul.f32 %v4087_v31, %v1195_v59  ;;  %v3515_v46 = vmul.f32 -1.442695, %v1501_v7  ;;  %v4091_v8 = vpop.eup %4090  ;;  %vm1222_vm3 = vcmp.eq.f32.partialorder %v1221_v20, 8.507059e+37  ;;  %v1243_v20 = vand.u32 2147483648, %v4846_v27 }
 0x197   :  { %v1215_v41 = vmul.f32 %v4089_v4, %v1214_v26  ;;  %v4874_v57 = vadd.f32 1.0, %v4091_v8  ;;  %vm1242_vm9 = vcmp.eq.f32.partialorder %v1241_v19, 8.507059e+37 }
 0x198   :  { %v4871_v25 = vpop.eup %4092  ;;  %v1197_v38 = vadd.f32 %v4087_v31, %v1196_v33  ;;  %4098 = vpow2.f32 %v3515_v46 }
 0x199   :  { %v4095_v52 = vpop.eup %4094  ;;  %v1216_v30 = vadd.f32 %v4089_v4, %v1215_v41  ;;  %v1233_v29 = vmul.f32 %v4871_v25, %v4846_v27  ;;  %4100 = vrcp.f32 %v4874_v57  ;;  %vm1238_vm4 = vweird.f32 %v4871_v25 }
 0x19a   :  { %v4097_v13 = vpop.eup %4096  ;;  %v1201_v59 = vsel %vm1200_vm0, %v4087_v31, %v1197_v38  ;;  %v4881_v33 = vadd.f32 1.0, %v4095_v52  ;;  %v1483_v14 = vpop.f32.mrf.mxu2  ;;  %vm4900_vm6 = vmor %vm1237_vm5, %vm1238_vm4  ;;  %v1515_v27 = vand.u32 2147483647, %v4874_v57  ;;  %vm1511_vm8 = vweird.f32 %v4874_v57 }
 0x19b   :  { %v1496_v7 = vpop.f32.mrf.mxu3  ;;  %v1206_v26 = vsel %vm1203_vm1, %v1205_v5, %v1201_v59  ;;  %v1220_v46 = vsel %vm1219_vm2, %v4089_v4, %v1216_v30  ;;  %v1234_v1 = vsub.f32 1.0, %v1233_v29  ;;  %v1500_v5 = vadd.f32 %v1481_v36, %v347_v50 }
 0x19c   :  { %v1225_v0 = vsel %vm1222_vm3, %v1224_v3, %v1220_v46  ;;  %v1248_v8 = vmul.f32 %v4097_v13, %v1206_v26  ;;  %4102 = vrcp.f32 %v4881_v33  ;;  %v1517_v3 = vand.u32 2147483648, %v4874_v57 }
 0x19d   :  { %v1247_v41 = vmul.f32 0.0, %v1225_v0  ;;  %v1235_v31 = vmul.f32 %v4871_v25, %v1234_v1  ;;  %v1244_v7 = vor.u32 1.1754944e-38, %v1243_v20  ;;  %v1536_v1 = vand.u32 2147483648, %v4881_v33 }
 0x19e   :  { %v4099_v62 = vpop.eup %4098  ;;  %v1534_v0 = vand.u32 2147483647, %v4881_v33  ;;  %vm1530_vm11 = vweird.f32 %v4881_v33  ;;  %vm1516_vm13 = vcmp.eq.f32.partialorder %v1515_v27, 8.507059e+37 }
 0x19f   :  { %v4887_v38 = vadd.f32 %v1248_v8, %v1247_v41  ;;  %v4889_v52 = vadd.f32 1.0, %v4099_v62  ;;  %v4101_v14 = vpop.eup %4100  ;;  %v1236_v4 = vadd.f32 %v4871_v25, %v1235_v31 }
 0x1a0   :  { %v1507_v30 = vmul.f32 %v4101_v14, %v4874_v57  ;;  %vm1512_vm7 = vweird.f32 %v4101_v14  ;;  %vm1535_vm15 = vcmp.eq.f32.partialorder %v1534_v0, 8.507059e+37 }
 0x1a1   :  { %4104 = vtanh.f32 %v4887_v38  ;;  %v1240_v59 = vsel %vm4900_vm6, %v4871_v25, %v1236_v4  ;;  %vm1513_vm12 = vmor %vm1511_vm8, %vm1512_vm7  ;;  %v1518_v25 = vor.u32 1.1754944e-38, %v1517_v3  ;;  %v1556_v27 = vand.u32 2147483648, %v4889_v52 }
 0x1a2   :  { %v4103_v29 = vpop.eup %4102  ;;  %4106 = vrcp.f32 %v4889_v52  ;;  %v1508_v62 = vsub.f32 1.0, %v1507_v30  ;;  %v1245_v31 = vsel %vm1242_vm9, %v1244_v7, %v1240_v59  ;;  %vm1550_vm1 = vweird.f32 %v4889_v52 }
 0x1a3   :  { %v1526_v36 = vmul.f32 %v4103_v29, %v4881_v33  ;;  %4108 = vtanh.f32 %v1500_v5  ;;  %vm1531_vm10 = vweird.f32 %v4103_v29  ;;  %v1557_v0 = vor.u32 1.1754944e-38, %v1556_v27  ;;  %v5538_v27 = vld [vmem:[#allocation46_spill] sm:$0xff] }
 0x1a4   :  { %v1509_v46 = vmul.f32 %v4101_v14, %v1508_v62  ;;  %vm1532_vm14 = vmor %vm1530_vm11, %vm1531_vm10 }
 0x1a5   :  { %v1527_v26 = vsub.f32 1.0, %v1526_v36  ;;  %v1537_v36 = vor.u32 1.1754944e-38, %v1536_v1 }
 0x1a6   :  { %v1510_v50 = vadd.f32 %v4101_v14, %v1509_v46 }
 0x1a7   :  { %v4105_v8 = vpop.eup %4104  ;;  %v1528_v41 = vmul.f32 %v4103_v29, %v1527_v26 }
 0x1a8   :  { %v4107_v5 = vpop.eup %4106  ;;  %v1251_v4 = vmul.f32 %v4105_v8, %v1245_v31  ;;  %v1514_v20 = vsel %vm1513_vm12, %v4101_v14, %v1510_v50  ;;  %v5520_v31 = vld [vmem:[#allocation28_spill] sm:$0xff] }
 0x1a9   :  { %v1529_v30 = vadd.f32 %v4103_v29, %v1528_v41  ;;  %v1546_v62 = vmul.f32 %v4107_v5, %v4889_v52  ;;  %v4109_v57 = vpop.eup %4108  ;;  %v1519_v19 = vsel %vm1516_vm13, %v1518_v25, %v1514_v20  ;;  %vm1551_vm0 = vweird.f32 %v4107_v5  ;;  %v5522_v25 = vld [vmem:[#allocation30_spill] sm:$0xff]  ;;  %v5524_v20 = vld [vmem:[#allocation32_spill] sm:$0xff] }
 0x1aa   :  { %v1598_v13 = vpack.c.bf16 %v1251_v4, %v1251_v4  ;;  %v1561_v46 = vmul.f32 %v4109_v57, %v1519_v19  ;;  %vm1552_vm2 = vmor %vm1550_vm1, %vm1551_vm0  ;;  %v5523_v4 = vld [vmem:[#allocation31_spill] sm:$0xff]  ;;  %v5529_v19 = vld [vmem:[#allocation37_spill] sm:$0xff] }
 0x1ab   :  { %v1533_v26 = vsel %vm1532_vm14, %v4103_v29, %v1529_v30  ;;  %v1547_v59 = vsub.f32 1.0, %v1546_v62  ;;  %v5525_v30 = vld [vmem:[#allocation33_spill] sm:$0xff]  ;;  %v5526_v62 = vld [vmem:[#allocation34_spill] sm:$0xff]  ;;  %v5527_v57 = vld [vmem:[#allocation35_spill] sm:$0xff] }
 0x1ac   :  { %v1538_v7 = vsel %vm1535_vm15, %v1537_v36, %v1533_v26  ;;  %1799 = vmatmul.bf16.vlgmr.msrb.gmra.mxu0 %v1598_v13  ;;  %1812 = vmatmul.bf16.vlgmr.msrb.gmra.mxu1 %v1598_v13  ;;  %v5528_v36 = vld [vmem:[#allocation36_spill] sm:$0xff]  ;;  %v5531_v26 = vld [vmem:[#allocation39_spill] sm:$0xff] }
 0x1ad   :  { %v1560_v33 = vmul.f32 %v1538_v7, %v4627_v39  ;;  %v1548_v3 = vmul.f32 %v4107_v5, %v1547_v59  ;;  %1825 = vmatmul.bf16.vlgmr.msrb.gmra.mxu2 %v1598_v13  ;;  %1838 = vmatmul.bf16.vlgmr.msrb.gmra.mxu3 %v1598_v13  ;;  %v1554_v39 = vand.u32 2147483647, %v4889_v52  ;;  %v5530_v13 = vld [vmem:[#allocation38_spill] sm:$0xff]  ;;  %v5533_v59 = vld [vmem:[#allocation41_spill] sm:$0xff] }
 0x1ae   :  { %2132 = vmatpush.bf16.msrb.mxu0 %v4481_v55  ;;  %2145 = vmatpush.bf16.msrb.mxu1 %v4483_v28  ;;  %v5534_v7 = vld [vmem:[#allocation42_spill] sm:$0xff] }
 0x1af   :  { %v4917_v14 = vadd.f32 %v1561_v46, %v1560_v33  ;;  %2158 = vmatpush.bf16.msrb.mxu2 %v4485_v63  ;;  %2171 = vmatpush.bf16.msrb.mxu3 %v4488_v6  ;;  %v1549_v29 = vadd.f32 %v4107_v5, %v1548_v3  ;;  %vm1555_vm3 = vcmp.eq.f32.partialorder %v1554_v39, 8.507059e+37  ;;  %v5532_v46 = vld [vmem:[#allocation40_spill] sm:$0xff]  ;;  %v5535_v33 = vld [vmem:[#allocation43_spill] sm:$0xff] }
 0x1b0   :  { %v5536_v3 = vld [vmem:[#allocation44_spill] sm:$0xff]  ;;  %v5539_v39 = vld [vmem:[#allocation47_spill] sm:$0xff] }
 0x1b1   :  { %4110 = vtanh.f32 %v4917_v14  ;;  %v1553_v1 = vsel %vm1552_vm2, %v4107_v5, %v1549_v29  ;;  %v5521_v5 = vld [vmem:[#allocation29_spill] sm:$0xff] }
 0x1b2   :  { %2133 = vmatpush.bf16.msrb.mxu0 %v4492_v11  ;;  %2146 = vmatpush.bf16.msrb.mxu1 %v4495_v16  ;;  %v1558_v41 = vsel %vm1555_vm3, %v1557_v0, %v1553_v1  ;;  %v5537_v29 = vld [vmem:[#allocation45_spill] sm:$0xff]  ;;  %v5540_v1 = vld [vmem:[#allocation48_spill] sm:$0xff] }
 0x1b3   :  { %2159 = vmatpush.bf16.msrb.mxu2 %v4497_v2  ;;  %2172 = vmatpush.bf16.msrb.mxu3 %v4501_v22  ;;  %v5541_v0 = vld [vmem:[#allocation49_spill] sm:$0xff] }
 0x1b6   :  { %2134 = vmatpush.bf16.msrb.mxu0 %v4504_v34  ;;  %2147 = vmatpush.bf16.msrb.mxu1 %v4508_v58 }
 0x1b7   :  { %v4111_v8 = vpop.eup %4110  ;;  %2160 = vmatpush.bf16.msrb.mxu2 %v4510_v42  ;;  %2173 = vmatpush.bf16.msrb.mxu3 %v4513_v45 }
 0x1b8   :  { %v1564_v52 = vmul.f32 %v4111_v8, %v1558_v41  ;;  %v5542_v8 = vld [vmem:[#allocation50_spill] sm:$0xff]  ;;  %v5543_v41 = vld [vmem:[#allocation51_spill] sm:$0xff] }
 0x1ba   :  { %v1565_v50 = vpack.c.bf16 %v1564_v52, %v1564_v52  ;;  %2135 = vmatpush.bf16.msrb.mxu0 %v4518_v54  ;;  %2148 = vmatpush.bf16.msrb.mxu1 %v4524_v61  ;;  %v5544_v52 = vld [vmem:[#allocation52_spill] sm:$0xff] }
 0x1bb   :  { %2161 = vmatpush.bf16.msrb.mxu2 %v4533_v17  ;;  %2174 = vmatpush.bf16.msrb.mxu3 %v4535_v18 }
 0x1bc   :  { %2011 = vmatmul.bf16.vlgmr.msra.gmra.mxu0 %v1565_v50  ;;  %2024 = vmatmul.bf16.vlgmr.msra.gmra.mxu1 %v1565_v50 }
 0x1bd   :  { %2037 = vmatmul.bf16.vlgmr.msra.gmra.mxu2 %v1565_v50  ;;  %2050 = vmatmul.bf16.vlgmr.msra.gmra.mxu3 %v1565_v50 }
 0x1be   :  { %2136 = vmatpush.bf16.msrb.mxu0 %v4539_v53  ;;  %2149 = vmatpush.bf16.msrb.mxu1 %v4543_v35 }
 0x1bf   :  { %2162 = vmatpush.bf16.msrb.mxu2 %v4545_v43  ;;  %2175 = vmatpush.bf16.msrb.mxu3 %v4553_v51 }
 0x1c2   :  { %2137 = vmatpush.bf16.msrb.mxu0 %v4555_v56  ;;  %2150 = vmatpush.bf16.msrb.mxu1 %v4562_v9 }
 0x1c3   :  { %2163 = vmatpush.bf16.msrb.mxu2 %v4572_v37  ;;  %2176 = vmatpush.bf16.msrb.mxu3 %v4579_v21 }
 0x1c6   :  { %2138 = vmatpush.bf16.msrb.mxu0 %v4581_v44  ;;  %2151 = vmatpush.bf16.msrb.mxu1 %v4591_v10 }
 0x1c7   :  { %2164 = vmatpush.bf16.msrb.mxu2 %v4597_v47  ;;  %2177 = vmatpush.bf16.msrb.mxu3 %v4600_v24 }
 0x1ca   :  { %2139 = vmatpush.bf16.msrb.mxu0 %v4605_v12  ;;  %2152 = vmatpush.bf16.msrb.mxu1 %v4614_v60 }
 0x1cb   :  { %2165 = vmatpush.bf16.msrb.mxu2 %v5520_v31  ;;  %2178 = vmatpush.bf16.msrb.mxu3 %v5521_v5 }
 0x1cd   :  { %2140 = vmatmul.bf16.vlgmr.msrb.gmra.mxu0 %v1565_v50  ;;  %2153 = vmatmul.bf16.vlgmr.msrb.gmra.mxu1 %v1565_v50 }
 0x1ce   :  { %2253 = vmatpush.bf16.msra.mxu0 %v5522_v25  ;;  %2266 = vmatpush.bf16.msra.mxu1 %v5523_v4 }
 0x1cf   :  { %2166 = vmatmul.bf16.vlgmr.msrb.gmra.mxu2 %v1565_v50  ;;  %2179 = vmatmul.bf16.vlgmr.msrb.gmra.mxu3 %v1565_v50  ;;  %v5545_v50 = vld [vmem:[#allocation53_spill] sm:$0xff] }
 0x1d0   :  { %2279 = vmatpush.bf16.msra.mxu2 %v5524_v20  ;;  %2292 = vmatpush.bf16.msra.mxu3 %v5525_v30 }
 0x1d2   :  { %2254 = vmatpush.bf16.msra.mxu0 %v5526_v62  ;;  %2267 = vmatpush.bf16.msra.mxu1 %v5527_v57 }
 0x1d4   :  { %2280 = vmatpush.bf16.msra.mxu2 %v5528_v36  ;;  %2293 = vmatpush.bf16.msra.mxu3 %v5529_v19 }
 0x1d6   :  { %2255 = vmatpush.bf16.msra.mxu0 %v5530_v13  ;;  %2268 = vmatpush.bf16.msra.mxu1 %v5531_v26 }
 0x1d8   :  { %2281 = vmatpush.bf16.msra.mxu2 %v5532_v46  ;;  %2294 = vmatpush.bf16.msra.mxu3 %v5533_v59 }
 0x1da   :  { %2256 = vmatpush.bf16.msra.mxu0 %v5534_v7  ;;  %2269 = vmatpush.bf16.msra.mxu1 %v5535_v33 }
 0x1dc   :  { %2282 = vmatpush.bf16.msra.mxu2 %v5536_v3  ;;  %2295 = vmatpush.bf16.msra.mxu3 %v5537_v29  ;;  %v5547_v3 = vld [vmem:[#allocation55_spill] sm:$0xff]  ;;  %v5548_v29 = vld [vmem:[#allocation56_spill] sm:$0xff] }
 0x1de   :  { %2257 = vmatpush.bf16.msra.mxu0 %v5538_v27  ;;  %2270 = vmatpush.bf16.msra.mxu1 %v5539_v39  ;;  %v5549_v27 = vld [vmem:[#allocation57_spill] sm:$0xff]  ;;  %v5550_v39 = vld [vmem:[#allocation58_spill] sm:$0xff] }
 0x1e0   :  { %2283 = vmatpush.bf16.msra.mxu2 %v5540_v1  ;;  %2296 = vmatpush.bf16.msra.mxu3 %v5541_v0  ;;  %v5551_v1 = vld [vmem:[#allocation59_spill] sm:$0xff]  ;;  %v5552_v0 = vld [vmem:[#allocation62_spill] sm:$0xff] }
 0x1e2   :  { %2258 = vmatpush.bf16.msra.mxu0 %v5542_v8  ;;  %2271 = vmatpush.bf16.msra.mxu1 %v5543_v41  ;;  %v5553_v8 = vld [vmem:[#allocation63_spill] sm:$0xff]  ;;  %v5554_v41 = vld [vmem:[#allocation60_spill] sm:$0xff] }
 0x1e4   :  { %2284 = vmatpush.bf16.msra.mxu2 %v5544_v52  ;;  %2297 = vmatpush.bf16.msra.mxu3 %v5545_v50  ;;  %v5555_v52 = vld [vmem:[#allocation61_spill] sm:$0xff]  ;;  %v5556_v50 = vld [vmem:[#allocation64_spill] sm:$0xff] }
 0x1e6   :  { %2259 = vmatpush.bf16.msra.mxu0 %v5546_v48  ;;  %2272 = vmatpush.bf16.msra.mxu1 %v5547_v3  ;;  %v5557_v48 = vld [vmem:[#allocation65_spill] sm:$0xff]  ;;  %v5558_v3 = vld [vmem:[#allocation66_spill] sm:$0xff] }
 0x1e8   :  { %2285 = vmatpush.bf16.msra.mxu2 %v5548_v29  ;;  %2298 = vmatpush.bf16.msra.mxu3 %v5549_v27  ;;  %v5559_v29 = vld [vmem:[#allocation67_spill] sm:$0xff]  ;;  %v5560_v27 = vld [vmem:[#allocation68_spill] sm:$0xff] }
 0x1ea   :  { %2260 = vmatpush.bf16.msra.mxu0 %v5550_v39  ;;  %2273 = vmatpush.bf16.msra.mxu1 %v5551_v1  ;;  %v5561_v39 = vld [vmem:[#allocation69_spill] sm:$0xff] }
 0x1ec   :  { %2286 = vmatpush.bf16.msra.mxu2 %v5554_v41  ;;  %2299 = vmatpush.bf16.msra.mxu3 %v5555_v52  ;;  %v5564_v41 = vld [vmem:[#allocation73_spill] sm:$0xff]  ;;  %v5565_v52 = vld [vmem:[#allocation74_spill] sm:$0xff] }
 0x1ee   :  { %2305 = vmatpush.bf16.msrb.mxu0 %v5552_v0  ;;  %2318 = vmatpush.bf16.msrb.mxu1 %v5553_v8  ;;  %v5562_v0 = vld [vmem:[#allocation71_spill] sm:$0xff]  ;;  %v5563_v8 = vld [vmem:[#allocation72_spill] sm:$0xff] }
 0x1f0   :  { %2331 = vmatpush.bf16.msrb.mxu2 %v5556_v50  ;;  %2344 = vmatpush.bf16.msrb.mxu3 %v5557_v48  ;;  %v5566_v50 = vld [vmem:[#allocation75_spill] sm:$0xff]  ;;  %v5567_v48 = vld [vmem:[#allocation76_spill] sm:$0xff] }
 0x1f2   :  { %2306 = vmatpush.bf16.msrb.mxu0 %v5558_v3  ;;  %2319 = vmatpush.bf16.msrb.mxu1 %v5559_v29  ;;  %v5568_v3 = vld [vmem:[#allocation77_spill] sm:$0xff]  ;;  %v5569_v29 = vld [vmem:[#allocation78_spill] sm:$0xff] }
 0x1f4   :  { %2332 = vmatpush.bf16.msrb.mxu2 %v5560_v27  ;;  %2345 = vmatpush.bf16.msrb.mxu3 %v5561_v39  ;;  %v5570_v27 = vld [vmem:[#allocation79_spill] sm:$0xff]  ;;  %v5571_v39 = vld [vmem:[#allocation80_spill] sm:$0xff] }
 0x1f6   :  { %2307 = vmatpush.bf16.msrb.mxu0 %v4770_v32  ;;  %2320 = vmatpush.bf16.msrb.mxu1 %v5562_v0  ;;  %v5572_v32 = vld [vmem:[#allocation81_spill] sm:$0xff]  ;;  %v5573_v0 = vld [vmem:[#allocation82_spill] sm:$0xff] }
 0x1f8   :  { %2333 = vmatpush.bf16.msrb.mxu2 %v5563_v8  ;;  %2346 = vmatpush.bf16.msrb.mxu3 %v5564_v41  ;;  %v5574_v8 = vld [vmem:[#allocation83_spill] sm:$0xff]  ;;  %v5575_v41 = vld [vmem:[#allocation84_spill] sm:$0xff] }
 0x1fa   :  { %2308 = vmatpush.bf16.msrb.mxu0 %v5565_v52  ;;  %2321 = vmatpush.bf16.msrb.mxu1 %v5566_v50  ;;  %v5576_v52 = vld [vmem:[#allocation85_spill] sm:$0xff] }
 0x1fc   :  { %2334 = vmatpush.bf16.msrb.mxu2 %v5567_v48  ;;  %2347 = vmatpush.bf16.msrb.mxu3 %v5568_v3  ;;  %v5577_v3 = vld [vmem:[#allocation88_spill] sm:$0xff] }
 0x1fe   :  { %2309 = vmatpush.bf16.msrb.mxu0 %v5569_v29  ;;  %2322 = vmatpush.bf16.msrb.mxu1 %v5570_v27  ;;  %v5578_v29 = vld [vmem:[#allocation89_spill] sm:$0xff]  ;;  %v5579_v27 = vld [vmem:[#allocation90_spill] sm:$0xff] }
 0x200   :  { %2335 = vmatpush.bf16.msrb.mxu2 %v5571_v39  ;;  %2348 = vmatpush.bf16.msrb.mxu3 %v5572_v32 }
 0x202   :  { %2310 = vmatpush.bf16.msrb.mxu0 %v5573_v0  ;;  %2323 = vmatpush.bf16.msrb.mxu1 %v5574_v8  ;;  %v5580_v0 = vld [vmem:[#allocation93_spill] sm:$0xff] }
 0x204   :  { %2336 = vmatpush.bf16.msrb.mxu2 %v5575_v41  ;;  %2349 = vmatpush.bf16.msrb.mxu3 %v5576_v52 }
 0x206   :  { %2311 = vmatpush.bf16.msrb.mxu0 %v4826_v40  ;;  %2324 = vmatpush.bf16.msrb.mxu1 %v4838_v23 }
 0x208   :  { %2337 = vmatpush.bf16.msrb.mxu2 %v5577_v3  ;;  %2350 = vmatpush.bf16.msrb.mxu3 %v5578_v29  ;;  %v3772_v3 = vld [vmem:[%s5291_s4 + $0x4] sm:$0xf]  ;;  %s4356_s4 = smov [#allocation8]  }
 0x209   :  { %v5020_v48 = vperm.slane %v3772_v3, 0  ;;  %v5026_v7 = vperm.slane %v3772_v3, 3  ;;  %s2814_s8 = sshll.u32 %s4356_s4, 4  ;;  %s2815_s8 = int_to_ptr.vmem [resolvable:$true] %s2814_s8 }
 0x20a   :  { %2312 = vmatpush.bf16.msrb.mxu0 %v5579_v27  ;;  %2325 = vmatpush.bf16.msrb.mxu1 %v4852_v15  ;;  %v5022_v27 = vperm.slane %v3772_v3, 1 }
 0x20b   :  { %5581 = vst [vmem:[#allocation28_spill] sm:$0xff] %v5020_v48 }
 0x20c   :  { %2338 = vmatpush.bf16.msrb.mxu2 %v4862_v49  ;;  %2351 = vmatpush.bf16.msrb.mxu3 %v5580_v0  ;;  %5582 = vst [vmem:[#allocation29_spill] sm:$0xff] %v5022_v27 }
 0x20d   :  { %5583 = vst [vmem:[#allocation30_spill] sm:$0xff] %v5026_v7 }
 0x229   :  { %v1800_v8 = vpop.f32.mrf.mxu0  ;;  %v1813_v41 = vpop.f32.mrf.mxu1 }
 0x230   :  { %v1826_v32 = vpop.f32.mrf.mxu2  ;;  %v1839_v52 = vpop.f32.mrf.mxu3 }
 0x231   :  { %v1802_v39 = vpop.f32.mrf.mxu0  ;;  %v1815_v40 = vpop.f32.mrf.mxu1 }
 0x238   :  { %v1828_v23 = vpop.f32.mrf.mxu2  ;;  %v1841_v29 = vpop.f32.mrf.mxu3 }
 0x239   :  { %v2012_v15 = vpop.f32.mrf.mxu0  ;;  %v2025_v49 = vpop.f32.mrf.mxu1 }
 0x23a   :  { %v2013_v50 = vadd.f32 %v2012_v15, %v1800_v8  ;;  %v2026_v0 = vadd.f32 %v2025_v49, %v1813_v41 }
 0x23c   :  { %v2065_v1 = vadd.f32 %v5020_v48, %v2013_v50  ;;  %v2066_v33 = vadd.f32 %v5022_v27, %v2026_v0  ;;  %v5029_v27 = vperm.slane %v3772_v3, 2 }
 0x23e   :  { %v3773_v39 = vmul.f32 -1.442695, %v2065_v1  ;;  %v3774_v40 = vmul.f32 -1.442695, %v2066_v33  ;;  %5584 = vst [vmem:[#allocation31_spill] sm:$0xff] %v5029_v27 }
 0x240   :  { %4112 = vpow2.f32 %v3773_v39  ;;  %v2038_v59 = vpop.f32.mrf.mxu2  ;;  %v2051_v23 = vpop.f32.mrf.mxu3 }
 0x241   :  { %4114 = vpow2.f32 %v3774_v40  ;;  %v2052_v29 = vadd.f32 %v2051_v23, %v1839_v52  ;;  %v2014_v46 = vpop.f32.mrf.mxu0  ;;  %v2027_v26 = vpop.f32.mrf.mxu1  ;;  %v2039_v39 = vadd.f32 %v2038_v59, %v1826_v32  ;;  %v5585_v52 = vld [vmem:[#allocation18_spill] sm:$0xff] }
 0x242   :  { %v5586_v26 = vld [vmem:[#allocation19_spill] sm:$0xff] }
 0x243   :  { %v2068_v13 = vadd.f32 %v5026_v7, %v2052_v29 }
 0x245   :  { %v3775_v19 = vmul.f32 -1.442695, %v2068_v13 }
 0x246   :  { %v4113_v15 = vpop.eup %4112 }
 0x247   :  { %v4115_v49 = vpop.eup %4114  ;;  %v2072_v8 = vadd.f32 1.0, %v4113_v15  ;;  %4116 = vpow2.f32 %v3775_v19  ;;  %v2067_v15 = vadd.f32 %v5029_v27, %v2039_v39 }
 0x248   :  { %v2091_v41 = vadd.f32 1.0, %v4115_v49  ;;  %v2040_v0 = vpop.f32.mrf.mxu2  ;;  %v2053_v1 = vpop.f32.mrf.mxu3 }
 0x249   :  { %4118 = vrcp.f32 %v2072_v8  ;;  %vm2078_vm6 = vweird.f32 %v2072_v8 }
 0x24a   :  { %4120 = vrcp.f32 %v2091_v41  ;;  %v2141_v33 = vpop.f32.mrf.mxu0  ;;  %v2154_v50 = vpop.f32.mrf.mxu1  ;;  %v2103_v48 = vand.u32 2147483648, %v2091_v41  ;;  %vm2097_vm7 = vweird.f32 %v2091_v41 }
 0x24b   :  { %v2184_v46 = vadd.f32 %v2141_v33, %v5585_v52  ;;  %v2185_v40 = vadd.f32 %v2154_v50, %v5586_v26  ;;  %v5587_v33 = vld [vmem:[#allocation24_spill] sm:$0xff] }
 0x24d   :  { %v4117_v23 = vpop.eup %4116  ;;  %v3776_v13 = vmul.f32 -1.442695, %v2184_v46  ;;  %v3777_v29 = vmul.f32 -1.442695, %v2185_v40  ;;  %v2082_v40 = vand.u32 2147483647, %v2072_v8 }
 0x24e   :  { %v5033_v7 = vadd.f32 1.0, %v4117_v23  ;;  %v2084_v23 = vand.u32 2147483648, %v2072_v8 }
 0x24f   :  { %v4119_v19 = vpop.eup %4118  ;;  %4122 = vpow2.f32 %v3776_v13  ;;  %vm2083_vm9 = vcmp.eq.f32.partialorder %v2082_v40, 8.507059e+37 }
 0x250   :  { %v4121_v49 = vpop.eup %4120  ;;  %v2074_v0 = vmul.f32 %v4119_v19, %v2072_v8  ;;  %4124 = vrcp.f32 %v5033_v7  ;;  %vm2079_vm4 = vweird.f32 %v4119_v19  ;;  %vm2117_vm13 = vweird.f32 %v5033_v7 }
 0x251   :  { %v2093_v32 = vmul.f32 %v4121_v49, %v2091_v41  ;;  %4126 = vpow2.f32 %v3777_v29  ;;  %vm2098_vm5 = vweird.f32 %v4121_v49  ;;  %v2101_v29 = vand.u32 2147483647, %v2091_v41  ;;  %vm2080_vm8 = vmor %vm2078_vm6, %vm2079_vm4 }
 0x252   :  { %v2167_v59 = vpop.f32.mrf.mxu2  ;;  %v2180_v3 = vpop.f32.mrf.mxu3  ;;  %v2075_v1 = vsub.f32 1.0, %v2074_v0  ;;  %4128 = vtanh.f32 %v2067_v15  ;;  %v2085_v15 = vor.u32 1.1754944e-38, %v2084_v23  ;;  %vm2099_vm10 = vmor %vm2097_vm7, %vm2098_vm5 }
 0x253   :  { %v2187_v50 = vadd.f32 %v2180_v3, %v5587_v33  ;;  %v2143_v52 = vpop.f32.mrf.mxu0  ;;  %v2156_v46 = vpop.f32.mrf.mxu1  ;;  %v2094_v26 = vsub.f32 1.0, %v2093_v32  ;;  %vm2102_vm11 = vcmp.eq.f32.partialorder %v2101_v29, 8.507059e+37 }
 0x254   :  { %v2076_v39 = vmul.f32 %v4119_v19, %v2075_v1 }
 0x255   :  { %v3778_v13 = vmul.f32 -1.442695, %v2187_v50  ;;  %v4123_v27 = vpop.eup %4122  ;;  %v2095_v36 = vmul.f32 %v4121_v49, %v2094_v26  ;;  %v2104_v50 = vor.u32 1.1754944e-38, %v2103_v48 }
 0x256   :  { %v5038_v57 = vpop.eup %4124  ;;  %v2077_v0 = vadd.f32 %v4119_v19, %v2076_v39  ;;  %v5040_v3 = vadd.f32 1.0, %v4123_v27 }
 0x257   :  { %4130 = vpow2.f32 %v3778_v13  ;;  %v4127_v32 = vpop.eup %4126  ;;  %v2096_v33 = vadd.f32 %v4121_v49, %v2095_v36  ;;  %v2113_v1 = vmul.f32 %v5038_v57, %v5033_v7  ;;  %vm2118_vm12 = vweird.f32 %v5038_v57 }
 0x258   :  { %v2081_v52 = vsel %vm2080_vm8, %v4119_v19, %v2077_v0  ;;  %4132 = vrcp.f32 %v5040_v3  ;;  %v5045_v8 = vadd.f32 1.0, %v4127_v32  ;;  %v4129_v41 = vpop.eup %4128  ;;  %vm5064_vm14 = vmor %vm2117_vm13, %vm2118_vm12  ;;  %vm2197_vm0 = vweird.f32 %v5040_v3 }
 0x259   :  { %v2086_v46 = vsel %vm2083_vm9, %v2085_v15, %v2081_v52  ;;  %v2100_v27 = vsel %vm2099_vm10, %v4121_v49, %v2096_v33  ;;  %v2114_v26 = vsub.f32 1.0, %v2113_v1  ;;  %v5588_v15 = vld [vmem:[#allocation22_spill] sm:$0xff]  ;;  %v2123_v33 = vand.u32 2147483648, %v5033_v7 }
 0x25a   :  { %v2169_v39 = vpop.f32.mrf.mxu2  ;;  %v2182_v13 = vpop.f32.mrf.mxu3  ;;  %v2105_v40 = vsel %vm2102_vm11, %v2104_v50, %v2100_v27  ;;  %v2128_v23 = vmul.f32 %v4129_v41, %v2086_v46  ;;  %4134 = vrcp.f32 %v5045_v8  ;;  %v2186_v49 = vadd.f32 %v2167_v59, %v5588_v15 }
 0x25b   :  { %v2127_v36 = vmul.f32 %v2105_v40, %v4887_v38  ;;  %v2115_v48 = vmul.f32 %v5038_v57, %v2114_v26  ;;  %v2203_v41 = vand.u32 2147483648, %v5040_v3  ;;  %v2124_v27 = vor.u32 1.1754944e-38, %v2123_v33 }
 0x25c   :  { %v2222_v13 = vand.u32 2147483648, %v5045_v8  ;;  %v2220_v40 = vand.u32 2147483647, %v5045_v8  ;;  %vm2216_vm3 = vweird.f32 %v5045_v8 }
 0x25d   :  { %v4131_v62 = vpop.eup %4130  ;;  %v5050_v19 = vadd.f32 %v2128_v23, %v2127_v36  ;;  %v2116_v29 = vadd.f32 %v5038_v57, %v2115_v48 }
 0x25e   :  { %v5052_v0 = vadd.f32 1.0, %v4131_v62  ;;  %v4133_v32 = vpop.eup %4132  ;;  %v2121_v62 = vand.u32 2147483647, %v5033_v7  ;;  %v2201_v7 = vand.u32 2147483647, %v5040_v3  ;;  %vm2221_vm7 = vcmp.eq.f32.partialorder %v2220_v40, 8.507059e+37 }
 0x25f   :  { %4136 = vtanh.f32 %v5050_v19  ;;  %v2193_v38 = vmul.f32 %v4133_v32, %v5040_v3  ;;  %v2120_v46 = vsel %vm5064_vm14, %v5038_v57, %v2116_v29  ;;  %vm2198_vm15 = vweird.f32 %v4133_v32  ;;  %v5623_v40 = vld [vmem:[#allocation66_spill] sm:$0xff] }
 0x260   :  { %v4135_v1 = vpop.eup %4134  ;;  %4138 = vrcp.f32 %v5052_v0  ;;  %vm2122_vm1 = vcmp.eq.f32.partialorder %v2121_v62, 8.507059e+37  ;;  %vm2199_vm4 = vmor %vm2197_vm0, %vm2198_vm15  ;;  %v2204_v57 = vor.u32 1.1754944e-38, %v2203_v41  ;;  %vm2202_vm5 = vcmp.eq.f32.partialorder %v2201_v7, 8.507059e+37 }
 0x261   :  { %v2194_v50 = vsub.f32 1.0, %v2193_v38  ;;  %v2212_v59 = vmul.f32 %v4135_v1, %v5045_v8  ;;  %4140 = vtanh.f32 %v2186_v49  ;;  %vm2217_vm2 = vweird.f32 %v4135_v1 }
 0x262   :  { %v2125_v15 = vsel %vm2122_vm1, %v2124_v27, %v2120_v46  ;;  %vm2218_vm6 = vmor %vm2216_vm3, %vm2217_vm2  ;;  %v2242_v7 = vand.u32 2147483648, %v5052_v0  ;;  %vm2236_vm9 = vweird.f32 %v5052_v0 }
 0x263   :  { %v2213_v26 = vsub.f32 1.0, %v2212_v59  ;;  %v2195_v39 = vmul.f32 %v4133_v32, %v2194_v50  ;;  %v2223_v59 = vor.u32 1.1754944e-38, %v2222_v13  ;;  %v5622_v13 = vld [vmem:[#allocation65_spill] sm:$0xff] }
 0x265   :  { %v4137_v23 = vpop.eup %4136  ;;  %v2214_v36 = vmul.f32 %v4135_v1, %v2213_v26  ;;  %v2196_v48 = vadd.f32 %v4133_v32, %v2195_v39 }
 0x266   :  { %v4139_v49 = vpop.eup %4138  ;;  %v2131_v29 = vmul.f32 %v4137_v23, %v2125_v15  ;;  %v5624_v23 = vld [vmem:[#allocation67_spill] sm:$0xff]  ;;  %v5627_v15 = vld [vmem:[#allocation70_spill] sm:$0xff] }
 0x267   :  { %v2200_v33 = vsel %vm2199_vm4, %v4133_v32, %v2196_v48  ;;  %v2215_v38 = vadd.f32 %v4135_v1, %v2214_v36  ;;  %v2232_v50 = vmul.f32 %v4139_v49, %v5052_v0  ;;  %v4141_v3 = vpop.eup %4140  ;;  %vm2237_vm8 = vweird.f32 %v4139_v49  ;;  %v5625_v36 = vld [vmem:[#allocation68_spill] sm:$0xff]  ;;  %v5626_v48 = vld [vmem:[#allocation69_spill] sm:$0xff] }
 0x268   :  { %v2205_v62 = vsel %vm2202_vm5, %v2204_v57, %v2200_v33  ;;  %v2252_v52 = vpack.c.bf16 %v2131_v29, %v2131_v29  ;;  %vm2238_vm10 = vmor %vm2236_vm9, %vm2237_vm8  ;;  %v5629_v57 = vld [vmem:[#allocation72_spill] sm:$0xff]  ;;  %v5630_v29 = vld [vmem:[#allocation73_spill] sm:$0xff] }
 0x269   :  { %v2219_v26 = vsel %vm2218_vm6, %v4135_v1, %v2215_v38  ;;  %v2247_v39 = vmul.f32 %v4141_v3, %v2205_v62  ;;  %v2233_v46 = vsub.f32 1.0, %v2232_v50  ;;  %v5631_v33 = vld [vmem:[#allocation74_spill] sm:$0xff]  ;;  %v5632_v38 = vld [vmem:[#allocation75_spill] sm:$0xff]  ;;  %v5633_v50 = vld [vmem:[#allocation76_spill] sm:$0xff] }
 0x26a   :  { %v2224_v27 = vsel %vm2221_vm7, %v2223_v59, %v2219_v26  ;;  %2261 = vmatmul.bf16.vlgmr.msra.gmra.mxu0 %v2252_v52  ;;  %2274 = vmatmul.bf16.vlgmr.msra.gmra.mxu1 %v2252_v52  ;;  %v5634_v3 = vld [vmem:[#allocation77_spill] sm:$0xff]  ;;  %v5635_v59 = vld [vmem:[#allocation78_spill] sm:$0xff]  ;;  %v5636_v62 = vld [vmem:[#allocation79_spill] sm:$0xff] }
 0x26b   :  { %v2246_v8 = vmul.f32 %v2224_v27, %v4917_v14  ;;  %v2234_v41 = vmul.f32 %v4139_v49, %v2233_v46  ;;  %2287 = vmatmul.bf16.vlgmr.msra.gmra.mxu2 %v2252_v52  ;;  %2300 = vmatmul.bf16.vlgmr.msra.gmra.mxu3 %v2252_v52  ;;  %v2240_v14 = vand.u32 2147483647, %v5052_v0  ;;  %v5621_v0 = vld [vmem:[#allocation64_spill] sm:$0xff]  ;;  %v5638_v26 = vld [vmem:[#allocation81_spill] sm:$0xff]  ;;  %v5640_v46 = vld [vmem:[#allocation83_spill] sm:$0xff] }
 0x26c   :  { %2424 = vmatpush.bf16.msra.mxu0 %v4481_v55  ;;  %2437 = vmatpush.bf16.msra.mxu1 %v4483_v28  ;;  %v2243_v28 = vor.u32 1.1754944e-38, %v2242_v7  ;;  %v5637_v52 = vld [vmem:[#allocation80_spill] sm:$0xff] }
 0x26d   :  { %v5081_v32 = vadd.f32 %v2247_v39, %v2246_v8  ;;  %2450 = vmatpush.bf16.msra.mxu2 %v4485_v63  ;;  %2463 = vmatpush.bf16.msra.mxu3 %v4488_v6  ;;  %v2235_v1 = vadd.f32 %v4139_v49, %v2234_v41  ;;  %vm2241_vm11 = vcmp.eq.f32.partialorder %v2240_v14, 8.507059e+37  ;;  %v5639_v39 = vld [vmem:[#allocation82_spill] sm:$0xff]  ;;  %v5641_v27 = vld [vmem:[#allocation84_spill] sm:$0xff]  ;;  %v5642_v8 = vld [vmem:[#allocation85_spill] sm:$0xff] }
 0x26e   :  { %v5643_v41 = vld [vmem:[#allocation86_spill] sm:$0xff]  ;;  %v5645_v7 = vld [vmem:[#allocation88_spill] sm:$0xff]  ;;  %v5646_v14 = vld [vmem:[#allocation89_spill] sm:$0xff] }
 0x26f   :  { %4142 = vtanh.f32 %v5081_v32  ;;  %v2239_v55 = vsel %vm2238_vm10, %v4139_v49, %v2235_v1  ;;  %v5628_v49 = vld [vmem:[#allocation71_spill] sm:$0xff] }
 0x270   :  { %2425 = vmatpush.bf16.msra.mxu0 %v4492_v11  ;;  %2438 = vmatpush.bf16.msra.mxu1 %v4495_v16  ;;  %v2244_v6 = vsel %vm2241_vm11, %v2243_v28, %v2239_v55  ;;  %v5644_v1 = vld [vmem:[#allocation87_spill] sm:$0xff]  ;;  %v5647_v55 = vld [vmem:[#allocation90_spill] sm:$0xff] }
 0x271   :  { %2451 = vmatpush.bf16.msra.mxu2 %v4497_v2  ;;  %2464 = vmatpush.bf16.msra.mxu3 %v4501_v22  ;;  %v5591_v2 = vld [vmem:[#allocation34_spill] sm:$0xff]  ;;  %v5592_v22 = vld [vmem:[#allocation35_spill] sm:$0xff] }
 0x272   :  { %v5648_v28 = vld [vmem:[#allocation91_spill] sm:$0xff] }
 0x274   :  { %2426 = vmatpush.bf16.msra.mxu0 %v4504_v34  ;;  %2439 = vmatpush.bf16.msra.mxu1 %v4508_v58  ;;  %v5593_v34 = vld [vmem:[#allocation36_spill] sm:$0xff]  ;;  %v5594_v58 = vld [vmem:[#allocation37_spill] sm:$0xff] }
 0x275   :  { %v4143_v63 = vpop.eup %4142  ;;  %2452 = vmatpush.bf16.msra.mxu2 %v4510_v42  ;;  %2465 = vmatpush.bf16.msra.mxu3 %v4513_v45  ;;  %v5595_v42 = vld [vmem:[#allocation38_spill] sm:$0xff]  ;;  %v5596_v45 = vld [vmem:[#allocation39_spill] sm:$0xff] }
 0x276   :  { %v2250_v11 = vmul.f32 %v4143_v63, %v2244_v6  ;;  %v5649_v63 = vld [vmem:[#allocation92_spill] sm:$0xff]  ;;  %v5650_v6 = vld [vmem:[#allocation93_spill] sm:$0xff] }
 0x278   :  { %v2251_v16 = vpack.c.bf16 %v2250_v11, %v2250_v11  ;;  %2427 = vmatpush.bf16.msra.mxu0 %v4518_v54  ;;  %2440 = vmatpush.bf16.msra.mxu1 %v4524_v61  ;;  %v5597_v54 = vld [vmem:[#allocation40_spill] sm:$0xff]  ;;  %v5598_v61 = vld [vmem:[#allocation41_spill] sm:$0xff] }
 0x279   :  { %2453 = vmatpush.bf16.msra.mxu2 %v4533_v17  ;;  %2466 = vmatpush.bf16.msra.mxu3 %v4535_v18  ;;  %v5599_v17 = vld [vmem:[#allocation42_spill] sm:$0xff]  ;;  %v5600_v18 = vld [vmem:[#allocation43_spill] sm:$0xff] }
 0x27a   :  { %2313 = vmatmul.bf16.vlgmr.msrb.gmra.mxu0 %v2251_v16  ;;  %2326 = vmatmul.bf16.vlgmr.msrb.gmra.mxu1 %v2251_v16 }
 0x27b   :  { %2339 = vmatmul.bf16.vlgmr.msrb.gmra.mxu2 %v2251_v16  ;;  %2352 = vmatmul.bf16.vlgmr.msrb.gmra.mxu3 %v2251_v16 }
 0x27c   :  { %2428 = vmatpush.bf16.msra.mxu0 %v4539_v53  ;;  %2441 = vmatpush.bf16.msra.mxu1 %v4543_v35  ;;  %v5601_v53 = vld [vmem:[#allocation44_spill] sm:$0xff]  ;;  %v5602_v35 = vld [vmem:[#allocation45_spill] sm:$0xff] }
 0x27d   :  { %2454 = vmatpush.bf16.msra.mxu2 %v4545_v43  ;;  %2467 = vmatpush.bf16.msra.mxu3 %v4553_v51  ;;  %v5603_v43 = vld [vmem:[#allocation46_spill] sm:$0xff]  ;;  %v5604_v51 = vld [vmem:[#allocation47_spill] sm:$0xff] }
 0x280   :  { %2429 = vmatpush.bf16.msra.mxu0 %v4555_v56  ;;  %2442 = vmatpush.bf16.msra.mxu1 %v4562_v9  ;;  %v5605_v56 = vld [vmem:[#allocation48_spill] sm:$0xff]  ;;  %v5606_v9 = vld [vmem:[#allocation49_spill] sm:$0xff] }
 0x281   :  { %2455 = vmatpush.bf16.msra.mxu2 %v4572_v37  ;;  %2468 = vmatpush.bf16.msra.mxu3 %v4579_v21  ;;  %v5607_v37 = vld [vmem:[#allocation50_spill] sm:$0xff]  ;;  %v5608_v21 = vld [vmem:[#allocation51_spill] sm:$0xff] }
 0x284   :  { %2430 = vmatpush.bf16.msra.mxu0 %v4581_v44  ;;  %2443 = vmatpush.bf16.msra.mxu1 %v4591_v10  ;;  %v5609_v44 = vld [vmem:[#allocation52_spill] sm:$0xff]  ;;  %v5610_v10 = vld [vmem:[#allocation53_spill] sm:$0xff] }
 0x285   :  { %2456 = vmatpush.bf16.msra.mxu2 %v4597_v47  ;;  %2469 = vmatpush.bf16.msra.mxu3 %v4600_v24  ;;  %v5611_v47 = vld [vmem:[#allocation54_spill] sm:$0xff]  ;;  %v5612_v24 = vld [vmem:[#allocation55_spill] sm:$0xff] }
 0x288   :  { %2431 = vmatpush.bf16.msra.mxu0 %v4605_v12  ;;  %2444 = vmatpush.bf16.msra.mxu1 %v4614_v60  ;;  %v5613_v12 = vld [vmem:[#allocation56_spill] sm:$0xff]  ;;  %v5614_v60 = vld [vmem:[#allocation57_spill] sm:$0xff] }
 0x289   :  { %2457 = vmatpush.bf16.msra.mxu2 %v5520_v31  ;;  %2470 = vmatpush.bf16.msra.mxu3 %v5521_v5  ;;  %v5615_v31 = vld [vmem:[#allocation58_spill] sm:$0xff]  ;;  %v5616_v5 = vld [vmem:[#allocation59_spill] sm:$0xff] }
 0x28b   :  { %2432 = vmatmul.bf16.vlgmr.msra.gmra.mxu0 %v2251_v16  ;;  %2445 = vmatmul.bf16.vlgmr.msra.gmra.mxu1 %v2251_v16 }
 0x28c   :  { %2545 = vmatpush.bf16.msrb.mxu0 %v5522_v25  ;;  %2558 = vmatpush.bf16.msrb.mxu1 %v5523_v4  ;;  %v5617_v25 = vld [vmem:[#allocation62_spill] sm:$0xff]  ;;  %v5618_v4 = vld [vmem:[#allocation63_spill] sm:$0xff] }
 0x28d   :  { %2458 = vmatmul.bf16.vlgmr.msra.gmra.mxu2 %v2251_v16  ;;  %2471 = vmatmul.bf16.vlgmr.msra.gmra.mxu3 %v2251_v16 }
 0x28e   :  { %2571 = vmatpush.bf16.msrb.mxu2 %v5524_v20  ;;  %2584 = vmatpush.bf16.msrb.mxu3 %v5525_v30  ;;  %v5619_v20 = vld [vmem:[#allocation60_spill] sm:$0xff]  ;;  %v5620_v30 = vld [vmem:[#allocation61_spill] sm:$0xff] }
 0x290   :  { %2546 = vmatpush.bf16.msrb.mxu0 %v5591_v2  ;;  %2559 = vmatpush.bf16.msrb.mxu1 %v5592_v22 }
 0x292   :  { %2572 = vmatpush.bf16.msrb.mxu2 %v5593_v34  ;;  %2585 = vmatpush.bf16.msrb.mxu3 %v5594_v58 }
 0x294   :  { %2547 = vmatpush.bf16.msrb.mxu0 %v5595_v42  ;;  %2560 = vmatpush.bf16.msrb.mxu1 %v5596_v45 }
 0x296   :  { %2573 = vmatpush.bf16.msrb.mxu2 %v5597_v54  ;;  %2586 = vmatpush.bf16.msrb.mxu3 %v5598_v61 }
 0x298   :  { %2548 = vmatpush.bf16.msrb.mxu0 %v5599_v17  ;;  %2561 = vmatpush.bf16.msrb.mxu1 %v5600_v18 }
 0x29a   :  { %2574 = vmatpush.bf16.msrb.mxu2 %v5601_v53  ;;  %2587 = vmatpush.bf16.msrb.mxu3 %v5602_v35  ;;  %v5651_v53 = vld [vmem:[#allocation28_spill] sm:$0xff] }
 0x29c   :  { %2549 = vmatpush.bf16.msrb.mxu0 %v5603_v43  ;;  %2562 = vmatpush.bf16.msrb.mxu1 %v5604_v51  ;;  %v5652_v43 = vld [vmem:[#allocation29_spill] sm:$0xff] }
 0x29e   :  { %2575 = vmatpush.bf16.msrb.mxu2 %v5605_v56  ;;  %2588 = vmatpush.bf16.msrb.mxu3 %v5606_v9 }
 0x2a0   :  { %2550 = vmatpush.bf16.msrb.mxu0 %v5607_v37  ;;  %2563 = vmatpush.bf16.msrb.mxu1 %v5608_v21 }
 0x2a2   :  { %2576 = vmatpush.bf16.msrb.mxu2 %v5609_v44  ;;  %2589 = vmatpush.bf16.msrb.mxu3 %v5610_v10 }
 0x2a4   :  { %2551 = vmatpush.bf16.msrb.mxu0 %v5611_v47  ;;  %2564 = vmatpush.bf16.msrb.mxu1 %v5612_v24  ;;  %v5653_v24 = vld [vmem:[#allocation30_spill] sm:$0xff] }
 0x2a6   :  { %2577 = vmatpush.bf16.msrb.mxu2 %v5613_v12  ;;  %2590 = vmatpush.bf16.msrb.mxu3 %v5614_v60 }
 0x2a8   :  { %2552 = vmatpush.bf16.msrb.mxu0 %v5615_v31  ;;  %2565 = vmatpush.bf16.msrb.mxu1 %v5616_v5 }
 0x2aa   :  { %2578 = vmatpush.bf16.msrb.mxu2 %v5619_v20  ;;  %2591 = vmatpush.bf16.msrb.mxu3 %v5620_v30 }
 0x2ac   :  { %2597 = vmatpush.bf16.msra.mxu0 %v5617_v25  ;;  %2610 = vmatpush.bf16.msra.mxu1 %v5618_v4 }
 0x2ae   :  { %2623 = vmatpush.bf16.msra.mxu2 %v5621_v0  ;;  %2636 = vmatpush.bf16.msra.mxu3 %v5622_v13  ;;  %v5654_v0 = vld [vmem:[#allocation16_spill] sm:$0xff]  ;;  %v5655_v13 = vld [vmem:[#allocation23_spill] sm:$0xff] }
 0x2b0   :  { %2598 = vmatpush.bf16.msra.mxu0 %v5623_v40  ;;  %2611 = vmatpush.bf16.msra.mxu1 %v5624_v23  ;;  %v314_v40 = vadd.f32 %v5655_v13, %v5654_v0  ;;  %v5656_v23 = vld [vmem:[#allocation17_spill] sm:$0xff]  ;;  %v5661_v13 = vld [vmem:[#allocation20_spill] sm:$0xff] }
 0x2b2   :  { %2624 = vmatpush.bf16.msra.mxu2 %v5625_v36  ;;  %2637 = vmatpush.bf16.msra.mxu3 %v5626_v48  ;;  %v5657_v36 = vld [vmem:[#allocation25_spill] sm:$0xff] }
 0x2b3   :  { %v333_v48 = vadd.f32 %v5657_v36, %v5656_v23 }
 0x2b4   :  { %2599 = vmatpush.bf16.msra.mxu0 %v5627_v15  ;;  %2612 = vmatpush.bf16.msra.mxu1 %v5628_v49 }
 0x2b6   :  { %2625 = vmatpush.bf16.msra.mxu2 %v5629_v57  ;;  %2638 = vmatpush.bf16.msra.mxu3 %v5630_v29 }
 0x2b8   :  { %2600 = vmatpush.bf16.msra.mxu0 %v5631_v33  ;;  %2613 = vmatpush.bf16.msra.mxu1 %v5632_v38 }
 0x2ba   :  { %2626 = vmatpush.bf16.msra.mxu2 %v5633_v50  ;;  %2639 = vmatpush.bf16.msra.mxu3 %v5634_v3 }
 0x2bc   :  { %2601 = vmatpush.bf16.msra.mxu0 %v5635_v59  ;;  %2614 = vmatpush.bf16.msra.mxu1 %v5636_v62 }
 0x2be   :  { %2627 = vmatpush.bf16.msra.mxu2 %v5637_v52  ;;  %2640 = vmatpush.bf16.msra.mxu3 %v5638_v26  ;;  %v5658_v52 = vld [vmem:[#allocation31_spill] sm:$0xff] }
 0x2c0   :  { %2602 = vmatpush.bf16.msra.mxu0 %v5639_v39  ;;  %2615 = vmatpush.bf16.msra.mxu1 %v5640_v46  ;;  %v5659_v46 = vld [vmem:[#allocation21_spill] sm:$0xff] }
 0x2c2   :  { %2628 = vmatpush.bf16.msra.mxu2 %v5641_v27  ;;  %2641 = vmatpush.bf16.msra.mxu3 %v5642_v8  ;;  %v5660_v27 = vld [vmem:[#allocation27_spill] sm:$0xff] }
 0x2c3   :  { %v371_v8 = vadd.f32 %v5660_v27, %v5659_v46 }
 0x2c4   :  { %2603 = vmatpush.bf16.msra.mxu0 %v5643_v41  ;;  %2616 = vmatpush.bf16.msra.mxu1 %v5644_v1 }
 0x2c6   :  { %2629 = vmatpush.bf16.msra.mxu2 %v5645_v7  ;;  %2642 = vmatpush.bf16.msra.mxu3 %v5646_v14 }
 0x2c8   :  { %2604 = vmatpush.bf16.msra.mxu0 %v5647_v55  ;;  %2617 = vmatpush.bf16.msra.mxu1 %v5648_v28 }
 0x2ca   :  { %2630 = vmatpush.bf16.msra.mxu2 %v5649_v63  ;;  %2643 = vmatpush.bf16.msra.mxu3 %v5650_v6 }
 0x2e7   :  { %v2262_v11 = vpop.f32.mrf.mxu0  ;;  %v2275_v16 = vpop.f32.mrf.mxu1 }
 0x2ee   :  { %v2288_v2 = vpop.f32.mrf.mxu2  ;;  %v2301_v22 = vpop.f32.mrf.mxu3 }
 0x2ef   :  { %v2264_v34 = vpop.f32.mrf.mxu0  ;;  %v2277_v58 = vpop.f32.mrf.mxu1 }
 0x2f6   :  { %v2290_v42 = vpop.f32.mrf.mxu2  ;;  %v2303_v45 = vpop.f32.mrf.mxu3 }
 0x2f7   :  { %v2314_v54 = vpop.f32.mrf.mxu0  ;;  %v2327_v61 = vpop.f32.mrf.mxu1 }
 0x2f8   :  { %v2315_v17 = vadd.f32 %v2314_v54, %v2262_v11  ;;  %v2328_v18 = vadd.f32 %v2327_v61, %v2275_v16 }
 0x2fa   :  { %v2357_v35 = vadd.f32 %v2315_v17, %v5651_v53  ;;  %v2358_v51 = vadd.f32 %v2328_v18, %v5652_v43 }
 0x2fc   :  { %v3779_v56 = vmul.f32 -1.442695, %v2357_v35  ;;  %v3780_v9 = vmul.f32 -1.442695, %v2358_v51 }
 0x2fe   :  { %4144 = vpow2.f32 %v3779_v56  ;;  %v2340_v37 = vpop.f32.mrf.mxu2  ;;  %v2353_v21 = vpop.f32.mrf.mxu3 }
 0x2ff   :  { %4146 = vpow2.f32 %v3780_v9  ;;  %v2354_v44 = vadd.f32 %v2353_v21, %v2301_v22  ;;  %v2316_v10 = vpop.f32.mrf.mxu0  ;;  %v2329_v47 = vpop.f32.mrf.mxu1  ;;  %v2341_v57 = vadd.f32 %v2340_v37, %v2288_v2 }
 0x301   :  { %v2360_v12 = vadd.f32 %v2354_v44, %v5653_v24  ;;  %v2359_v26 = vadd.f32 %v2341_v57, %v5658_v52 }
 0x303   :  { %v3781_v60 = vmul.f32 -1.442695, %v2360_v12 }
 0x304   :  { %v4145_v31 = vpop.eup %4144 }
 0x305   :  { %v4147_v5 = vpop.eup %4146  ;;  %v2364_v25 = vadd.f32 1.0, %v4145_v31  ;;  %4148 = vpow2.f32 %v3781_v60 }
 0x306   :  { %v5184_v4 = vadd.f32 1.0, %v4147_v5  ;;  %v2342_v20 = vpop.f32.mrf.mxu2  ;;  %v2355_v30 = vpop.f32.mrf.mxu3 }
 0x307   :  { %4150 = vrcp.f32 %v2364_v25  ;;  %v2374_v16 = vand.u32 2147483647, %v2364_v25  ;;  %v2376_v2 = vand.u32 2147483648, %v2364_v25  ;;  %vm2370_vm14 = vweird.f32 %v2364_v25 }
 0x308   :  { %4152 = vrcp.f32 %v5184_v4  ;;  %v2433_v15 = vpop.f32.mrf.mxu0  ;;  %v2446_v49 = vpop.f32.mrf.mxu1  ;;  %v2395_v22 = vand.u32 2147483648, %v5184_v4  ;;  %v2393_v54 = vand.u32 2147483647, %v5184_v4  ;;  %vm2389_vm15 = vweird.f32 %v5184_v4 }
 0x309   :  { %v2476_v29 = vadd.f32 %v2433_v15, %v314_v40  ;;  %v2477_v33 = vadd.f32 %v2446_v49, %v333_v48  ;;  %vm2375_vm1 = vcmp.eq.f32.partialorder %v2374_v16, 8.507059e+37  ;;  %v2377_v51 = vor.u32 1.1754944e-38, %v2376_v2  ;;  %v5662_v40 = vld [vmem:[#allocation26_spill] sm:$0xff] }
 0x30a   :  { %v2396_v37 = vor.u32 1.1754944e-38, %v2395_v22  ;;  %vm2394_vm3 = vcmp.eq.f32.partialorder %v2393_v54, 8.507059e+37  ;;  %v352_v23 = vadd.f32 %v5662_v40, %v5661_v13  ;;  %v4051_v40 = vld [vmem:[%s5292_s5 + $0x28] sm:$0xff] }
 0x30b   :  { %v4149_v38 = vpop.eup %4148  ;;  %v3782_v50 = vmul.f32 -1.442695, %v2476_v29  ;;  %v3783_v3 = vmul.f32 -1.442695, %v2477_v33 }
 0x30c   :  { %v5191_v59 = vadd.f32 1.0, %v4149_v38 }
 0x30d   :  { %v4151_v62 = vpop.eup %4150  ;;  %4154 = vpow2.f32 %v3782_v50 }
 0x30e   :  { %v4153_v39 = vpop.eup %4152  ;;  %v2366_v41 = vmul.f32 %v4151_v62, %v2364_v25  ;;  %4156 = vrcp.f32 %v5191_v59  ;;  %vm2371_vm12 = vweird.f32 %v4151_v62  ;;  %v2415_v49 = vand.u32 2147483648, %v5191_v59 }
 0x30f   :  { %v2385_v1 = vmul.f32 %v4153_v39, %v5184_v4  ;;  %4158 = vpow2.f32 %v3783_v3  ;;  %vm2390_vm13 = vweird.f32 %v4153_v39  ;;  %vm2372_vm0 = vmor %vm2370_vm14, %vm2371_vm12  ;;  %vm2409_vm5 = vweird.f32 %v5191_v59 }
 0x310   :  { %v2459_v7 = vpop.f32.mrf.mxu2  ;;  %v2472_v14 = vpop.f32.mrf.mxu3  ;;  %v2367_v55 = vsub.f32 1.0, %v2366_v41  ;;  %4160 = vtanh.f32 %v2359_v26  ;;  %vm2391_vm2 = vmor %vm2389_vm15, %vm2390_vm13  ;;  %v2413_v38 = vand.u32 2147483647, %v5191_v59  ;;  %v2416_v46 = vor.u32 1.1754944e-38, %v2415_v49 }
 0x311   :  { %v2479_v28 = vadd.f32 %v2472_v14, %v371_v8  ;;  %v2435_v63 = vpop.f32.mrf.mxu0  ;;  %v2448_v6 = vpop.f32.mrf.mxu1  ;;  %v2386_v11 = vsub.f32 1.0, %v2385_v1  ;;  %v2478_v57 = vadd.f32 %v2459_v7, %v352_v23 }
 0x312   :  { %v2368_v34 = vmul.f32 %v4151_v62, %v2367_v55  ;;  %vm2414_vm9 = vcmp.eq.f32.partialorder %v2413_v38, 8.507059e+37 }
 0x313   :  { %v3784_v58 = vmul.f32 -1.442695, %v2479_v28  ;;  %v4155_v42 = vpop.eup %4154  ;;  %v2387_v45 = vmul.f32 %v4153_v39, %v2386_v11 }
 0x314   :  { %v5200_v61 = vpop.eup %4156  ;;  %v2369_v17 = vadd.f32 %v4151_v62, %v2368_v34  ;;  %v5203_v18 = vadd.f32 1.0, %v4155_v42 }
 0x315   :  { %4162 = vpow2.f32 %v3784_v58  ;;  %v4159_v35 = vpop.eup %4158  ;;  %v2388_v56 = vadd.f32 %v4153_v39, %v2387_v45  ;;  %v2405_v9 = vmul.f32 %v5200_v61, %v5191_v59  ;;  %vm2410_vm4 = vweird.f32 %v5200_v61 }
 0x316   :  { %v2373_v21 = vsel %vm2372_vm0, %v4151_v62, %v2369_v17  ;;  %4164 = vrcp.f32 %v5203_v18  ;;  %v5208_v44 = vadd.f32 1.0, %v4159_v35  ;;  %v4161_v10 = vpop.eup %4160  ;;  %vm5228_vm6 = vmor %vm2409_vm5, %vm2410_vm4  ;;  %v2495_v26 = vand.u32 2147483648, %v5203_v18 }
 0x317   :  { %v2378_v47 = vsel %vm2375_vm1, %v2377_v51, %v2373_v21  ;;  %v2392_v12 = vsel %vm2391_vm2, %v4153_v39, %v2388_v56  ;;  %v2406_v60 = vsub.f32 1.0, %v2405_v9  ;;  %v2493_v59 = vand.u32 2147483647, %v5203_v18 }
 0x318   :  { %v2461_v31 = vpop.f32.mrf.mxu2  ;;  %v2474_v5 = vpop.f32.mrf.mxu3  ;;  %v2397_v25 = vsel %vm2394_vm3, %v2396_v37, %v2392_v12  ;;  %v2420_v4 = vmul.f32 %v4161_v10, %v2378_v47  ;;  %4166 = vrcp.f32 %v5208_v44  ;;  %v2514_v41 = vand.u32 2147483648, %v5208_v44 }
 0x319   :  { %v2419_v20 = vmul.f32 %v2397_v25, %v5050_v19  ;;  %v2407_v30 = vmul.f32 %v5200_v61, %v2406_v60  ;;  %vm2489_vm8 = vweird.f32 %v5203_v18  ;;  %v2512_v1 = vand.u32 2147483647, %v5208_v44  ;;  %v4053_v25 = vld [vmem:[%s5292_s5 + $0x38] sm:$0xff] }
 0x31a   :  { %vm2508_vm11 = vweird.f32 %v5208_v44  ;;  %v2496_v6 = vor.u32 1.1754944e-38, %v2495_v26  ;;  %vm2494_vm13 = vcmp.eq.f32.partialorder %v2493_v59, 8.507059e+37  ;;  %v2515_v58 = vor.u32 1.1754944e-38, %v2514_v41  ;;  %v4048_v26 = vld [vmem:[%s5292_s5 + $0x10] sm:$0xff] }
 0x31b   :  { %v4163_v0 = vpop.eup %4162  ;;  %v5215_v36 = vadd.f32 %v2420_v4, %v2419_v20  ;;  %v2408_v29 = vadd.f32 %v5200_v61, %v2407_v30  ;;  %vm2513_vm15 = vcmp.eq.f32.partialorder %v2512_v1, 8.507059e+37  ;;  %v4052_v30 = vld [vmem:[%s5292_s5 + $0x30] sm:$0xff] }
 0x31c   :  { %v5217_v48 = vadd.f32 1.0, %v4163_v0  ;;  %v4165_v15 = vpop.eup %4164 }
 0x31d   :  { %4168 = vtanh.f32 %v5215_v36  ;;  %v2485_v19 = vmul.f32 %v4165_v15, %v5203_v18  ;;  %v2412_v39 = vsel %vm5228_vm6, %v5200_v61, %v2408_v29  ;;  %vm2490_vm7 = vweird.f32 %v4165_v15 }
 0x31e   :  { %v4167_v33 = vpop.eup %4166  ;;  %4170 = vrcp.f32 %v5217_v48  ;;  %v2417_v28 = vsel %vm2414_vm9, %v2416_v46, %v2412_v39  ;;  %vm2491_vm12 = vmor %vm2489_vm8, %vm2490_vm7  ;;  %v2534_v37 = vand.u32 2147483648, %v5217_v48  ;;  %vm2528_vm1 = vweird.f32 %v5217_v48 }
 0x31f   :  { %v2486_v50 = vsub.f32 1.0, %v2485_v19  ;;  %v2504_v3 = vmul.f32 %v4167_v33, %v5208_v44  ;;  %4172 = vtanh.f32 %v2478_v57  ;;  %vm2509_vm10 = vweird.f32 %v4167_v33 }
 0x320   :  { %vm2510_vm14 = vmor %vm2508_vm11, %vm2509_vm10  ;;  %v2532_v21 = vand.u32 2147483647, %v5217_v48  ;;  %v2535_v10 = vor.u32 1.1754944e-38, %v2534_v37 }
 0x321   :  { %v2505_v27 = vsub.f32 1.0, %v2504_v3  ;;  %v2487_v8 = vmul.f32 %v4165_v15, %v2486_v50  ;;  %v4049_v50 = vld [vmem:[%s5292_s5 + $0x18] sm:$0xff] }
 0x322   :  { %vm2533_vm3 = vcmp.eq.f32.partialorder %v2532_v21, 8.507059e+37 }
 0x323   :  { %v4169_v7 = vpop.eup %4168  ;;  %v2506_v14 = vmul.f32 %v4167_v33, %v2505_v27  ;;  %v2488_v55 = vadd.f32 %v4165_v15, %v2487_v8 }
 0x324   :  { %v4171_v63 = vpop.eup %4170  ;;  %v2423_v11 = vmul.f32 %v4169_v7, %v2417_v28  ;;  %v4046_v7 = vld [vmem:[%s5292_s5] sm:$0xff] }
 0x325   :  { %v2492_v16 = vsel %vm2491_vm12, %v4165_v15, %v2488_v55  ;;  %v2507_v2 = vadd.f32 %v4167_v33, %v2506_v14  ;;  %v2524_v22 = vmul.f32 %v4171_v63, %v5217_v48  ;;  %v4173_v34 = vpop.eup %4172  ;;  %vm2529_vm0 = vweird.f32 %v4171_v63  ;;  %v4050_v15 = vld [vmem:[%s5292_s5 + $0x20] sm:$0xff] }
 0x326   :  { %v2497_v42 = vsel %vm2494_vm13, %v2496_v6, %v2492_v16  ;;  %v2544_v45 = vpack.c.bf16 %v2423_v11, %v2423_v11  ;;  %vm2530_vm2 = vmor %vm2528_vm1, %vm2529_vm0 }
 0x327   :  { %v2511_v54 = vsel %vm2510_vm14, %v4167_v33, %v2507_v2  ;;  %v2539_v61 = vmul.f32 %v4173_v34, %v2497_v42  ;;  %v2525_v17 = vsub.f32 1.0, %v2524_v22 }
 0x328   :  { %v2516_v18 = vsel %vm2513_vm15, %v2515_v58, %v2511_v54  ;;  %2553 = vmatmul.bf16.vlgmr.msrb.gmra.mxu0 %v2544_v45  ;;  %2566 = vmatmul.bf16.vlgmr.msrb.gmra.mxu1 %v2544_v45 }
 0x329   :  { %v2538_v35 = vmul.f32 %v2516_v18, %v5081_v32  ;;  %v2526_v51 = vmul.f32 %v4171_v63, %v2525_v17  ;;  %2579 = vmatmul.bf16.vlgmr.msrb.gmra.mxu2 %v2544_v45  ;;  %2592 = vmatmul.bf16.vlgmr.msrb.gmra.mxu3 %v2544_v45 }
 0x32a   :  { %2785 = vmatpush.bf16.msrb.mxu0 %v4053_v25 }
 0x32b   :  { %v2540_v56 = vadd.f32 %v2539_v61, %v2538_v35  ;;  %v2527_v9 = vadd.f32 %v4171_v63, %v2526_v51 }
 0x32d   :  { %4174 = vtanh.f32 %v2540_v56  ;;  %v2531_v44 = vsel %vm2530_vm2, %v4171_v63, %v2527_v9 }
 0x32e   :  { %v2536_v12 = vsel %vm2533_vm3, %v2535_v10, %v2531_v44  ;;  %2786 = vmatpush.bf16.msrb.mxu0 %v4052_v30 }
 0x332   :  { %2787 = vmatpush.bf16.msrb.mxu0 %v4051_v40 }
 0x333   :  { %v4175_v47 = vpop.eup %4174 }
 0x334   :  { %v2542_v32 = vmul.f32 %v4175_v47, %v2536_v12 }
 0x336   :  { %v2543_v60 = vpack.c.bf16 %v2542_v32, %v2542_v32  ;;  %2788 = vmatpush.bf16.msrb.mxu0 %v4050_v15 }
 0x338   :  { %2605 = vmatmul.bf16.vlgmr.msra.gmra.mxu0 %v2543_v60  ;;  %2618 = vmatmul.bf16.vlgmr.msra.gmra.mxu1 %v2543_v60 }
 0x339   :  { %2631 = vmatmul.bf16.vlgmr.msra.gmra.mxu2 %v2543_v60  ;;  %2644 = vmatmul.bf16.vlgmr.msra.gmra.mxu3 %v2543_v60 }
 0x33a   :  { %2789 = vmatpush.bf16.msrb.mxu0 %v4049_v50 }
 0x33e   :  { %2790 = vmatpush.bf16.msrb.mxu0 %v4048_v26 }
 0x3a5   :  { %v2554_v31 = vpop.f32.mrf.mxu0  ;;  %v2567_v5 = vpop.f32.mrf.mxu1 }
 0x3ac   :  { %v2580_v4 = vpop.f32.mrf.mxu2  ;;  %v2593_v20 = vpop.f32.mrf.mxu3 }
 0x3ad   :  { %v2556_v0 = vpop.f32.mrf.mxu0  ;;  %v2569_v13 = vpop.f32.mrf.mxu1 }
 0x3b4   :  { %v2582_v23 = vpop.f32.mrf.mxu2  ;;  %v2595_v48 = vpop.f32.mrf.mxu3 }
 0x3b5   :  { %v2606_v49 = vpop.f32.mrf.mxu0  ;;  %v2619_v57 = vpop.f32.mrf.mxu1 }
 0x3b6   :  { %v2607_v29 = vadd.f32 %v2606_v49, %v2554_v31  ;;  %v2620_v19 = vadd.f32 %v2619_v57, %v2567_v5 }
 0x3b8   :  { %v2649_v33 = vadd.f32 %v2607_v29, %v5651_v53  ;;  %v2650_v38 = vadd.f32 %v2620_v19, %v5652_v43  ;;  %v4047_v43 = vld [vmem:[%s5292_s5 + $0x8] sm:$0xff] }
 0x3b9   :  { %2791 = vmatpush.bf16.msrb.mxu0 %v4047_v43 }
 0x3ba   :  { %v3785_v3 = vmul.f32 -1.442695, %v2649_v33  ;;  %v3786_v62 = vmul.f32 -1.442695, %v2650_v38 }
 0x3bc   :  { %4176 = vpow2.f32 %v3785_v3  ;;  %v2632_v39 = vpop.f32.mrf.mxu2  ;;  %v2645_v46 = vpop.f32.mrf.mxu3 }
 0x3bd   :  { %4178 = vpow2.f32 %v3786_v62  ;;  %v2646_v27 = vadd.f32 %v2645_v46, %v2593_v20  ;;  %v2608_v8 = vpop.f32.mrf.mxu0  ;;  %v2621_v53 = vpop.f32.mrf.mxu1  ;;  %2792 = vmatpush.bf16.msrb.mxu0 %v4046_v7  ;;  %v2633_v11 = vadd.f32 %v2632_v39, %v2580_v4 }
 0x3bf   :  { %v2652_v59 = vadd.f32 %v2646_v27, %v5653_v24  ;;  %v2651_v22 = vadd.f32 %v2633_v11, %v5658_v52 }
 0x3c1   :  { %v3787_v41 = vmul.f32 -1.442695, %v2652_v59 }
 0x3c2   :  { %v4177_v1 = vpop.eup %4176 }
 0x3c3   :  { %v4179_v14 = vpop.eup %4178  ;;  %v2656_v55 = vadd.f32 1.0, %v4177_v1  ;;  %4180 = vpow2.f32 %v3787_v41 }
 0x3c4   :  { %v2675_v28 = vadd.f32 1.0, %v4179_v14  ;;  %v2634_v63 = vpop.f32.mrf.mxu2  ;;  %v2647_v6 = vpop.f32.mrf.mxu3 }
 0x3c5   :  { %4182 = vrcp.f32 %v2656_v55  ;;  %v2668_v61 = vand.u32 2147483648, %v2656_v55  ;;  %v2666_v35 = vand.u32 2147483647, %v2656_v55  ;;  %vm2662_vm6 = vweird.f32 %v2656_v55 }
 0x3c6   :  { %4184 = vrcp.f32 %v2675_v28  ;;  %v2687_v17 = vand.u32 2147483648, %v2675_v28  ;;  %v2685_v56 = vand.u32 2147483647, %v2675_v28  ;;  %vm2681_vm7 = vweird.f32 %v2675_v28 }
 0x3c7   :  { %v2669_v52 = vor.u32 1.1754944e-38, %v2668_v61  ;;  %vm2667_vm10 = vcmp.eq.f32.partialorder %v2666_v35, 8.507059e+37 }
 0x3c8   :  { %v2688_v10 = vor.u32 1.1754944e-38, %v2687_v17  ;;  %vm2686_vm11 = vcmp.eq.f32.partialorder %v2685_v56, 8.507059e+37 }
 0x3c9   :  { %v4181_v16 = vpop.eup %4180 }
 0x3ca   :  { %v2695_v2 = vadd.f32 1.0, %v4181_v16 }
 0x3cb   :  { %v4183_v24 = vpop.eup %4182 }
 0x3cc   :  { %v4185_v34 = vpop.eup %4184  ;;  %v2658_v58 = vmul.f32 %v4183_v24, %v2656_v55  ;;  %4186 = vrcp.f32 %v2695_v2  ;;  %vm2663_vm4 = vweird.f32 %v4183_v24  ;;  %v2707_v13 = vand.u32 2147483648, %v2695_v2 }
 0x3cd   :  { %v2677_v42 = vmul.f32 %v4185_v34, %v2675_v28  ;;  %4188 = vtanh.f32 %v2651_v22  ;;  %vm2682_vm5 = vweird.f32 %v4185_v34  ;;  %vm2664_vm8 = vmor %vm2662_vm6, %vm2663_vm4  ;;  %vm2701_vm13 = vweird.f32 %v2695_v2 }
 0x3ce   :  { %v2659_v45 = vsub.f32 1.0, %v2658_v58  ;;  %vm2683_vm9 = vmor %vm2681_vm7, %vm2682_vm5  ;;  %v2705_v40 = vand.u32 2147483647, %v2695_v2  ;;  %v2708_v48 = vor.u32 1.1754944e-38, %v2707_v13 }
 0x3cf   :  { %v2678_v54 = vsub.f32 1.0, %v2677_v42 }
 0x3d0   :  { %v2660_v18 = vmul.f32 %v4183_v24, %v2659_v45  ;;  %vm2706_vm15 = vcmp.eq.f32.partialorder %v2705_v40, 8.507059e+37 }
 0x3d1   :  { %v2679_v51 = vmul.f32 %v4185_v34, %v2678_v54 }
 0x3d2   :  { %v4187_v9 = vpop.eup %4186  ;;  %v2661_v37 = vadd.f32 %v4183_v24, %v2660_v18 }
 0x3d3   :  { %v2680_v21 = vadd.f32 %v4185_v34, %v2679_v51  ;;  %v2697_v44 = vmul.f32 %v4187_v9, %v2695_v2  ;;  %v4189_v12 = vpop.eup %4188  ;;  %vm2702_vm12 = vweird.f32 %v4187_v9 }
 0x3d4   :  { %v2665_v47 = vsel %vm2664_vm8, %v4183_v24, %v2661_v37  ;;  %vm2703_vm14 = vmor %vm2701_vm13, %vm2702_vm12 }
 0x3d5   :  { %v2670_v32 = vsel %vm2667_vm10, %v2669_v52, %v2665_v47  ;;  %v2684_v60 = vsel %vm2683_vm9, %v4185_v34, %v2680_v21  ;;  %v2698_v31 = vsub.f32 1.0, %v2697_v44 }
 0x3d6   :  { %v2689_v5 = vsel %vm2686_vm11, %v2688_v10, %v2684_v60  ;;  %v2712_v25 = vmul.f32 %v4189_v12, %v2670_v32 }
 0x3d7   :  { %v2711_v4 = vmul.f32 %v2689_v5, %v5215_v36  ;;  %v2699_v20 = vmul.f32 %v4187_v9, %v2698_v31  ;;  %v4063_v36 = vld [vmem:[%s5293_s6] ss:$0 sm:$0xff] }
 0x3d9   :  { %v2713_v30 = vadd.f32 %v2712_v25, %v2711_v4  ;;  %v2700_v0 = vadd.f32 %v4187_v9, %v2699_v20 }
 0x3db   :  { %4190 = vtanh.f32 %v2713_v30  ;;  %v2704_v23 = vsel %vm2703_vm14, %v4187_v9, %v2700_v0 }
 0x3dc   :  { %v2709_v49 = vsel %vm2706_vm15, %v2708_v48, %v2704_v23 }
 0x3e1   :  { %v4191_v15 = vpop.eup %4190 }
 0x3e2   :  { %v2715_v57 = vmul.f32 %v4191_v15, %v2709_v49 }
 0x3e4   :  { %v2716_v29 = vpack.c.bf16 %v2715_v57, %v2715_v57 }
 0x3e6   :  { %2793 = vmatmul.bf16.vlgmr.msrb.gmra.mxu0 %v2716_v29 }
 0x463   :  { %v2794_v19 = vpop.f32.mrf.mxu0 }
 0x464   :  { %v2795_v33 = vadd.f32 %v4063_v36, %v2794_v19 }
 0x466   :  { %2798 = vmax.xlane.f32.xlu0 %v2795_v33 }
 0x46b   :  { %v2796_v38 = vpop.f32.mrf.mxu0 }
 0x4d9   :  { %v2799_v50 = vpop.xlane.xlu0 %2798 }
 0x4da   :  { %v2800_v3 = vsub.f32 %v2795_v33, %v2799_v50 }
 0x4dc   :  { %v2801_v62 = vmul.f32 1.442695, %v2800_v3 }
 0x4de   :  { %4192 = vpow2.f32 %v2801_v62 }
 0x4e4   :  { %v4193_v26 = vpop.eup %4192 }
 0x4e5   :  { %2803 = vadd.xlane.f32.xlu0 %v4193_v26 }
 0x558   :  { %v2804_v39 = vpop.xlane.xlu0 %2803 }
 0x559   :  { %4194 = vlog2.f32 %v2804_v39 }
 0x55f   :  { %v4195_v46 = vpop.eup %4194 }
 0x560   :  { %v2806_v27 = vmul.f32 0.6931472, %v4195_v46 }
 0x562   :  { %v2807_v8 = vsub.f32 %v2800_v3, %v2806_v27 }
 0x564   :  { %2808 = vst [vmem:[#allocation8] sm:$0xff] %v2807_v8 }
 0x565   :  { %2819 = dma.vmem_to_hbm [thread:$0]  %s2815_s8, 128, %s2817_s13, [#allocation4]  }
 0x566   :  { %4344 = dma.done.wait [#allocation4], 128  }
 0x567   :  { %4345 = vsyncadd [#allocation4], 4294967168 }
 0x568   :  { %4346 = dma.done.wait [#allocation10], 256  }
 0x569   :  { %4347 = vsyncadd [#allocation10], 4294967040 }
 0x56a   :  { %2854 = vsyncpa [#allocation3], 1 }
 0x56b   :  { %2855 = vsyncpa [#allocation6], 1 }
 0x56c   :  { %2856 = vsyncpa [#allocation4], 1 }
 0x56d   :  { %2857 = vsyncpa [#allocation10], 1 }

</bundles_post_ra>
